<compile_context>
chip_gen: v6e
topology: v6e:2x2x1
jax: 0.10.0
libtpu: 0.0.40
codegen_flags: <defaults>
</compile_context>

<pallas_src>
import functools

import jax
import jax.numpy as jnp
from jax.experimental import pallas as pl
from jax.experimental.pallas import tpu as pltpu


# bf16 MXU inputs + fp32 accumulation everywhere (reviewer-endorsed).  Near-tie sort keys may round
# differently than a pure-fp32 reference, but the module semantics (sorting the computed values)
# are preserved.
_DOT_DTYPE = jnp.bfloat16


def _round_up(x, m):
    return -(-x // m) * m


@functools.lru_cache(maxsize=None)
def _vmem_limit_bytes():
    """Generation-aware scoped-VMEM limit (v5e/v6e: 128 MiB physical, v7x: 64 MiB)."""
    cap = 64 * 1024 * 1024
    try:
        info = pltpu.get_tpu_info()
        cap = int(getattr(info, "vmem_capacity_bytes", cap))
    except Exception:
        pass
    return max(32 * 1024 * 1024, min(cap * 3 // 4, 100 * 1024 * 1024))


def _cparams(dims):
    return pltpu.CompilerParams(dimension_semantics=dims,
                                vmem_limit_bytes=_vmem_limit_bytes())


def _pick_tile(size, target, align):
    """Largest `align`-multiple tile <= target that divides `size`, else the full dim."""
    if size <= target:
        return size
    t = (target // align) * align
    while t >= align:
        if size % t == 0:
            return t
        t -= align
    return size


# ----------------------------------------------------------------------------
# Pallas kernels
# ----------------------------------------------------------------------------

def _matmul_kernel(x_ref, w_ref, o_ref, acc_ref):
    """Tiled (M,K)@(K,N) with fp32 VMEM accumulator over the K grid axis."""
    @pl.when(pl.program_id(2) == 0)
    def _():
        acc_ref[...] = jnp.zeros_like(acc_ref)

    acc_ref[...] += jnp.dot(x_ref[...].astype(_DOT_DTYPE),
                            w_ref[...].astype(_DOT_DTYPE),
                            preferred_element_type=jnp.float32)

    @pl.when(pl.program_id(2) == pl.num_programs(2) - 1)
    def _():
        o_ref[...] = acc_ref[...].astype(o_ref.dtype)


def _conv3x3_bn_silu_kernel(xs_ref, w_ref, s_ref, b_ref, o_ref, lhs_ref, *, th, Wp, Cin):
    """3x3 'same' conv over one row strip; im2col fused as a single stacked-K dot.

    xs_ref: (1, (th+3)*Wp, Cin) row-flattened zero-padded strip (1-row halo top/bottom plus one
    dummy row so every shifted slice stays in bounds).  For tap (di,dj) the needed rows are the
    contiguous slab starting at di*Wp+dj; the 9 shifted slabs are packed side by side into the
    bf16 VMEM scratch `lhs_ref` and contracted in ONE (th*Wp, 9*Cin)@(9*Cin, tco) dot (one MXU
    fill/drain, no accumulator read-modify-write).  Folded-BN affine + NaN-safe SiLU in-kernel.
    The 2 garbage columns per output row are trimmed by the wrapper.
    """
    nrows = th * Wp
    t = 0
    for di in range(3):
        for dj in range(3):
            off = di * Wp + dj
            lhs_ref[:, t * Cin:(t + 1) * Cin] = (
                xs_ref[0, off:off + nrows, :].astype(lhs_ref.dtype))
            t += 1
    y = jnp.dot(lhs_ref[...], w_ref[...], preferred_element_type=jnp.float32)
    y = y * s_ref[...] + b_ref[...]
    # NaN-safe SiLU: y * sigmoid(y)
    ey = jnp.exp(-jnp.abs(y))
    y = y * jnp.where(y >= 0.0, 1.0 / (1.0 + ey), ey / (1.0 + ey))
    o_ref[...] = y[None].astype(o_ref.dtype)


def _dwconv3x3_kernel(xp_ref, w_ref, o_ref, *, H, W):
    """Depthwise 3x3, stride 1.  xp: (1,H+2,W+2,tc) padded, w: (9,tc), out: (1,H,W,tc)."""
    xp = xp_ref[...]
    w = w_ref[...]
    acc = jnp.zeros(o_ref.shape, jnp.float32)
    t = 0
    for di in range(3):
        for dj in range(3):
            acc = acc + xp[:, di:di + H, dj:dj + W, :] * w[t]
            t += 1
    o_ref[...] = acc.astype(o_ref.dtype)


def _attn_kernel(q_ref, kt_ref, v_ref, t_ref, o_ref):
    """DHSA attention over a group of (batch*head) slices.

    q,v: (G, R, HWp) bf16; kt: (G, HWp, R) bf16 (k pre-transposed in the wrapper so both einsums
    contract lhs-last vs rhs-second-minor -> no in-kernel XLU transpose).  L2-normalize q,k along
    hw, attn = (q k^T)*temp, softmax_1 = exp(a)/(1+sum exp(a)) in max-stabilized form, out=attn@v.
    The hw zero-padding is exact for the norms, attn and the valid output columns.
    """
    qf = q_ref[...].astype(jnp.float32)
    kf = kt_ref[...].astype(jnp.float32)
    temp = t_ref[...]                                        # (G, 1, 1)

    # torch.nn.functional.normalize(x, dim=-1), eps=1e-12
    qn = (qf * jax.lax.rsqrt(jnp.maximum(jnp.sum(qf * qf, -1, keepdims=True), 1e-24))
          ).astype(_DOT_DTYPE)
    kn = (kf * jax.lax.rsqrt(jnp.maximum(jnp.sum(kf * kf, 1, keepdims=True), 1e-24))
          ).astype(_DOT_DTYPE)

    attn = jnp.einsum('grh,ghs->grs', qn, kn,
                      preferred_element_type=jnp.float32) * temp

    # stabilized softmax_1: exp(a - m) / (exp(-m) + sum exp(a - m)),  m = max(max_j a_j, 0)
    m = jnp.maximum(jnp.max(attn, axis=-1, keepdims=True), 0.0)
    e = jnp.exp(attn - m)
    denom = jnp.sum(e, axis=-1, keepdims=True) + jnp.exp(-m)
    p = (e * pl.reciprocal(denom, approx=True)).astype(_DOT_DTYPE)

    out = jnp.einsum('grs,gsh->grh', p, v_ref[...],
                     preferred_element_type=jnp.float32)
    o_ref[...] = out.astype(o_ref.dtype)


# ----------------------------------------------------------------------------
# Pallas wrappers
# ----------------------------------------------------------------------------

def matmul_plain(x, w):
    """(M,K)@(K,N) with tiles; dims are zero-padded up to the tile (never a full-dim fallback)."""
    M, K = x.shape
    N = w.shape[1]
    tm = min(256, _round_up(M, 8))
    tk = min(512, _round_up(K, 128))
    tn = min(256, _round_up(N, 128))
    Mp, Kp, Np = _round_up(M, tm), _round_up(K, tk), _round_up(N, tn)
    xq = jnp.pad(x, ((0, Mp - M), (0, Kp - K))) if (Mp, Kp) != (M, K) else x
    wq = jnp.pad(w, ((0, Kp - K), (0, Np - N))) if (Kp, Np) != (K, N) else w
    out = pl.pallas_call(
        _matmul_kernel,
        out_shape=jax.ShapeDtypeStruct((Mp, Np), jnp.float32),
        grid=(Mp // tm, Np // tn, Kp // tk),
        in_specs=[pl.BlockSpec((tm, tk), lambda i, j, k: (i, k)),
                  pl.BlockSpec((tk, tn), lambda i, j, k: (k, j))],
        out_specs=pl.BlockSpec((tm, tn), lambda i, j, k: (i, j)),
        scratch_shapes=[pltpu.VMEM((tm, tn), jnp.float32)],
        compiler_params=_cparams(("parallel", "parallel", "arbitrary")),
    )(xq, wq)
    if (Mp, Np) != (M, N):
        out = out[:M, :N]
    return out


def conv3x3_bn_silu(x, w, scale, bias):
    """3x3 'same' conv (no bias) + folded BN + SiLU.  x: (B,H,W,Cin) NHWC, w: (Cout,Cin,3,3)."""
    B, H, W, Cin = x.shape
    Cout = w.shape[0]
    Wp = W + 2
    tco = _pick_tile(Cout, 256, 128)

    # Row-strip height: bound per-step VMEM (double-buffered input strip + stacked-K lhs + output).
    budget = _vmem_limit_bytes() // 3
    per_row = Wp * 4 * (2 * Cin + 9 * Cin + 3 * tco)
    th = max(1, budget // max(per_row, 1))
    if th >= 8:
        th = (th // 8) * 8
    th = min(th, H)
    n_strips = -(-H // th)
    Hpad = n_strips * th

    # TODO(synk): the zero pad + (for n_strips>1) halo'd strip gather are XLA-side HBM copies;
    # folding them into the kernel (interior-only DMA) would save one activation round trip.
    xpad = jnp.pad(x, ((0, 0), (1, Hpad - H + 2), (1, 1), (0, 0)))      # (B, Hpad+3, Wp, Cin)
    if n_strips == 1:
        xs = xpad.reshape(B, (th + 3) * Wp, Cin)
    else:
        rid = jnp.arange(n_strips)[:, None] * th + jnp.arange(th + 3)[None, :]
        xs = xpad[:, rid].reshape(B * n_strips, (th + 3) * Wp, Cin)

    # tap-major stacked-K weights, pre-cast to bf16 (halves the weight DMA)
    w9 = jnp.transpose(w, (2, 3, 1, 0)).reshape(9 * Cin, Cout).astype(_DOT_DTYPE)

    kern = functools.partial(_conv3x3_bn_silu_kernel, th=th, Wp=Wp, Cin=Cin)
    out = pl.pallas_call(
        kern,
        out_shape=jax.ShapeDtypeStruct((B * n_strips, th * Wp, Cout), jnp.float32),
        grid=(B * n_strips, Cout // tco),
        in_specs=[
            pl.BlockSpec((1, (th + 3) * Wp, Cin), lambda s, j: (s, 0, 0)),
            pl.BlockSpec((9 * Cin, tco), lambda s, j: (0, j)),
            pl.BlockSpec((1, tco), lambda s, j: (0, j)),
            pl.BlockSpec((1, tco), lambda s, j: (0, j)),
        ],
        out_specs=pl.BlockSpec((1, th * Wp, tco), lambda s, j: (s, 0, j)),
        scratch_shapes=[pltpu.VMEM((th * Wp, 9 * Cin), jnp.bfloat16)],
        compiler_params=_cparams(("parallel", "parallel")),
    )(xs, w9, scale, bias)
    # TODO(synk): the 2 garbage columns per flattened row are trimmed here by XLA (one extra output
    # round trip); trimming in-kernel needs a (th*Wp)->(th,Wp) sublane reshape Mosaic can't express.
    return out.reshape(B, Hpad, Wp, Cout)[:, :H, :W, :]


def dwconv3x3(x, w_taps):
    """Depthwise 3x3 'same' conv.  x: (B,H,W,C) NHWC, w_taps: (9, C)."""
    B, H, W, C = x.shape
    xp = jnp.pad(x, ((0, 0), (1, 1), (1, 1), (0, 0)))
    Hp, Wp = H + 2, W + 2
    budget = _vmem_limit_bytes() // 4
    per_ch = 4 * 2 * (Hp * Wp + H * W)            # f32, double-buffered in + out
    target = max(128, min(512, (budget // max(per_ch, 1)) // 128 * 128))
    tc = _pick_tile(C, target, 128)
    kern = functools.partial(_dwconv3x3_kernel, H=H, W=W)
    return pl.pallas_call(
        kern,
        out_shape=jax.ShapeDtypeStruct((B, H, W, C), jnp.float32),
        grid=(B, C // tc),
        in_specs=[pl.BlockSpec((1, Hp, Wp, tc), lambda b, j: (b, 0, 0, j)),
                  pl.BlockSpec((9, tc), lambda b, j: (0, j))],
        out_specs=pl.BlockSpec((1, H, W, tc), lambda b, j: (b, 0, 0, j)),
        compiler_params=_cparams(("parallel", "parallel")),
    )(xp, w_taps)


def _choose_head_group(BH, R, HWp, budget_bytes):
    # bf16 q/kt/v/out double-buffered IO + fp32 in-kernel working set (q/k/out copies, attn/e/p).
    io = 2 * 2 * 4 * R * HWp
    work = 4 * 4 * R * HWp + 3 * 4 * R * R
    per = io + work
    g = max(1, min(BH, int(budget_bytes // max(per, 1))))
    if BH >= 2:
        g = min(g, max(1, BH // 2))   # keep >= 2 parallel grid steps so both v7x TCs get work
    while g > 1 and BH % g:
        g -= 1
    return g


def attention_pallas(q, kt, v, temp_bh):
    """q,v: (BH, R, HWp) bf16; kt: (BH, HWp, R) bf16; temp: (BH,1,1) f32 -> (BH, R, HWp) bf16."""
    BH, R, HWp = q.shape
    G = _choose_head_group(BH, R, HWp, _vmem_limit_bytes() // 2)
    return pl.pallas_call(
        _attn_kernel,
        out_shape=jax.ShapeDtypeStruct((BH, R, HWp), jnp.bfloat16),
        grid=(BH // G,),
        in_specs=[
            pl.BlockSpec((G, R, HWp), lambda i: (i, 0, 0)),
            pl.BlockSpec((G, HWp, R), lambda i: (i, 0, 0)),
            pl.BlockSpec((G, R, HWp), lambda i: (i, 0, 0)),
            pl.BlockSpec((G, 1, 1), lambda i: (i, 0, 0)),
        ],
        out_specs=pl.BlockSpec((G, R, HWp), lambda i: (i, 0, 0)),
        compiler_params=_cparams(("parallel",)),
    )(q, kt, v, temp_bh)


# ----------------------------------------------------------------------------
# Module forward (JAX glue around the Pallas kernels) — channels-last inside
# ----------------------------------------------------------------------------

def reshape_attn(q, k, v, temp, ifBox, num_heads):
    """q,k,v: (b, hw_total, c) channels-last.  Returns (b, hw_total, c)."""
    b, hwt0, c = q.shape
    factor = num_heads
    cp = c // num_heads
    pad_amt = (-hwt0) % factor
    if pad_amt:
        padc = ((0, 0), (0, pad_amt), (0, 0))
        q, k, v = jnp.pad(q, padc), jnp.pad(k, padc), jnp.pad(v, padc)
    hwt = hwt0 + pad_amt
    hw = hwt // factor
    hwp = _round_up(hw, 128)      # lane-dense last dim for the attention kernel (zeros are exact)

    def to_5d(t):
        # torch: 'b (head c) (factor hw) -> b head (c factor) hw'   (ifBox)
        #        'b (head c) (hw factor) -> b head (c factor) hw'   (else)
        if ifBox:
            t = jnp.transpose(t.reshape(b, factor, hw, num_heads, cp), (0, 3, 4, 1, 2))
        else:
            t = jnp.transpose(t.reshape(b, hw, factor, num_heads, cp), (0, 3, 4, 2, 1))
        return t                                            # (b, head, cp, factor, hw)

    q5, k5, v5 = to_5d(q), to_5d(k), to_5d(v)
    R = cp * factor
    qh = q5.reshape(b * num_heads, R, hw)
    vh = v5.reshape(b * num_heads, R, hw)
    kt = jnp.transpose(k5, (0, 1, 4, 2, 3)).reshape(b * num_heads, hw, R)   # pre-transposed k
    if hwp != hw:
        qh = jnp.pad(qh, ((0, 0), (0, 0), (0, hwp - hw)))
        vh = jnp.pad(vh, ((0, 0), (0, 0), (0, hwp - hw)))
        kt = jnp.pad(kt, ((0, 0), (0, hwp - hw), (0, 0)))
    # bf16 HBM for q/k/v/out halves the attention DMA bytes (everything is downstream of the sorts)
    qh, kt, vh = qh.astype(jnp.bfloat16), kt.astype(jnp.bfloat16), vh.astype(jnp.bfloat16)

    temp_bh = jnp.tile(temp.reshape(num_heads), (b,)).reshape(b * num_heads, 1, 1)
    oh = attention_pallas(qh, kt, vh, temp_bh)              # (b*head, R, hwp) bf16
    oh = oh[:, :, :hw].astype(jnp.float32)

    o = oh.reshape(b, num_heads, cp, factor, hw)
    if ifBox:
        o = jnp.transpose(o, (0, 3, 4, 1, 2)).reshape(b, hwt, c)
    else:
        o = jnp.transpose(o, (0, 4, 3, 1, 2)).reshape(b, hwt, c)
    if pad_amt:
        o = o[:, :hwt0, :]
    return o


def dhsa_forward_nhwc(x, p, num_heads=4):
    """DHSA forward.  x: (b, h, w, c) NHWC."""
    b, h, w, c = x.shape
    ch = c // 2

    # TODO(synk): data-dependent sort / gather / scatter (torch.sort/gather/scatter) have no clean
    # Pallas TPU equivalent; they run as jnp.argsort / take_along_axis glue between kernels.
    x_half = x[..., :ch]
    idx_h = jnp.argsort(x_half, axis=1)
    x_sort = jnp.take_along_axis(x_half, idx_h, axis=1)
    idx_w = jnp.argsort(x_sort, axis=2)
    x_sort = jnp.take_along_axis(x_sort, idx_w, axis=2)
    x = x.at[..., :ch].set(x_sort)

    # qkv 1x1 conv (tiled Pallas matmul), then depthwise 3x3 conv (Pallas)
    qkv = matmul_plain(x.reshape(b * h * w, c), p['w_qkv']).reshape(b, h, w, 5 * c)
    qkv = dwconv3x3(qkv, p['w_dw'])                          # (b, h, w, 5c)

    # split and sequence-sort (data-dependent glue)
    qkv = qkv.reshape(b, h * w, 5 * c)
    q1, k1, q2, k2, v = [qkv[..., i * c:(i + 1) * c] for i in range(5)]
    idx = jnp.argsort(v, axis=1)
    v = jnp.take_along_axis(v, idx, axis=1)
    q1 = jnp.take_along_axis(q1, idx, axis=1)
    k1 = jnp.take_along_axis(k1, idx, axis=1)
    q2 = jnp.take_along_axis(q2, idx, axis=1)
    k2 = jnp.take_along_axis(k2, idx, axis=1)

    out1 = reshape_attn(q1, k1, v, p['temperature'], True, num_heads)
    out2 = reshape_attn(q2, k2, v, p['temperature'], False, num_heads)

    # torch.scatter with a permutation index == inverse-permutation gather
    inv_idx = jnp.argsort(idx, axis=1)
    out1 = jnp.take_along_axis(out1, inv_idx, axis=1)
    out2 = jnp.take_along_axis(out2, inv_idx, axis=1)
    out = out1 * out2                                        # (b, hw, c)

    # project_out 1x1 conv (tiled Pallas matmul)
    out = matmul_plain(out.reshape(b * h * w, c), p['w_proj']).reshape(b, h, w, c)

    # undo the spatial sorts on the first half of the channels (scatter == inverse permutation)
    out_rep = out[..., :ch]
    inv_w = jnp.argsort(idx_w, axis=2)
    out_rep = jnp.take_along_axis(out_rep, inv_w, axis=2)
    inv_h = jnp.argsort(idx_h, axis=1)
    out_rep = jnp.take_along_axis(out_rep, inv_h, axis=1)
    out = out.at[..., :ch].set(out_rep)
    return out


def bottleneck_forward(x, p, num_heads=4):
    """x: NCHW.  One NCHW->NHWC transpose at entry, one NHWC->NCHW at exit."""
    x_nhwc = jnp.transpose(x, (0, 2, 3, 1))
    y = conv3x3_bn_silu(x_nhwc, p['cv1_w'], p['cv1_scale'], p['cv1_bias'])
    y = conv3x3_bn_silu(y, p['cv2_w'], p['cv2_scale'], p['cv2_bias'])
    y = dhsa_forward_nhwc(y, p, num_heads=num_heads)
    out = x_nhwc + y                                         # shortcut=True and c1 == c2
    return jnp.transpose(out, (0, 3, 1, 2))


# ----------------------------------------------------------------------------
# Deterministic parameter init (synthetic weights; BN in eval mode, folded)
# ----------------------------------------------------------------------------

def init_params(key, c1, c2, e=0.5, num_heads=4):
    c_ = int(c2 * e)
    dim = c2
    ks = jax.random.split(key, 5)
    p = {}
    p['cv1_w'] = 0.2 * jax.random.normal(ks[0], (c_, c1, 3, 3), jnp.float32)   # torch OIHW
    p['cv2_w'] = 0.2 * jax.random.normal(ks[1], (c2, c_, 3, 3), jnp.float32)

    def bn_fold(cn):
        gamma = 1.0 + 0.01 * jnp.arange(cn, dtype=jnp.float32)
        beta = 0.01 * jnp.arange(cn, dtype=jnp.float32)
        mean = jnp.zeros((cn,), jnp.float32)
        var = jnp.ones((cn,), jnp.float32)
        scale = gamma / jnp.sqrt(var + 1e-5)
        bias = beta - mean * scale
        return scale.reshape(1, cn), bias.reshape(1, cn)

    p['cv1_scale'], p['cv1_bias'] = bn_fold(c_)
    p['cv2_scale'], p['cv2_bias'] = bn_fold(c2)

    p['w_qkv'] = 0.2 * jax.random.normal(ks[2], (dim, dim * 5), jnp.float32)   # 1x1 conv (Cin, Cout)
    p['w_dw'] = 0.2 * jax.random.normal(ks[3], (9, dim * 5), jnp.float32)      # depthwise taps (9, C)
    p['w_proj'] = 0.2 * jax.random.normal(ks[4], (dim, dim), jnp.float32)      # 1x1 conv (Cin, Cout)
    p['temperature'] = 1.0 + 0.1 * jnp.arange(num_heads, dtype=jnp.float32)
    return p


if __name__ == "__main__":
    key = jax.random.PRNGKey(0)
    B, C, H, W = 2, 8, 8, 8      # c1 == c2 -> residual add; num_heads=4 divides C; H*W % 4 == 0
    k_x, k_p = jax.random.split(key)
    x = jax.random.normal(k_x, (B, C, H, W), jnp.float32)
    params = init_params(k_p, C, C, e=0.5, num_heads=4)

    fwd = jax.jit(bottleneck_forward)
    out = fwd(x, params)
    jax.block_until_ready(out)
    assert out.shape == (B, C, H, W)
    assert bool(jnp.all(jnp.isfinite(out)))
    print("KERNEL_OK")
</pallas_src>

<mosaic_0001>
module attributes {stable_mosaic.version = 11 : i64} {
  func.func @_conv3x3_bn_silu_kernel(%arg0: i32, %arg1: i32, %arg2: memref<1x110x4xf32, #tpu.memory_space<vmem>>, %arg3: memref<36x8xbf16, #tpu.memory_space<vmem>>, %arg4: memref<1x8xf32, #tpu.memory_space<vmem>>, %arg5: memref<1x8xf32, #tpu.memory_space<vmem>>, %arg6: memref<1x80x8xf32, #tpu.memory_space<vmem>>, %arg7: memref<80x36xbf16, #tpu.memory_space<vmem>>) attributes {dimension_semantics = [#tpu.dimension_semantics<parallel>, #tpu.dimension_semantics<parallel>], iteration_bounds = array<i64: 2, 1>, scalar_prefetch = 0 : i64, scratch_operands = 1 : i64, tpu.core_type = #tpu.core_type<tc>, window_params = [{transform_indices = @transform_0, window_bounds = array<i64: 1, 110, 4>}, {transform_indices = @transform_1, window_bounds = array<i64: 36, 8>}, {transform_indices = @transform_2, window_bounds = array<i64: 1, 8>}, {transform_indices = @transform_3, window_bounds = array<i64: 1, 8>}, {transform_indices = @transform_4, window_bounds = array<i64: 1, 80, 8>}]} {
    %c0 = arith.constant 0 : index
    %c0_0 = arith.constant 0 : index
    %c0_1 = arith.constant 0 : index
    %0 = vector.load %arg2[%c0, %c0_0, %c0_1] : memref<1x110x4xf32, #tpu.memory_space<vmem>>, vector<1x80x4xf32>
    %1 = vector.shape_cast %0 : vector<1x80x4xf32> to vector<80x4xf32>
    %2 = arith.truncf %1 : vector<80x4xf32> to vector<80x4xbf16>
    %c0_2 = arith.constant 0 : index
    %c0_3 = arith.constant 0 : index
    %3 = vector.load %arg7[%c0_2, %c0_3] : memref<80x36xbf16, #tpu.memory_space<vmem>>, vector<80x4xbf16>
    tpu.vector_store %arg7[%c0_2, %c0_3], %2 {strides = array<i32>} : memref<80x36xbf16, #tpu.memory_space<vmem>>, vector<80x4xbf16>,
    %c0_4 = arith.constant 0 : index
    %c1 = arith.constant 1 : index
    %c0_5 = arith.constant 0 : index
    %4 = vector.load %arg2[%c0_4, %c1, %c0_5] : memref<1x110x4xf32, #tpu.memory_space<vmem>>, vector<1x80x4xf32>
    %5 = vector.shape_cast %4 : vector<1x80x4xf32> to vector<80x4xf32>
    %6 = arith.truncf %5 : vector<80x4xf32> to vector<80x4xbf16>
    %c0_6 = arith.constant 0 : index
    %c4 = arith.constant 4 : index
    %7 = vector.load %arg7[%c0_6, %c4] : memref<80x36xbf16, #tpu.memory_space<vmem>>, vector<80x4xbf16>
    tpu.vector_store %arg7[%c0_6, %c4], %6 {strides = array<i32>} : memref<80x36xbf16, #tpu.memory_space<vmem>>, vector<80x4xbf16>,
    %c0_7 = arith.constant 0 : index
    %c2 = arith.constant 2 : index
    %c0_8 = arith.constant 0 : index
    %8 = vector.load %arg2[%c0_7, %c2, %c0_8] : memref<1x110x4xf32, #tpu.memory_space<vmem>>, vector<1x80x4xf32>
    %9 = vector.shape_cast %8 : vector<1x80x4xf32> to vector<80x4xf32>
    %10 = arith.truncf %9 : vector<80x4xf32> to vector<80x4xbf16>
    %c0_9 = arith.constant 0 : index
    %c8 = arith.constant 8 : index
    %11 = vector.load %arg7[%c0_9, %c8] : memref<80x36xbf16, #tpu.memory_space<vmem>>, vector<80x4xbf16>
    tpu.vector_store %arg7[%c0_9, %c8], %10 {strides = array<i32>} : memref<80x36xbf16, #tpu.memory_space<vmem>>, vector<80x4xbf16>,
    %c0_10 = arith.constant 0 : index
    %c10 = arith.constant 10 : index
    %c0_11 = arith.constant 0 : index
    %12 = vector.load %arg2[%c0_10, %c10, %c0_11] : memref<1x110x4xf32, #tpu.memory_space<vmem>>, vector<1x80x4xf32>
    %13 = vector.shape_cast %12 : vector<1x80x4xf32> to vector<80x4xf32>
    %14 = arith.truncf %13 : vector<80x4xf32> to vector<80x4xbf16>
    %c0_12 = arith.constant 0 : index
    %c12 = arith.constant 12 : index
    %15 = vector.load %arg7[%c0_12, %c12] : memref<80x36xbf16, #tpu.memory_space<vmem>>, vector<80x4xbf16>
    tpu.vector_store %arg7[%c0_12, %c12], %14 {strides = array<i32>} : memref<80x36xbf16, #tpu.memory_space<vmem>>, vector<80x4xbf16>,
    %c0_13 = arith.constant 0 : index
    %c11 = arith.constant 11 : index
    %c0_14 = arith.constant 0 : index
    %16 = vector.load %arg2[%c0_13, %c11, %c0_14] : memref<1x110x4xf32, #tpu.memory_space<vmem>>, vector<1x80x4xf32>
    %17 = vector.shape_cast %16 : vector<1x80x4xf32> to vector<80x4xf32>
    %18 = arith.truncf %17 : vector<80x4xf32> to vector<80x4xbf16>
    %c0_15 = arith.constant 0 : index
    %c16 = arith.constant 16 : index
    %19 = vector.load %arg7[%c0_15, %c16] : memref<80x36xbf16, #tpu.memory_space<vmem>>, vector<80x4xbf16>
    tpu.vector_store %arg7[%c0_15, %c16], %18 {strides = array<i32>} : memref<80x36xbf16, #tpu.memory_space<vmem>>, vector<80x4xbf16>,
    %c0_16 = arith.constant 0 : index
    %c12_17 = arith.constant 12 : index
    %c0_18 = arith.constant 0 : index
    %20 = vector.load %arg2[%c0_16, %c12_17, %c0_18] : memref<1x110x4xf32, #tpu.memory_space<vmem>>, vector<1x80x4xf32>
    %21 = vector.shape_cast %20 : vector<1x80x4xf32> to vector<80x4xf32>
    %22 = arith.truncf %21 : vector<80x4xf32> to vector<80x4xbf16>
    %c0_19 = arith.constant 0 : index
    %c20 = arith.constant 20 : index
    %23 = vector.load %arg7[%c0_19, %c20] : memref<80x36xbf16, #tpu.memory_space<vmem>>, vector<80x4xbf16>
    tpu.vector_store %arg7[%c0_19, %c20], %22 {strides = array<i32>} : memref<80x36xbf16, #tpu.memory_space<vmem>>, vector<80x4xbf16>,
    %c0_20 = arith.constant 0 : index
    %c20_21 = arith.constant 20 : index
    %c0_22 = arith.constant 0 : index
    %24 = vector.load %arg2[%c0_20, %c20_21, %c0_22] : memref<1x110x4xf32, #tpu.memory_space<vmem>>, vector<1x80x4xf32>
    %25 = vector.shape_cast %24 : vector<1x80x4xf32> to vector<80x4xf32>
    %26 = arith.truncf %25 : vector<80x4xf32> to vector<80x4xbf16>
    %c0_23 = arith.constant 0 : index
    %c24 = arith.constant 24 : index
    %27 = vector.load %arg7[%c0_23, %c24] : memref<80x36xbf16, #tpu.memory_space<vmem>>, vector<80x4xbf16>
    tpu.vector_store %arg7[%c0_23, %c24], %26 {strides = array<i32>} : memref<80x36xbf16, #tpu.memory_space<vmem>>, vector<80x4xbf16>,
    %c0_24 = arith.constant 0 : index
    %c21 = arith.constant 21 : index
    %c0_25 = arith.constant 0 : index
    %28 = vector.load %arg2[%c0_24, %c21, %c0_25] : memref<1x110x4xf32, #tpu.memory_space<vmem>>, vector<1x80x4xf32>
    %29 = vector.shape_cast %28 : vector<1x80x4xf32> to vector<80x4xf32>
    %30 = arith.truncf %29 : vector<80x4xf32> to vector<80x4xbf16>
    %c0_26 = arith.constant 0 : index
    %c28 = arith.constant 28 : index
    %31 = vector.load %arg7[%c0_26, %c28] : memref<80x36xbf16, #tpu.memory_space<vmem>>, vector<80x4xbf16>
    tpu.vector_store %arg7[%c0_26, %c28], %30 {strides = array<i32>} : memref<80x36xbf16, #tpu.memory_space<vmem>>, vector<80x4xbf16>,
    %c0_27 = arith.constant 0 : index
    %c22 = arith.constant 22 : index
    %c0_28 = arith.constant 0 : index
    %32 = vector.load %arg2[%c0_27, %c22, %c0_28] : memref<1x110x4xf32, #tpu.memory_space<vmem>>, vector<1x80x4xf32>
    %33 = vector.shape_cast %32 : vector<1x80x4xf32> to vector<80x4xf32>
    %34 = arith.truncf %33 : vector<80x4xf32> to vector<80x4xbf16>
    %c0_29 = arith.constant 0 : index
    %c32 = arith.constant 32 : index
    %35 = vector.load %arg7[%c0_29, %c32] : memref<80x36xbf16, #tpu.memory_space<vmem>>, vector<80x4xbf16>
    tpu.vector_store %arg7[%c0_29, %c32], %34 {strides = array<i32>} : memref<80x36xbf16, #tpu.memory_space<vmem>>, vector<80x4xbf16>,
    %c0_30 = arith.constant 0 : index
    %c0_31 = arith.constant 0 : index
    %36 = vector.load %arg7[%c0_30, %c0_31] : memref<80x36xbf16, #tpu.memory_space<vmem>>, vector<80x36xbf16>
    %c0_32 = arith.constant 0 : index
    %c0_33 = arith.constant 0 : index
    %37 = vector.load %arg3[%c0_32, %c0_33] : memref<36x8xbf16, #tpu.memory_space<vmem>>, vector<36x8xbf16>
    %cst = arith.constant dense<0.000000e+00> : vector<80x8xf32>
    %38 = tpu.matmul %36, %37, %cst {dimension_numbers = #tpu.dot_dimension_numbers<[1], [0], [0], [1], [0, 0, 1, 1], [], []>} : vector<80x36xbf16>, vector<36x8xbf16>, vector<80x8xf32> -> vector<80x8xf32>
    %c0_34 = arith.constant 0 : index
    %c0_35 = arith.constant 0 : index
    %39 = vector.load %arg4[%c0_34, %c0_35] : memref<1x8xf32, #tpu.memory_space<vmem>>, vector<1x8xf32>
    %40 = vector.broadcast %39 : vector<1x8xf32> to vector<80x8xf32>
    %41 = arith.mulf %38, %40 : vector<80x8xf32>
    %c0_36 = arith.constant 0 : index
    %c0_37 = arith.constant 0 : index
    %42 = vector.load %arg5[%c0_36, %c0_37] : memref<1x8xf32, #tpu.memory_space<vmem>>, vector<1x8xf32>
    %43 = vector.broadcast %42 : vector<1x8xf32> to vector<80x8xf32>
    %44 = arith.addf %41, %43 : vector<80x8xf32>
    %45 = math.absf %44 : vector<80x8xf32>
    %cst_38 = arith.constant 0.000000e+00 : f32
    %46 = vector.broadcast %cst_38 : f32 to vector<80x8xf32>
    %47 = arith.subf %46, %45 : vector<80x8xf32>
    %48 = math.exp %47 : vector<80x8xf32>
    %cst_39 = arith.constant 0.000000e+00 : f32
    %49 = vector.broadcast %cst_39 : f32 to vector<80x8xf32>
    %50 = arith.cmpf oge, %44, %49 : vector<80x8xf32>
    %cst_40 = arith.constant 1.000000e+00 : f32
    %51 = vector.broadcast %cst_40 : f32 to vector<80x8xf32>
    %52 = arith.addf %51, %48 : vector<80x8xf32>
    %cst_41 = arith.constant 1.000000e+00 : f32
    %53 = vector.broadcast %cst_41 : f32 to vector<80x8xf32>
    %54 = arith.divf %53, %52 : vector<80x8xf32>
    %cst_42 = arith.constant 1.000000e+00 : f32
    %55 = vector.broadcast %cst_42 : f32 to vector<80x8xf32>
    %56 = arith.addf %55, %48 : vector<80x8xf32>
    %57 = arith.divf %48, %56 : vector<80x8xf32>
    %58 = arith.select %50, %54, %57 : vector<80x8xi1>, vector<80x8xf32>
    %59 = arith.mulf %44, %58 : vector<80x8xf32>
    %60 = vector.shape_cast %59 : vector<80x8xf32> to vector<1x80x8xf32>
    %c0_43 = arith.constant 0 : index
    %c0_44 = arith.constant 0 : index
    %c0_45 = arith.constant 0 : index
    %61 = vector.load %arg6[%c0_43, %c0_44, %c0_45] : memref<1x80x8xf32, #tpu.memory_space<vmem>>, vector<1x80x8xf32>
    tpu.vector_store %arg6[%c0_43, %c0_44, %c0_45], %60 {strides = array<i32>} : memref<1x80x8xf32, #tpu.memory_space<vmem>>, vector<1x80x8xf32>,
    return
  }
  func.func @transform_0(%arg0: i32, %arg1: i32) -> (i32, i32, i32) {
    %c0_i32 = arith.constant 0 : i32
    %c0_i32_0 = arith.constant 0 : i32
    %c0_i32_1 = arith.constant 0 : i32
    return %arg0, %c0_i32, %c0_i32_0 : i32, i32, i32
  }
  func.func @transform_1(%arg0: i32, %arg1: i32) -> (i32, i32) {
    %c0_i32 = arith.constant 0 : i32
    %c0_i32_0 = arith.constant 0 : i32
    return %c0_i32, %arg1 : i32, i32
  }
  func.func @transform_2(%arg0: i32, %arg1: i32) -> (i32, i32) {
    %c0_i32 = arith.constant 0 : i32
    %c0_i32_0 = arith.constant 0 : i32
    return %c0_i32, %arg1 : i32, i32
  }
  func.func @transform_3(%arg0: i32, %arg1: i32) -> (i32, i32) {
    %c0_i32 = arith.constant 0 : i32
    %c0_i32_0 = arith.constant 0 : i32
    return %c0_i32, %arg1 : i32, i32
  }
  func.func @transform_4(%arg0: i32, %arg1: i32) -> (i32, i32, i32) {
    %c0_i32 = arith.constant 0 : i32
    %c0_i32_0 = arith.constant 0 : i32
    return %arg0, %c0_i32, %arg1 : i32, i32, i32
  }
}

module attributes {stable_mosaic.version = 11 : i64} {
  func.func @_conv3x3_bn_silu_kernel(%arg0: i32, %arg1: i32, %arg2: memref<1x110x8xf32, #tpu.memory_space<vmem>>, %arg3: memref<72x4xbf16, #tpu.memory_space<vmem>>, %arg4: memref<1x4xf32, #tpu.memory_space<vmem>>, %arg5: memref<1x4xf32, #tpu.memory_space<vmem>>, %arg6: memref<1x80x4xf32, #tpu.memory_space<vmem>>, %arg7: memref<80x72xbf16, #tpu.memory_space<vmem>>) attributes {dimension_semantics = [#tpu.dimension_semantics<parallel>, #tpu.dimension_semantics<parallel>], iteration_bounds = array<i64: 2, 1>, scalar_prefetch = 0 : i64, scratch_operands = 1 : i64, tpu.core_type = #tpu.core_type<tc>, window_params = [{transform_indices = @transform_0, window_bounds = array<i64: 1, 110, 8>}, {transform_indices = @transform_1, window_bounds = array<i64: 72, 4>}, {transform_indices = @transform_2, window_bounds = array<i64: 1, 4>}, {transform_indices = @transform_3, window_bounds = array<i64: 1, 4>}, {transform_indices = @transform_4, window_bounds = array<i64: 1, 80, 4>}]} {
    %c0 = arith.constant 0 : index
    %c0_0 = arith.constant 0 : index
    %c0_1 = arith.constant 0 : index
    %0 = vector.load %arg2[%c0, %c0_0, %c0_1] : memref<1x110x8xf32, #tpu.memory_space<vmem>>, vector<1x80x8xf32>
    %1 = vector.shape_cast %0 : vector<1x80x8xf32> to vector<80x8xf32>
    %2 = arith.truncf %1 : vector<80x8xf32> to vector<80x8xbf16>
    %c0_2 = arith.constant 0 : index
    %c0_3 = arith.constant 0 : index
    %3 = vector.load %arg7[%c0_2, %c0_3] : memref<80x72xbf16, #tpu.memory_space<vmem>>, vector<80x8xbf16>
    tpu.vector_store %arg7[%c0_2, %c0_3], %2 {strides = array<i32>} : memref<80x72xbf16, #tpu.memory_space<vmem>>, vector<80x8xbf16>,
    %c0_4 = arith.constant 0 : index
    %c1 = arith.constant 1 : index
    %c0_5 = arith.constant 0 : index
    %4 = vector.load %arg2[%c0_4, %c1, %c0_5] : memref<1x110x8xf32, #tpu.memory_space<vmem>>, vector<1x80x8xf32>
    %5 = vector.shape_cast %4 : vector<1x80x8xf32> to vector<80x8xf32>
    %6 = arith.truncf %5 : vector<80x8xf32> to vector<80x8xbf16>
    %c0_6 = arith.constant 0 : index
    %c8 = arith.constant 8 : index
    %7 = vector.load %arg7[%c0_6, %c8] : memref<80x72xbf16, #tpu.memory_space<vmem>>, vector<80x8xbf16>
    tpu.vector_store %arg7[%c0_6, %c8], %6 {strides = array<i32>} : memref<80x72xbf16, #tpu.memory_space<vmem>>, vector<80x8xbf16>,
    %c0_7 = arith.constant 0 : index
    %c2 = arith.constant 2 : index
    %c0_8 = arith.constant 0 : index
    %8 = vector.load %arg2[%c0_7, %c2, %c0_8] : memref<1x110x8xf32, #tpu.memory_space<vmem>>, vector<1x80x8xf32>
    %9 = vector.shape_cast %8 : vector<1x80x8xf32> to vector<80x8xf32>
    %10 = arith.truncf %9 : vector<80x8xf32> to vector<80x8xbf16>
    %c0_9 = arith.constant 0 : index
    %c16 = arith.constant 16 : index
    %11 = vector.load %arg7[%c0_9, %c16] : memref<80x72xbf16, #tpu.memory_space<vmem>>, vector<80x8xbf16>
    tpu.vector_store %arg7[%c0_9, %c16], %10 {strides = array<i32>} : memref<80x72xbf16, #tpu.memory_space<vmem>>, vector<80x8xbf16>,
    %c0_10 = arith.constant 0 : index
    %c10 = arith.constant 10 : index
    %c0_11 = arith.constant 0 : index
    %12 = vector.load %arg2[%c0_10, %c10, %c0_11] : memref<1x110x8xf32, #tpu.memory_space<vmem>>, vector<1x80x8xf32>
    %13 = vector.shape_cast %12 : vector<1x80x8xf32> to vector<80x8xf32>
    %14 = arith.truncf %13 : vector<80x8xf32> to vector<80x8xbf16>
    %c0_12 = arith.constant 0 : index
    %c24 = arith.constant 24 : index
    %15 = vector.load %arg7[%c0_12, %c24] : memref<80x72xbf16, #tpu.memory_space<vmem>>, vector<80x8xbf16>
    tpu.vector_store %arg7[%c0_12, %c24], %14 {strides = array<i32>} : memref<80x72xbf16, #tpu.memory_space<vmem>>, vector<80x8xbf16>,
    %c0_13 = arith.constant 0 : index
    %c11 = arith.constant 11 : index
    %c0_14 = arith.constant 0 : index
    %16 = vector.load %arg2[%c0_13, %c11, %c0_14] : memref<1x110x8xf32, #tpu.memory_space<vmem>>, vector<1x80x8xf32>
    %17 = vector.shape_cast %16 : vector<1x80x8xf32> to vector<80x8xf32>
    %18 = arith.truncf %17 : vector<80x8xf32> to vector<80x8xbf16>
    %c0_15 = arith.constant 0 : index
    %c32 = arith.constant 32 : index
    %19 = vector.load %arg7[%c0_15, %c32] : memref<80x72xbf16, #tpu.memory_space<vmem>>, vector<80x8xbf16>
    tpu.vector_store %arg7[%c0_15, %c32], %18 {strides = array<i32>} : memref<80x72xbf16, #tpu.memory_space<vmem>>, vector<80x8xbf16>,
    %c0_16 = arith.constant 0 : index
    %c12 = arith.constant 12 : index
    %c0_17 = arith.constant 0 : index
    %20 = vector.load %arg2[%c0_16, %c12, %c0_17] : memref<1x110x8xf32, #tpu.memory_space<vmem>>, vector<1x80x8xf32>
    %21 = vector.shape_cast %20 : vector<1x80x8xf32> to vector<80x8xf32>
    %22 = arith.truncf %21 : vector<80x8xf32> to vector<80x8xbf16>
    %c0_18 = arith.constant 0 : index
    %c40 = arith.constant 40 : index
    %23 = vector.load %arg7[%c0_18, %c40] : memref<80x72xbf16, #tpu.memory_space<vmem>>, vector<80x8xbf16>
    tpu.vector_store %arg7[%c0_18, %c40], %22 {strides = array<i32>} : memref<80x72xbf16, #tpu.memory_space<vmem>>, vector<80x8xbf16>,
    %c0_19 = arith.constant 0 : index
    %c20 = arith.constant 20 : index
    %c0_20 = arith.constant 0 : index
    %24 = vector.load %arg2[%c0_19, %c20, %c0_20] : memref<1x110x8xf32, #tpu.memory_space<vmem>>, vector<1x80x8xf32>
    %25 = vector.shape_cast %24 : vector<1x80x8xf32> to vector<80x8xf32>
    %26 = arith.truncf %25 : vector<80x8xf32> to vector<80x8xbf16>
    %c0_21 = arith.constant 0 : index
    %c48 = arith.constant 48 : index
    %27 = vector.load %arg7[%c0_21, %c48] : memref<80x72xbf16, #tpu.memory_space<vmem>>, vector<80x8xbf16>
    tpu.vector_store %arg7[%c0_21, %c48], %26 {strides = array<i32>} : memref<80x72xbf16, #tpu.memory_space<vmem>>, vector<80x8xbf16>,
    %c0_22 = arith.constant 0 : index
    %c21 = arith.constant 21 : index
    %c0_23 = arith.constant 0 : index
    %28 = vector.load %arg2[%c0_22, %c21, %c0_23] : memref<1x110x8xf32, #tpu.memory_space<vmem>>, vector<1x80x8xf32>
    %29 = vector.shape_cast %28 : vector<1x80x8xf32> to vector<80x8xf32>
    %30 = arith.truncf %29 : vector<80x8xf32> to vector<80x8xbf16>
    %c0_24 = arith.constant 0 : index
    %c56 = arith.constant 56 : index
    %31 = vector.load %arg7[%c0_24, %c56] : memref<80x72xbf16, #tpu.memory_space<vmem>>, vector<80x8xbf16>
    tpu.vector_store %arg7[%c0_24, %c56], %30 {strides = array<i32>} : memref<80x72xbf16, #tpu.memory_space<vmem>>, vector<80x8xbf16>,
    %c0_25 = arith.constant 0 : index
    %c22 = arith.constant 22 : index
    %c0_26 = arith.constant 0 : index
    %32 = vector.load %arg2[%c0_25, %c22, %c0_26] : memref<1x110x8xf32, #tpu.memory_space<vmem>>, vector<1x80x8xf32>
    %33 = vector.shape_cast %32 : vector<1x80x8xf32> to vector<80x8xf32>
    %34 = arith.truncf %33 : vector<80x8xf32> to vector<80x8xbf16>
    %c0_27 = arith.constant 0 : index
    %c64 = arith.constant 64 : index
    %35 = vector.load %arg7[%c0_27, %c64] : memref<80x72xbf16, #tpu.memory_space<vmem>>, vector<80x8xbf16>
    tpu.vector_store %arg7[%c0_27, %c64], %34 {strides = array<i32>} : memref<80x72xbf16, #tpu.memory_space<vmem>>, vector<80x8xbf16>,
    %c0_28 = arith.constant 0 : index
    %c0_29 = arith.constant 0 : index
    %36 = vector.load %arg7[%c0_28, %c0_29] : memref<80x72xbf16, #tpu.memory_space<vmem>>, vector<80x72xbf16>
    %c0_30 = arith.constant 0 : index
    %c0_31 = arith.constant 0 : index
    %37 = vector.load %arg3[%c0_30, %c0_31] : memref<72x4xbf16, #tpu.memory_space<vmem>>, vector<72x4xbf16>
    %cst = arith.constant dense<0.000000e+00> : vector<80x4xf32>
    %38 = tpu.matmul %36, %37, %cst {dimension_numbers = #tpu.dot_dimension_numbers<[1], [0], [0], [1], [0, 0, 1, 1], [], []>} : vector<80x72xbf16>, vector<72x4xbf16>, vector<80x4xf32> -> vector<80x4xf32>
    %c0_32 = arith.constant 0 : index
    %c0_33 = arith.constant 0 : index
    %39 = vector.load %arg4[%c0_32, %c0_33] : memref<1x4xf32, #tpu.memory_space<vmem>>, vector<1x4xf32>
    %40 = vector.broadcast %39 : vector<1x4xf32> to vector<80x4xf32>
    %41 = arith.mulf %38, %40 : vector<80x4xf32>
    %c0_34 = arith.constant 0 : index
    %c0_35 = arith.constant 0 : index
    %42 = vector.load %arg5[%c0_34, %c0_35] : memref<1x4xf32, #tpu.memory_space<vmem>>, vector<1x4xf32>
    %43 = vector.broadcast %42 : vector<1x4xf32> to vector<80x4xf32>
    %44 = arith.addf %41, %43 : vector<80x4xf32>
    %45 = math.absf %44 : vector<80x4xf32>
    %cst_36 = arith.constant 0.000000e+00 : f32
    %46 = vector.broadcast %cst_36 : f32 to vector<80x4xf32>
    %47 = arith.subf %46, %45 : vector<80x4xf32>
    %48 = math.exp %47 : vector<80x4xf32>
    %cst_37 = arith.constant 0.000000e+00 : f32
    %49 = vector.broadcast %cst_37 : f32 to vector<80x4xf32>
    %50 = arith.cmpf oge, %44, %49 : vector<80x4xf32>
    %cst_38 = arith.constant 1.000000e+00 : f32
    %51 = vector.broadcast %cst_38 : f32 to vector<80x4xf32>
    %52 = arith.addf %51, %48 : vector<80x4xf32>
    %cst_39 = arith.constant 1.000000e+00 : f32
    %53 = vector.broadcast %cst_39 : f32 to vector<80x4xf32>
    %54 = arith.divf %53, %52 : vector<80x4xf32>
    %cst_40 = arith.constant 1.000000e+00 : f32
    %55 = vector.broadcast %cst_40 : f32 to vector<80x4xf32>
    %56 = arith.addf %55, %48 : vector<80x4xf32>
    %57 = arith.divf %48, %56 : vector<80x4xf32>
    %58 = arith.select %50, %54, %57 : vector<80x4xi1>, vector<80x4xf32>
    %59 = arith.mulf %44, %58 : vector<80x4xf32>
    %60 = vector.shape_cast %59 : vector<80x4xf32> to vector<1x80x4xf32>
    %c0_41 = arith.constant 0 : index
    %c0_42 = arith.constant 0 : index
    %c0_43 = arith.constant 0 : index
    %61 = vector.load %arg6[%c0_41, %c0_42, %c0_43] : memref<1x80x4xf32, #tpu.memory_space<vmem>>, vector<1x80x4xf32>
    tpu.vector_store %arg6[%c0_41, %c0_42, %c0_43], %60 {strides = array<i32>} : memref<1x80x4xf32, #tpu.memory_space<vmem>>, vector<1x80x4xf32>,
    return
  }
  func.func @transform_0(%arg0: i32, %arg1: i32) -> (i32, i32, i32) {
    %c0_i32 = arith.constant 0 : i32
    %c0_i32_0 = arith.constant 0 : i32
    %c0_i32_1 = arith.constant 0 : i32
    return %arg0, %c0_i32, %c0_i32_0 : i32, i32, i32
  }
  func.func @transform_1(%arg0: i32, %arg1: i32) -> (i32, i32) {
    %c0_i32 = arith.constant 0 : i32
    %c0_i32_0 = arith.constant 0 : i32
    return %c0_i32, %arg1 : i32, i32
  }
  func.func @transform_2(%arg0: i32, %arg1: i32) -> (i32, i32) {
    %c0_i32 = arith.constant 0 : i32
    %c0_i32_0 = arith.constant 0 : i32
    return %c0_i32, %arg1 : i32, i32
  }
  func.func @transform_3(%arg0: i32, %arg1: i32) -> (i32, i32) {
    %c0_i32 = arith.constant 0 : i32
    %c0_i32_0 = arith.constant 0 : i32
    return %c0_i32, %arg1 : i32, i32
  }
  func.func @transform_4(%arg0: i32, %arg1: i32) -> (i32, i32, i32) {
    %c0_i32 = arith.constant 0 : i32
    %c0_i32_0 = arith.constant 0 : i32
    return %arg0, %c0_i32, %arg1 : i32, i32, i32
  }
}

module attributes {stable_mosaic.version = 11 : i64} {
  func.func @_dwconv3x3_kernel(%arg0: i32, %arg1: i32, %arg2: memref<1x10x10x40xf32, #tpu.memory_space<vmem>>, %arg3: memref<9x40xf32, #tpu.memory_space<vmem>>, %arg4: memref<1x8x8x40xf32, #tpu.memory_space<vmem>>) attributes {dimension_semantics = [#tpu.dimension_semantics<parallel>, #tpu.dimension_semantics<parallel>], iteration_bounds = array<i64: 2, 1>, scalar_prefetch = 0 : i64, scratch_operands = 0 : i64, tpu.core_type = #tpu.core_type<tc>, window_params = [{transform_indices = @transform_0, window_bounds = array<i64: 1, 10, 10, 40>}, {transform_indices = @transform_1, window_bounds = array<i64: 9, 40>}, {transform_indices = @transform_2, window_bounds = array<i64: 1, 8, 8, 40>}]} {
    %c0 = arith.constant 0 : index
    %c0_0 = arith.constant 0 : index
    %c0_1 = arith.constant 0 : index
    %c0_2 = arith.constant 0 : index
    %0 = vector.load %arg2[%c0, %c0_0, %c0_1, %c0_2] : memref<1x10x10x40xf32, #tpu.memory_space<vmem>>, vector<1x10x10x40xf32>
    %c0_3 = arith.constant 0 : index
    %c0_4 = arith.constant 0 : index
    %1 = vector.load %arg3[%c0_3, %c0_4] : memref<9x40xf32, #tpu.memory_space<vmem>>, vector<9x40xf32>
    %cst = arith.constant 0.000000e+00 : f32
    %2 = vector.broadcast %cst : f32 to vector<1x8x8x40xf32>
    %3 = vector.extract_strided_slice %0 {offsets = [0, 0, 0, 0], sizes = [1, 8, 8, 40], strides = [1, 1, 1, 1]} : vector<1x10x10x40xf32> to vector<1x8x8x40xf32>
    %4 = vector.extract_strided_slice %1 {offsets = [0, 0], sizes = [1, 40], strides = [1, 1]} : vector<9x40xf32> to vector<1x40xf32>
    %5 = vector.shape_cast %4 : vector<1x40xf32> to vector<40xf32>
    %6 = vector.shape_cast %5 : vector<40xf32> to vector<1x1x1x40xf32>
    %7 = vector.broadcast %6 : vector<1x1x1x40xf32> to vector<1x8x8x40xf32>
    %8 = arith.mulf %3, %7 : vector<1x8x8x40xf32>
    %9 = arith.addf %2, %8 : vector<1x8x8x40xf32>
    %10 = vector.extract_strided_slice %0 {offsets = [0, 0, 1, 0], sizes = [1, 8, 8, 40], strides = [1, 1, 1, 1]} : vector<1x10x10x40xf32> to vector<1x8x8x40xf32>
    %11 = vector.extract_strided_slice %1 {offsets = [1, 0], sizes = [1, 40], strides = [1, 1]} : vector<9x40xf32> to vector<1x40xf32>
    %12 = vector.shape_cast %11 : vector<1x40xf32> to vector<40xf32>
    %13 = vector.shape_cast %12 : vector<40xf32> to vector<1x1x1x40xf32>
    %14 = vector.broadcast %13 : vector<1x1x1x40xf32> to vector<1x8x8x40xf32>
    %15 = arith.mulf %10, %14 : vector<1x8x8x40xf32>
    %16 = arith.addf %9, %15 : vector<1x8x8x40xf32>
    %17 = vector.extract_strided_slice %0 {offsets = [0, 0, 2, 0], sizes = [1, 8, 8, 40], strides = [1, 1, 1, 1]} : vector<1x10x10x40xf32> to vector<1x8x8x40xf32>
    %18 = vector.extract_strided_slice %1 {offsets = [2, 0], sizes = [1, 40], strides = [1, 1]} : vector<9x40xf32> to vector<1x40xf32>
    %19 = vector.shape_cast %18 : vector<1x40xf32> to vector<40xf32>
    %20 = vector.shape_cast %19 : vector<40xf32> to vector<1x1x1x40xf32>
    %21 = vector.broadcast %20 : vector<1x1x1x40xf32> to vector<1x8x8x40xf32>
    %22 = arith.mulf %17, %21 : vector<1x8x8x40xf32>
    %23 = arith.addf %16, %22 : vector<1x8x8x40xf32>
    %24 = vector.extract_strided_slice %0 {offsets = [0, 1, 0, 0], sizes = [1, 8, 8, 40], strides = [1, 1, 1, 1]} : vector<1x10x10x40xf32> to vector<1x8x8x40xf32>
    %25 = vector.extract_strided_slice %1 {offsets = [3, 0], sizes = [1, 40], strides = [1, 1]} : vector<9x40xf32> to vector<1x40xf32>
    %26 = vector.shape_cast %25 : vector<1x40xf32> to vector<40xf32>
    %27 = vector.shape_cast %26 : vector<40xf32> to vector<1x1x1x40xf32>
    %28 = vector.broadcast %27 : vector<1x1x1x40xf32> to vector<1x8x8x40xf32>
    %29 = arith.mulf %24, %28 : vector<1x8x8x40xf32>
    %30 = arith.addf %23, %29 : vector<1x8x8x40xf32>
    %31 = vector.extract_strided_slice %0 {offsets = [0, 1, 1, 0], sizes = [1, 8, 8, 40], strides = [1, 1, 1, 1]} : vector<1x10x10x40xf32> to vector<1x8x8x40xf32>
    %32 = vector.extract_strided_slice %1 {offsets = [4, 0], sizes = [1, 40], strides = [1, 1]} : vector<9x40xf32> to vector<1x40xf32>
    %33 = vector.shape_cast %32 : vector<1x40xf32> to vector<40xf32>
    %34 = vector.shape_cast %33 : vector<40xf32> to vector<1x1x1x40xf32>
    %35 = vector.broadcast %34 : vector<1x1x1x40xf32> to vector<1x8x8x40xf32>
    %36 = arith.mulf %31, %35 : vector<1x8x8x40xf32>
    %37 = arith.addf %30, %36 : vector<1x8x8x40xf32>
    %38 = vector.extract_strided_slice %0 {offsets = [0, 1, 2, 0], sizes = [1, 8, 8, 40], strides = [1, 1, 1, 1]} : vector<1x10x10x40xf32> to vector<1x8x8x40xf32>
    %39 = vector.extract_strided_slice %1 {offsets = [5, 0], sizes = [1, 40], strides = [1, 1]} : vector<9x40xf32> to vector<1x40xf32>
    %40 = vector.shape_cast %39 : vector<1x40xf32> to vector<40xf32>
    %41 = vector.shape_cast %40 : vector<40xf32> to vector<1x1x1x40xf32>
    %42 = vector.broadcast %41 : vector<1x1x1x40xf32> to vector<1x8x8x40xf32>
    %43 = arith.mulf %38, %42 : vector<1x8x8x40xf32>
    %44 = arith.addf %37, %43 : vector<1x8x8x40xf32>
    %45 = vector.extract_strided_slice %0 {offsets = [0, 2, 0, 0], sizes = [1, 8, 8, 40], strides = [1, 1, 1, 1]} : vector<1x10x10x40xf32> to vector<1x8x8x40xf32>
    %46 = vector.extract_strided_slice %1 {offsets = [6, 0], sizes = [1, 40], strides = [1, 1]} : vector<9x40xf32> to vector<1x40xf32>
    %47 = vector.shape_cast %46 : vector<1x40xf32> to vector<40xf32>
    %48 = vector.shape_cast %47 : vector<40xf32> to vector<1x1x1x40xf32>
    %49 = vector.broadcast %48 : vector<1x1x1x40xf32> to vector<1x8x8x40xf32>
    %50 = arith.mulf %45, %49 : vector<1x8x8x40xf32>
    %51 = arith.addf %44, %50 : vector<1x8x8x40xf32>
    %52 = vector.extract_strided_slice %0 {offsets = [0, 2, 1, 0], sizes = [1, 8, 8, 40], strides = [1, 1, 1, 1]} : vector<1x10x10x40xf32> to vector<1x8x8x40xf32>
    %53 = vector.extract_strided_slice %1 {offsets = [7, 0], sizes = [1, 40], strides = [1, 1]} : vector<9x40xf32> to vector<1x40xf32>
    %54 = vector.shape_cast %53 : vector<1x40xf32> to vector<40xf32>
    %55 = vector.shape_cast %54 : vector<40xf32> to vector<1x1x1x40xf32>
    %56 = vector.broadcast %55 : vector<1x1x1x40xf32> to vector<1x8x8x40xf32>
    %57 = arith.mulf %52, %56 : vector<1x8x8x40xf32>
    %58 = arith.addf %51, %57 : vector<1x8x8x40xf32>
    %59 = vector.extract_strided_slice %0 {offsets = [0, 2, 2, 0], sizes = [1, 8, 8, 40], strides = [1, 1, 1, 1]} : vector<1x10x10x40xf32> to vector<1x8x8x40xf32>
    %60 = vector.extract_strided_slice %1 {offsets = [8, 0], sizes = [1, 40], strides = [1, 1]} : vector<9x40xf32> to vector<1x40xf32>
    %61 = vector.shape_cast %60 : vector<1x40xf32> to vector<40xf32>
    %62 = vector.shape_cast %61 : vector<40xf32> to vector<1x1x1x40xf32>
    %63 = vector.broadcast %62 : vector<1x1x1x40xf32> to vector<1x8x8x40xf32>
    %64 = arith.mulf %59, %63 : vector<1x8x8x40xf32>
    %65 = arith.addf %58, %64 : vector<1x8x8x40xf32>
    %c0_5 = arith.constant 0 : index
    %c0_6 = arith.constant 0 : index
    %c0_7 = arith.constant 0 : index
    %c0_8 = arith.constant 0 : index
    %66 = vector.load %arg4[%c0_5, %c0_6, %c0_7, %c0_8] : memref<1x8x8x40xf32, #tpu.memory_space<vmem>>, vector<1x8x8x40xf32>
    tpu.vector_store %arg4[%c0_5, %c0_6, %c0_7, %c0_8], %65 {strides = array<i32>} : memref<1x8x8x40xf32, #tpu.memory_space<vmem>>, vector<1x8x8x40xf32>,
    return
  }
  func.func @transform_0(%arg0: i32, %arg1: i32) -> (i32, i32, i32, i32) {
    %c0_i32 = arith.constant 0 : i32
    %c0_i32_0 = arith.constant 0 : i32
    %c0_i32_1 = arith.constant 0 : i32
    return %arg0, %c0_i32, %c0_i32_0, %arg1 : i32, i32, i32, i32
  }
  func.func @transform_1(%arg0: i32, %arg1: i32) -> (i32, i32) {
    %c0_i32 = arith.constant 0 : i32
    %c0_i32_0 = arith.constant 0 : i32
    return %c0_i32, %arg1 : i32, i32
  }
  func.func @transform_2(%arg0: i32, %arg1: i32) -> (i32, i32, i32, i32) {
    %c0_i32 = arith.constant 0 : i32
    %c0_i32_0 = arith.constant 0 : i32
    %c0_i32_1 = arith.constant 0 : i32
    return %arg0, %c0_i32, %c0_i32_0, %arg1 : i32, i32, i32, i32
  }
}

module attributes {stable_mosaic.version = 11 : i64} {
  func.func @_matmul_kernel(%arg0: i32, %arg1: i32, %arg2: i32, %arg3: memref<128x128xf32, #tpu.memory_space<vmem>>, %arg4: memref<128x128xf32, #tpu.memory_space<vmem>>, %arg5: memref<128x128xf32, #tpu.memory_space<vmem>>, %arg6: memref<128x128xf32, #tpu.memory_space<vmem>>) attributes {dimension_semantics = [#tpu.dimension_semantics<parallel>, #tpu.dimension_semantics<parallel>, #tpu.dimension_semantics<arbitrary>], iteration_bounds = array<i64: 1, 1, 1>, scalar_prefetch = 0 : i64, scratch_operands = 1 : i64, tpu.core_type = #tpu.core_type<tc>, window_params = [{transform_indices = @transform_0, window_bounds = array<i64: 128, 128>}, {transform_indices = @transform_1, window_bounds = array<i64: 128, 128>}, {transform_indices = @transform_2, window_bounds = array<i64: 128, 128>}]} {
    %c0_i32 = arith.constant 0 : i32
    %0 = arith.cmpi eq, %arg2, %c0_i32 : i32
    %1 = arith.extui %0 : i1 to i32
    %c0_i32_0 = arith.constant 0 : i32
    %2 = arith.cmpi ne, %1, %c0_i32_0 : i32
    scf.if %2 {
      %cst_10 = arith.constant 0.000000e+00 : f32
      %14 = vector.broadcast %cst_10 : f32 to vector<128x128xf32>
      %c0_11 = arith.constant 0 : index
      %c0_12 = arith.constant 0 : index
      %15 = vector.load %arg6[%c0_11, %c0_12] : memref<128x128xf32, #tpu.memory_space<vmem>>, vector<128x128xf32>
      tpu.vector_store %arg6[%c0_11, %c0_12], %14 {strides = array<i32>} : memref<128x128xf32, #tpu.memory_space<vmem>>, vector<128x128xf32>,
    } else {
    }
    %c0 = arith.constant 0 : index
    %c0_1 = arith.constant 0 : index
    %3 = vector.load %arg6[%c0, %c0_1] : memref<128x128xf32, #tpu.memory_space<vmem>>, vector<128x128xf32>
    %c0_2 = arith.constant 0 : index
    %c0_3 = arith.constant 0 : index
    %4 = vector.load %arg3[%c0_2, %c0_3] : memref<128x128xf32, #tpu.memory_space<vmem>>, vector<128x128xf32>
    %5 = arith.truncf %4 : vector<128x128xf32> to vector<128x128xbf16>
    %c0_4 = arith.constant 0 : index
    %c0_5 = arith.constant 0 : index
    %6 = vector.load %arg4[%c0_4, %c0_5] : memref<128x128xf32, #tpu.memory_space<vmem>>, vector<128x128xf32>
    %7 = arith.truncf %6 : vector<128x128xf32> to vector<128x128xbf16>
    %cst = arith.constant dense<0.000000e+00> : vector<128x128xf32>
    %8 = tpu.matmul %5, %7, %cst {dimension_numbers = #tpu.dot_dimension_numbers<[1], [0], [0], [1], [0, 0, 1, 1], [], []>} : vector<128x128xbf16>, vector<128x128xbf16>, vector<128x128xf32> -> vector<128x128xf32>
    %9 = arith.addf %3, %8 : vector<128x128xf32>
    %c0_6 = arith.constant 0 : index
    %c0_7 = arith.constant 0 : index
    %10 = vector.load %arg6[%c0_6, %c0_7] : memref<128x128xf32, #tpu.memory_space<vmem>>, vector<128x128xf32>
    tpu.vector_store %arg6[%c0_6, %c0_7], %9 {strides = array<i32>} : memref<128x128xf32, #tpu.memory_space<vmem>>, vector<128x128xf32>,
    %c0_i32_8 = arith.constant 0 : i32
    %11 = arith.cmpi eq, %arg2, %c0_i32_8 : i32
    %12 = arith.extui %11 : i1 to i32
    %c0_i32_9 = arith.constant 0 : i32
    %13 = arith.cmpi ne, %12, %c0_i32_9 : i32
    scf.if %13 {
      %c0_10 = arith.constant 0 : index
      %c0_11 = arith.constant 0 : index
      %14 = vector.load %arg6[%c0_10, %c0_11] : memref<128x128xf32, #tpu.memory_space<vmem>>, vector<128x128xf32>
      %c0_12 = arith.constant 0 : index
      %c0_13 = arith.constant 0 : index
      %15 = vector.load %arg5[%c0_12, %c0_13] : memref<128x128xf32, #tpu.memory_space<vmem>>, vector<128x128xf32>
      tpu.vector_store %arg5[%c0_12, %c0_13], %14 {strides = array<i32>} : memref<128x128xf32, #tpu.memory_space<vmem>>, vector<128x128xf32>,
    } else {
    }
    return
  }
  func.func @transform_0(%arg0: i32, %arg1: i32, %arg2: i32) -> (i32, i32) {
    %c0_i32 = arith.constant 0 : i32
    return %arg0, %arg2 : i32, i32
  }
  func.func @transform_1(%arg0: i32, %arg1: i32, %arg2: i32) -> (i32, i32) {
    %c0_i32 = arith.constant 0 : i32
    return %arg2, %arg1 : i32, i32
  }
  func.func @transform_2(%arg0: i32, %arg1: i32, %arg2: i32) -> (i32, i32) {
    %c0_i32 = arith.constant 0 : i32
    return %arg0, %arg1 : i32, i32
  }
}

module attributes {stable_mosaic.version = 11 : i64} {
  func.func @_attn_kernel(%arg0: i32, %arg1: memref<4x8x128xbf16, #tpu.memory_space<vmem>>, %arg2: memref<4x128x8xbf16, #tpu.memory_space<vmem>>, %arg3: memref<4x8x128xbf16, #tpu.memory_space<vmem>>, %arg4: memref<4x1x1xf32, #tpu.memory_space<vmem>>, %arg5: memref<4x8x128xbf16, #tpu.memory_space<vmem>>) attributes {dimension_semantics = [#tpu.dimension_semantics<parallel>], iteration_bounds = array<i64: 2>, scalar_prefetch = 0 : i64, scratch_operands = 0 : i64, tpu.core_type = #tpu.core_type<tc>, window_params = [{transform_indices = @transform_0, window_bounds = array<i64: 4, 8, 128>}, {transform_indices = @transform_1, window_bounds = array<i64: 4, 128, 8>}, {transform_indices = @transform_2, window_bounds = array<i64: 4, 8, 128>}, {transform_indices = @transform_3, window_bounds = array<i64: 4, 1, 1>}, {transform_indices = @transform_4, window_bounds = array<i64: 4, 8, 128>}]} {
    %c0 = arith.constant 0 : index
    %c0_0 = arith.constant 0 : index
    %c0_1 = arith.constant 0 : index
    %0 = vector.load %arg1[%c0, %c0_0, %c0_1] : memref<4x8x128xbf16, #tpu.memory_space<vmem>>, vector<4x8x128xbf16>
    %1 = arith.extf %0 : vector<4x8x128xbf16> to vector<4x8x128xf32>
    %c0_2 = arith.constant 0 : index
    %c0_3 = arith.constant 0 : index
    %c0_4 = arith.constant 0 : index
    %2 = vector.load %arg2[%c0_2, %c0_3, %c0_4] : memref<4x128x8xbf16, #tpu.memory_space<vmem>>, vector<4x128x8xbf16>
    %3 = arith.extf %2 : vector<4x128x8xbf16> to vector<4x128x8xf32>
    %c0_5 = arith.constant 0 : index
    %c0_6 = arith.constant 0 : index
    %c0_7 = arith.constant 0 : index
    %4 = vector.load %arg4[%c0_5, %c0_6, %c0_7] : memref<4x1x1xf32, #tpu.memory_space<vmem>>, vector<4x1x1xf32>
    %5 = arith.mulf %1, %1 : vector<4x8x128xf32>
    %cst = arith.constant dense<0.000000e+00> : vector<4x8xf32>
    %6 = vector.multi_reduction <add>, %5, %cst [2] : vector<4x8x128xf32> to vector<4x8xf32>
    %7 = vector.shape_cast %6 : vector<4x8xf32> to vector<4x8x1xf32>
    %cst_8 = arith.constant 1.000000e-24 : f32
    %8 = vector.broadcast %cst_8 : f32 to vector<4x8x1xf32>
    %9 = arith.maximumf %7, %8 : vector<4x8x1xf32>
    %10 = math.rsqrt %9 : vector<4x8x1xf32>
    %11 = vector.broadcast %10 : vector<4x8x1xf32> to vector<4x8x128xf32>
    %12 = arith.mulf %1, %11 : vector<4x8x128xf32>
    %13 = arith.truncf %12 : vector<4x8x128xf32> to vector<4x8x128xbf16>
    %14 = arith.mulf %3, %3 : vector<4x128x8xf32>
    %cst_9 = arith.constant dense<0.000000e+00> : vector<4x8xf32>
    %15 = vector.multi_reduction <add>, %14, %cst_9 [1] : vector<4x128x8xf32> to vector<4x8xf32>
    %16 = vector.shape_cast %15 : vector<4x8xf32> to vector<4x1x8xf32>
    %cst_10 = arith.constant 1.000000e-24 : f32
    %17 = vector.broadcast %cst_10 : f32 to vector<4x1x8xf32>
    %18 = arith.maximumf %16, %17 : vector<4x1x8xf32>
    %19 = math.rsqrt %18 : vector<4x1x8xf32>
    %20 = vector.broadcast %19 : vector<4x1x8xf32> to vector<4x128x8xf32>
    %21 = arith.mulf %3, %20 : vector<4x128x8xf32>
    %22 = arith.truncf %21 : vector<4x128x8xf32> to vector<4x128x8xbf16>
    "tpu.trace_start"() <{level = 10 : i32, message = "grh,ghs->grs"}> : () -> ()
    %cst_11 = arith.constant dense<0.000000e+00> : vector<4x8x8xf32>
    %23 = tpu.matmul %13, %22, %cst_11 {dimension_numbers = #tpu.dot_dimension_numbers<[2], [1], [1], [2], [0, 0, 0, 1, 1, 2], [0], [0]>} : vector<4x8x128xbf16>, vector<4x128x8xbf16>, vector<4x8x8xf32> -> vector<4x8x8xf32>
    "tpu.trace_stop"() : () -> ()
    %24 = vector.broadcast %4 : vector<4x1x1xf32> to vector<4x8x8xf32>
    %25 = arith.mulf %23, %24 : vector<4x8x8xf32>
    %cst_12 = arith.constant dense<0xFF800000> : vector<4x8xf32>
    %26 = vector.multi_reduction <maximumf>, %25, %cst_12 [2] : vector<4x8x8xf32> to vector<4x8xf32>
    %27 = vector.shape_cast %26 : vector<4x8xf32> to vector<4x8x1xf32>
    %cst_13 = arith.constant 0.000000e+00 : f32
    %28 = vector.broadcast %cst_13 : f32 to vector<4x8x1xf32>
    %29 = arith.maximumf %27, %28 : vector<4x8x1xf32>
    %30 = vector.broadcast %29 : vector<4x8x1xf32> to vector<4x8x8xf32>
    %31 = arith.subf %25, %30 : vector<4x8x8xf32>
    %32 = math.exp %31 : vector<4x8x8xf32>
    %cst_14 = arith.constant dense<0.000000e+00> : vector<4x8xf32>
    %33 = vector.multi_reduction <add>, %32, %cst_14 [2] : vector<4x8x8xf32> to vector<4x8xf32>
    %34 = vector.shape_cast %33 : vector<4x8xf32> to vector<4x8x1xf32>
    %cst_15 = arith.constant 0.000000e+00 : f32
    %35 = vector.broadcast %cst_15 : f32 to vector<4x8x1xf32>
    %36 = arith.subf %35, %29 : vector<4x8x1xf32>
    %37 = math.exp %36 : vector<4x8x1xf32>
    %38 = arith.addf %34, %37 : vector<4x8x1xf32>
    %39 = tpu.reciprocal %38 {approx = true} : vector<4x8x1xf32> -> vector<4x8x1xf32>
    %40 = vector.broadcast %39 : vector<4x8x1xf32> to vector<4x8x8xf32>
    %41 = arith.mulf %32, %40 : vector<4x8x8xf32>
    %42 = arith.truncf %41 : vector<4x8x8xf32> to vector<4x8x8xbf16>
    %c0_16 = arith.constant 0 : index
    %c0_17 = arith.constant 0 : index
    %c0_18 = arith.constant 0 : index
    %43 = vector.load %arg3[%c0_16, %c0_17, %c0_18] : memref<4x8x128xbf16, #tpu.memory_space<vmem>>, vector<4x8x128xbf16>
    "tpu.trace_start"() <{level = 10 : i32, message = "grs,gsh->grh"}> : () -> ()
    %cst_19 = arith.constant dense<0.000000e+00> : vector<4x8x128xf32>
    %44 = tpu.matmul %42, %43, %cst_19 {dimension_numbers = #tpu.dot_dimension_numbers<[2], [1], [1], [2], [0, 0, 0, 1, 1, 2], [0], [0]>} : vector<4x8x8xbf16>, vector<4x8x128xbf16>, vector<4x8x128xf32> -> vector<4x8x128xf32>
    "tpu.trace_stop"() : () -> ()
    %45 = arith.truncf %44 : vector<4x8x128xf32> to vector<4x8x128xbf16>
    %c0_20 = arith.constant 0 : index
    %c0_21 = arith.constant 0 : index
    %c0_22 = arith.constant 0 : index
    %46 = vector.load %arg5[%c0_20, %c0_21, %c0_22] : memref<4x8x128xbf16, #tpu.memory_space<vmem>>, vector<4x8x128xbf16>
    tpu.vector_store %arg5[%c0_20, %c0_21, %c0_22], %45 {strides = array<i32>} : memref<4x8x128xbf16, #tpu.memory_space<vmem>>, vector<4x8x128xbf16>,
    return
  }
  func.func @transform_0(%arg0: i32) -> (i32, i32, i32) {
    %c0_i32 = arith.constant 0 : i32
    %c0_i32_0 = arith.constant 0 : i32
    %c0_i32_1 = arith.constant 0 : i32
    return %arg0, %c0_i32, %c0_i32_0 : i32, i32, i32
  }
  func.func @transform_1(%arg0: i32) -> (i32, i32, i32) {
    %c0_i32 = arith.constant 0 : i32
    %c0_i32_0 = arith.constant 0 : i32
    %c0_i32_1 = arith.constant 0 : i32
    return %arg0, %c0_i32, %c0_i32_0 : i32, i32, i32
  }
  func.func @transform_2(%arg0: i32) -> (i32, i32, i32) {
    %c0_i32 = arith.constant 0 : i32
    %c0_i32_0 = arith.constant 0 : i32
    %c0_i32_1 = arith.constant 0 : i32
    return %arg0, %c0_i32, %c0_i32_0 : i32, i32, i32
  }
  func.func @transform_3(%arg0: i32) -> (i32, i32, i32) {
    %c0_i32 = arith.constant 0 : i32
    %c0_i32_0 = arith.constant 0 : i32
    %c0_i32_1 = arith.constant 0 : i32
    return %arg0, %c0_i32, %c0_i32_0 : i32, i32, i32
  }
  func.func @transform_4(%arg0: i32) -> (i32, i32, i32) {
    %c0_i32 = arith.constant 0 : i32
    %c0_i32_0 = arith.constant 0 : i32
    %c0_i32_1 = arith.constant 0 : i32
    return %arg0, %c0_i32, %c0_i32_0 : i32, i32, i32
  }
}

</mosaic_0001>

<bundles_post_ra>
// kernel: tile.13
= control target key start
LH: loop header
LB: loop body
LE: loop exit
PB: predicated region body
PF: predicated region fallthrough
CT: control target
= control target key end

     0   :  { %s22_s0 = inlined_call_operand.vmem [shape: f32[4], index: 0, kind: input, shape index: {}]   ;;  %s23_s1 = inlined_call_operand.vmem [shape: f32[2,4], index: 1, kind: output, shape index: {}]  }
   0x1   :  { %v4_v0 = vld [vmem:[%s22_s0] ss:$0 sm:$0xff] }
   0x2   :  { %5 = vst [vmem:[%s23_s1] sm:$0x3] %v4_v0 }

// kernel: tile.0
= control target key start
LH: loop header
LB: loop body
LE: loop exit
PB: predicated region body
PF: predicated region fallthrough
CT: control target
= control target key end

     0   :  { %vm8_vm0 = vcmask 7168   ;;  %s109_s8 = smov 125   ;;  %s110_s9 = smov 126   ;;  %s156_s0 = inlined_call_operand.vmem [shape: f32[2,4], index: 0, kind: input, shape index: {}]   ;;  %s157_s1 = inlined_call_operand.vmem [shape: f32[8,1,1], index: 1, kind: output, shape index: {}]  }
   0x1   :  { %v5_v0 = vld [vmem:[%s156_s0] sm:$0x3]  ;;  %s108_s0 = smov 127  }
   0x2   :  { %6 = vst [vmem:[#allocation1] sm:$0x3] %v5_v0 }
   0x9   :  { %v12_v1 = vld [vmem:[#allocation1] sm:$0x3]  }
   0xa   :  { %v7_v2 = vld [vmem:[#allocation1] sm:$0x3]   ;;  %13 = vrot.lane.b32.xlu0 %v12_v1, %s108_s0 }
   0xb   :  { %v28_v3 = vld [vmem:[#allocation1] sm:$0x3]   ;;  %9 = vst.msk [vmem:[#allocation0] sm:$0x1] %vm8_vm0, %v7_v2   ;;  %11 = vst.msk [vmem:[#allocation0 + $0x1f] sm:$0x2] %vm8_vm0, %v7_v2  }
   0xc   :  { %29 = vrot.lane.b32.xlu1 %v28_v3, %s109_s8  ;;  %v20_v4 = vld [vmem:[#allocation1] sm:$0x3]  }
   0xe   :  { %21 = vrot.lane.b32.xlu0 %v20_v4, %s110_s9 }
  0x12   :  { %v40_v5 = vld [vmem:[#allocation0] sm:$0x1] }
  0x13   :  { %v65_v6 = vld [vmem:[#allocation0 + $0x20] sm:$0x1]  ;;  %43 = vst [vmem:[%s157_s1] sm:$0x1] %v40_v5 }
  0x14   :  { %101 = vst [vmem:[%s157_s1 + $0x4] sm:$0x1] %v65_v6 }
  0x7c   :  { %v14_v7 = vpop.permute.xlu0 %13  }
  0x7d   :  { %17 = vst.msk [vmem:[#allocation0 + $0x8] sm:$0x1] %vm8_vm0, %v14_v7   ;;  %19 = vst.msk [vmem:[#allocation0 + $0x27] sm:$0x2] %vm8_vm0, %v14_v7  }
  0x7e   :  { %v30_v8 = vpop.permute.xlu1 %29  }
  0x7f   :  { %33 = vst.msk [vmem:[#allocation0 + $0x18] sm:$0x1] %vm8_vm0, %v30_v8   ;;  %35 = vst.msk [vmem:[#allocation0 + $0x37] sm:$0x2] %vm8_vm0, %v30_v8  }
  0x80   :  { %v22_v9 = vpop.permute.xlu0 %21  }
  0x81   :  { %25 = vst.msk [vmem:[#allocation0 + $0x10] sm:$0x1] %vm8_vm0, %v22_v9   ;;  %27 = vst.msk [vmem:[#allocation0 + $0x2f] sm:$0x2] %vm8_vm0, %v22_v9  }
  0x84   :  { %v45_v10 = vld [vmem:[#allocation0 + $0x8] sm:$0x1] }
  0x85   :  { %v72_v11 = vld [vmem:[#allocation0 + $0x28] sm:$0x1]  ;;  %98 = vst [vmem:[%s157_s1 + $0x1] sm:$0x1] %v45_v10 }
  0x86   :  { %v58_v12 = vld [vmem:[#allocation0 + $0x18] sm:$0x1]  ;;  %102 = vst [vmem:[%s157_s1 + $0x5] sm:$0x1] %v72_v11 }
  0x87   :  { %100 = vst [vmem:[%s157_s1 + $0x3] sm:$0x1] %v58_v12  ;;  %v86_v13 = vld [vmem:[#allocation0 + $0x38] sm:$0x1] }
  0x88   :  { %104 = vst [vmem:[%s157_s1 + $0x7] sm:$0x1] %v86_v13  ;;  %v51_v14 = vld [vmem:[#allocation0 + $0x10] sm:$0x1] }
  0x89   :  { %v79_v15 = vld [vmem:[#allocation0 + $0x30] sm:$0x1]  ;;  %99 = vst [vmem:[%s157_s1 + $0x2] sm:$0x1] %v51_v14 }
  0x8a   :  { %103 = vst [vmem:[%s157_s1 + $0x6] sm:$0x1] %v79_v15 }

// kernel: bottleneck_forward.7
= control target key start
LH: loop header
LB: loop body
LE: loop exit
PB: predicated region body
PF: predicated region fallthrough
CT: control target
= control target key end

     0   :  { %s1813_s15 = smov 0   ;;  %s1815_s16 = smov 0   ;;  %s2218_s0 = inlined_call_operand.vmem [shape: f32[2,110,8], index: 0, kind: input, shape index: {}]   ;;  %s2219_s1 = inlined_call_operand.vmem [shape: bf16[72,4], index: 1, kind: input, shape index: {}]   ;;  %s2220_s2 = inlined_call_operand.vmem [shape: f32[1,4], index: 2, kind: input, shape index: {}]   ;;  %s2221_s3 = inlined_call_operand.vmem [shape: f32[1,4], index: 3, kind: input, shape index: {}]   ;;  %s2222_s4 = inlined_call_operand.vmem [shape: f32[2,80,4], index: 4, kind: output, shape index: {}]  }
   0x1   :  { %s1817_s17 = smov 0  }
   0x2 LB: > { %s26_s18 = sadd.s32 1, %s1772_s16  ;;  %p1416_p0 = scmp.ge.s32.totalorder %s1776_s17, 1  ;;  %s1776_s17 = sphi %s1817_s17, %s14_s17   ;;  %s1772_s16 = sphi %s1815_s16, %s2224_s16   ;;  %s1768_s15 = sphi %s1813_s15, %s2223_s15  }
   0x3   : > { %p28_p1 = scmp.ge.s32.totalorder %s26_s18, 2  ;;  %p201_p2 = scmp.lt.s32.totalorder %s1776_s17, 3 }
   0x5   : > { %s2226_s18 = smov (%p28_p1, %s26_s18), 0  ;;  %p202_p3 = pnand %p1416_p0, %p201_p2 }
   0x6   : > { %p240_p4 = scmp.lt.s32.totalorder (!%p202_p3), %s1768_s15, 1  ;;  %s1778_s23 = smov (!%p202_p3), 16  }
   0x7   : > { %205 = sbr.rel (%p202_p3) target bundleno = 542 (0x21e), region = 36  ;;  %s1779_s24 = smov (!%p202_p3), 8  }
   0x8   : > { %s1781_s25 = smov (!%p202_p3), 24   ;;  %s1782_s26 = smov (!%p202_p3), 32  }
   0x9   : > { %s1783_s27 = smov (!%p202_p3), 40   ;;  %s1784_s30 = smov (!%p202_p3), 48  }
   0xa   : > { %s1786_s7 = smov (!%p202_p3), 56   ;;  %s1787_s10 = smov (!%p202_p3), 64  }
   0xc   : > { %s2228_s15 = smov (!%p240_p4, %s1768_s15), 1  ;;  %v1780_v12 = vmov 0.0   ;;  %vm314_vm0 = vcmask 60416   ;;  %vm1060_vm1 = vcmask 1043456   ;;  %v1704_v27 = vld [vmem:[%s2219_s1 + $0x20] ss:$0 sps:$4 sm:$0xff]  }
   0xd   : > { %s1668_s19 = smul.u32 112, %s2228_s15  ;;  %1628 = vmatprep.subr.bf16.mxu0 %v1780_v12  ;;  %1658 = vmatprep.subr.bf16.mxu1 %v1780_v12  ;;  %v1062_v29 = vsel %vm1060_vm1, %v1704_v27, 0  ;;  %v1705_v37 = vld [vmem:[%s2219_s1 + $0x18] sm:$0xff]   ;;  %vm1785_vm2 = vmmov 0   ;;  %v1706_v46 = vld [vmem:[%s2219_s1 + $0x10] sm:$0xff]   ;;  %v1707_v51 = vld [vmem:[%s2219_s1 + $0x8] sm:$0xff]  }
   0xe   : > { %1629 = vmatpush3.bf16.msra.mxu0 %v1062_v29  ;;  %1663 = vmatpush3.bf16.msra.mxu1 %v1062_v29  ;;  %v1708_v55 = vld [vmem:[%s2219_s1] sm:$0xff]   ;;  %vm395_vm3 = vcmask 126016   ;;  %vm476_vm4 = vcmask 191616   ;;  %vm557_vm5 = vcmask 257216   ;;  %vm638_vm6 = vcmask 322816  }
   0xf   : > { %s1837_s22 = scalar_lea.vmem %s2218_s0, %s1668_s19  ;;  %1630 = vmatprep.subr.bf16.mxu0 %v1780_v12  ;;  %1659 = vmatprep.subr.bf16.mxu1 %v1780_v12  ;;  %vm719_vm7 = vcmask 388416   ;;  %vm800_vm8 = vcmask 454016   ;;  %vm881_vm9 = vcmask 519616   ;;  %vm962_vm10 = vcmask 585216  }
  0x10   : > { %v406_v0 = vld [vmem:[%s1837_s22 + $0x2] sm:$0xff]  ;;  %v407_v2 = vld [vmem:[%s1837_s22 + $0xa] sm:$0xff]  ;;  %v488_v8 = vld [vmem:[%s1837_s22 + $0x12] sm:$0xff]  ;;  %1638 = vmatprep.mubr.msk.bf16.mxu0 %vm1785_vm2, %v1780_v12  ;;  %1650 = vmatprep.mubr.msk.bf16.mxu1 %vm1785_vm2, %v1780_v12  ;;  %vm1044_vm11 = vcmask 588800   ;;  %vm1281_vm13 = vcmask 31744  }
  0x11   : > { %v325_v1 = vld [vmem:[%s1837_s22 + $0x1] sm:$0xff]  ;;  %v1548_v3 = vpack.c.bf16 %v406_v0, %v406_v0  ;;  %v326_v5 = vld [vmem:[%s1837_s22 + $0x9] sm:$0xff]  ;;  %v1549_v6 = vpack.c.bf16 %v407_v2, %v407_v2  ;;  %v1848_v9 = vpack.c.bf16 %v488_v8, %v488_v8  ;;  %v569_v10 = vld [vmem:[%s1837_s22 + $0x13] sm:$0xff] }
  0x12   : > { %v1538_v4 = vpack.c.bf16 %v325_v1, %v325_v1  ;;  %v1539_v7 = vpack.c.bf16 %v326_v5, %v326_v5  ;;  %v568_v11 = vld [vmem:[%s1837_s22 + $0xb] sm:$0xff]  ;;  %v1569_v13 = vpack.c.bf16 %v569_v10, %v569_v10  ;;  %v650_v15 = vld [vmem:[%s1837_s22 + $0x14] sm:$0xff]  ;;  %v731_v19 = vld [vmem:[%s1837_s22 + $0x1c] sm:$0xff]  ;;  %1631 = vmatpush3.bf16.msra.mxu0 %v1705_v37  ;;  %1664 = vmatpush3.bf16.msra.mxu1 %v1705_v37 }
  0x13   : > { %446 = vrot.lane.b32.xlu1 %v1548_v3, %s1778_s23  ;;  %v1568_v14 = vpack.c.bf16 %v568_v11, %v568_v11  ;;  %v649_v16 = vld [vmem:[%s1837_s22 + $0xc] sm:$0xff]  ;;  %v1579_v17 = vpack.c.bf16 %v650_v15, %v650_v15  ;;  %v264_v20 = vld [vmem:[%s1837_s22] sm:$0xff]  ;;  %v1866_v24 = vpack.c.bf16 %v731_v19, %v731_v19  ;;  %v811_v26 = vld [vmem:[%s1837_s22 + $0x15] sm:$0xff]  ;;  %1632 = vmatprep.subr.bf16.mxu0 %v1780_v12 }
  0x14   : > { %365 = vrot.lane.b32.xlu0 %v1538_v4, %s1779_s24  ;;  %v1578_v18 = vpack.c.bf16 %v649_v16, %v649_v16  ;;  %v1528_v21 = vpack.c.bf16 %v264_v20, %v264_v20  ;;  %v265_v22 = vld [vmem:[%s1837_s22 + $0x8] sm:$0xff]  ;;  %v812_v25 = vld [vmem:[%s1837_s22 + $0x1d] sm:$0xff]  ;;  %v266_v31 = vld [vmem:[%s1837_s22 + $0x10] sm:$0xff]  ;;  %v1598_v32 = vpack.c.bf16 %v811_v26, %v811_v26  ;;  %1660 = vmatprep.subr.bf16.mxu1 %v1780_v12 }
  0x15   : > { %v1529_v23 = vpack.c.bf16 %v265_v22, %v265_v22  ;;  %v1599_v28 = vpack.c.bf16 %v812_v25, %v812_v25  ;;  %v267_v30 = vld [vmem:[%s1837_s22 + $0x18] sm:$0xff]  ;;  %v1530_v36 = vpack.c.bf16 %v266_v31, %v266_v31  ;;  %v270_v39 = vld [vmem:[%s1837_s22 + $0x30] sm:$0xff]  ;;  %v490_v61 = vld [vmem:[%s1837_s22 + $0x22] sm:$0xff] }
  0x16   : > { %315 = vst.msk [vmem:[#allocation2] sm:$0xf] %vm314_vm0, %v1528_v21  ;;  %v893_v33 = vld [vmem:[%s1837_s22 + $0x1e] sm:$0xff]  ;;  %v892_v34 = vld [vmem:[%s1837_s22 + $0x16] sm:$0xff]  ;;  %v1531_v35 = vpack.c.bf16 %v267_v30, %v267_v30  ;;  %v1534_v41 = vpack.c.bf16 %v270_v39, %v270_v39  ;;  %1633 = vmatpush3.bf16.msra.mxu0 %v1706_v46  ;;  %1665 = vmatpush3.bf16.msra.mxu1 %v1706_v46  ;;  %v733_v16 = vld [vmem:[%s1837_s22 + $0x2c] sm:$0xff] }
  0x17   : > { %448 = vrot.lane.b32.xlu1 %v1549_v6, %s1778_s23  ;;  %316 = vst.msk [vmem:[#allocation2 + $0x4] sm:$0xf] %vm314_vm0, %v1529_v23  ;;  %v271_v38 = vld [vmem:[%s1837_s22 + $0x38] sm:$0xff]  ;;  %317 = vst.msk [vmem:[#allocation2 + $0x8] sm:$0xf] %vm314_vm0, %v1530_v36  ;;  %v1609_v42 = vpack.c.bf16 %v893_v33, %v893_v33  ;;  %v1608_v43 = vpack.c.bf16 %v892_v34, %v892_v34  ;;  %1634 = vmatprep.subr.bf16.mxu0 %v1780_v12  ;;  %v494_v63 = vld [vmem:[%s1837_s22 + $0x42] sm:$0xff] }
  0x18   : > { %367 = vrot.lane.b32.xlu0 %v1539_v7, %s1779_s24  ;;  %318 = vst.msk [vmem:[#allocation2 + $0xc] sm:$0xf] %vm314_vm0, %v1531_v35  ;;  %v1535_v40 = vpack.c.bf16 %v271_v38, %v271_v38  ;;  %321 = vst.msk [vmem:[#allocation2 + $0x18] sm:$0xf] %vm314_vm0, %v1534_v41  ;;  %v328_v44 = vld [vmem:[%s1837_s22 + $0x19] sm:$0xff]  ;;  %v327_v45 = vld [vmem:[%s1837_s22 + $0x11] sm:$0xff]  ;;  %1661 = vmatprep.subr.bf16.mxu1 %v1780_v12  ;;  %v1936_v62 = vpack.c.bf16 %v490_v61, %v490_v61 }
  0x19   : > { %v1541_v47 = vpack.c.bf16 %v328_v44, %v328_v44  ;;  %v1540_v48 = vpack.c.bf16 %v327_v45, %v327_v45  ;;  %v332_v49 = vld [vmem:[%s1837_s22 + $0x39] sm:$0xff]  ;;  %v331_v50 = vld [vmem:[%s1837_s22 + $0x31] sm:$0xff]  ;;  %v1942_v0 = vpack.c.bf16 %v494_v63, %v494_v63  ;;  %v571_v1 = vld [vmem:[%s1837_s22 + $0x23] sm:$0xff] }
  0x1a   : > { %322 = vst.msk [vmem:[#allocation2 + $0x1c] sm:$0xf] %vm314_vm0, %v1535_v40  ;;  %v1545_v52 = vpack.c.bf16 %v332_v49, %v332_v49  ;;  %v1544_v53 = vpack.c.bf16 %v331_v50, %v331_v50  ;;  %v409_v54 = vld [vmem:[%s1837_s22 + $0x1a] sm:$0xff]  ;;  %1635 = vmatpush3.bf16.msra.mxu0 %v1707_v51  ;;  %1666 = vmatpush3.bf16.msra.mxu1 %v1707_v51  ;;  %v412_v58 = vld [vmem:[%s1837_s22 + $0x32] sm:$0xff]  ;;  %v575_v5 = vld [vmem:[%s1837_s22 + $0x43] sm:$0xff] }
  0x1b   : > { %529 = vrot.lane.b32.xlu1 %v1848_v9, %s1781_s25  ;;  %1636 = vmatprep.subr.bf16.mxu0 %v1780_v12  ;;  %v1551_v56 = vpack.c.bf16 %v409_v54, %v409_v54  ;;  %v413_v57 = vld [vmem:[%s1837_s22 + $0x3a] sm:$0xff]  ;;  %v1930_v60 = vpack.c.bf16 %v412_v58, %v412_v58  ;;  %v1571_v3 = vpack.c.bf16 %v571_v1, %v571_v1  ;;  %v656_v11 = vld [vmem:[%s1837_s22 + $0x44] sm:$0xff]  ;;  %v814_v20 = vld [vmem:[%s1837_s22 + $0x2d] sm:$0xff] }
  0x1c   : > { %527 = vrot.lane.b32.xlu0 %v1549_v6, %s1781_s25  ;;  %1662 = vmatprep.subr.bf16.mxu1 %v1780_v12  ;;  %v1555_v59 = vpack.c.bf16 %v413_v57, %v413_v57  ;;  %v570_v2 = vld [vmem:[%s1837_s22 + $0x1b] sm:$0xff]  ;;  %v1575_v7 = vpack.c.bf16 %v575_v5, %v575_v5  ;;  %v813_v21 = vld [vmem:[%s1837_s22 + $0x25] sm:$0xff]  ;;  %v1601_v22 = vpack.c.bf16 %v814_v20, %v814_v20  ;;  %v895_v30 = vld [vmem:[%s1837_s22 + $0x2e] sm:$0xff] }
  0x1d   : > { %v1570_v4 = vpack.c.bf16 %v570_v2, %v570_v2  ;;  %v574_v6 = vld [vmem:[%s1837_s22 + $0x3b] sm:$0xff]  ;;  %v1600_v23 = vpack.c.bf16 %v813_v21, %v813_v21  ;;  %v817_v25 = vld [vmem:[%s1837_s22 + $0x45] sm:$0xff]  ;;  %v1611_v34 = vpack.c.bf16 %v895_v30, %v895_v30  ;;  %v899_v38 = vld [vmem:[%s1837_s22 + $0x4e] sm:$0xff] }
  0x1e   : > { %1637 = vmatpush3.bf16.msra.mxu0 %v1708_v55  ;;  %1667 = vmatpush3.bf16.msra.mxu1 %v1708_v55  ;;  %v1574_v8 = vpack.c.bf16 %v574_v6, %v574_v6  ;;  %v1604_v27 = vpack.c.bf16 %v817_v25, %v817_v25  ;;  %v268_v29 = vld [vmem:[%s1837_s22 + $0x20] sm:$0xff]  ;;  %v273_v36 = vld [vmem:[%s1837_s22 + $0x48] sm:$0xff]  ;;  %v573_v58 = vld [vmem:[%s1837_s22 + $0x33] sm:$0xff] }
  0x1f   : > { %610 = vrot.lane.b32.xlu1 %v1569_v13, %s1782_s26  ;;  %v655_v13 = vld [vmem:[%s1837_s22 + $0x3c] sm:$0xff]  ;;  %v894_v31 = vld [vmem:[%s1837_s22 + $0x26] sm:$0xff]  ;;  %v1532_v33 = vpack.c.bf16 %v268_v29, %v268_v29  ;;  %v1537_v40 = vpack.c.bf16 %v273_v36, %v273_v36  ;;  %v1573_v63 = vpack.c.bf16 %v573_v58, %v573_v58  ;;  %v654_v6 = vld [vmem:[%s1837_s22 + $0x34] sm:$0xff] }
  0x20   : > { %608 = vrot.lane.b32.xlu0 %v1568_v14, %s1782_s26  ;;  %v1585_v14 = vpack.c.bf16 %v656_v11, %v656_v11  ;;  %v1961_v15 = vpack.c.bf16 %v655_v13, %v655_v13  ;;  %v1610_v35 = vpack.c.bf16 %v894_v31, %v894_v31  ;;  %v272_v37 = vld [vmem:[%s1837_s22 + $0x40] sm:$0xff]  ;;  %v330_v44 = vld [vmem:[%s1837_s22 + $0x29] sm:$0xff] }
  0x21   : > { %319 = vst.msk [vmem:[#allocation2 + $0x10] sm:$0xf] %vm314_vm0, %v1532_v33  ;;  %v898_v39 = vld [vmem:[%s1837_s22 + $0x46] sm:$0xff]  ;;  %v1536_v41 = vpack.c.bf16 %v272_v37, %v272_v37  ;;  %324 = vst.msk [vmem:[#allocation2 + $0x24] sm:$0xf] %vm314_vm0, %v1537_v40  ;;  %v1543_v46 = vpack.c.bf16 %v330_v44, %v330_v44  ;;  %v739_v20 = vld [vmem:[%s1837_s22 + $0x5c] sm:$0xff] }
  0x22   : > { %v329_v45 = vld [vmem:[%s1837_s22 + $0x21] sm:$0xff]  ;;  %v415_v54 = vld [vmem:[%s1837_s22 + $0x4a] sm:$0xff]  ;;  %v900_v40 = vld [vmem:[%s1837_s22 + $0x56] sm:$0xff] }
  0x23   : > { %691 = vrot.lane.b32.xlu1 %v1579_v17, %s1783_s27  ;;  %323 = vst.msk [vmem:[#allocation2 + $0x20] sm:$0xf] %vm314_vm0, %v1536_v41  ;;  %v333_v49 = vld [vmem:[%s1837_s22 + $0x41] sm:$0xff]  ;;  %v1557_v55 = vpack.c.bf16 %v415_v54, %v415_v54  ;;  %v576_v1 = vld [vmem:[%s1837_s22 + $0x4b] sm:$0xff] }
  0x24   : > { %689 = vrot.lane.b32.xlu0 %v1578_v18, %s1783_s27  ;;  %v737_v18 = vld [vmem:[%s1837_s22 + $0x4c] sm:$0xff]  ;;  %v1546_v51 = vpack.c.bf16 %v333_v49, %v333_v49  ;;  %v1576_v5 = vpack.c.bf16 %v576_v1, %v576_v1  ;;  %v897_v33 = vld [vmem:[%s1837_s22 + $0x3e] sm:$0xff] }
  0x25   : > { %v1973_v19 = vpack.c.bf16 %v737_v18, %v737_v18  ;;  %v1613_v37 = vpack.c.bf16 %v897_v33, %v897_v33 }
  0x27   : > { %772 = vrot.lane.b32.xlu1 %v1866_v24, %s1784_s30 }
  0x28   : > { %770 = vrot.lane.b32.xlu0 %v1579_v17, %s1784_s30  ;;  %v1967_v17 = vpack.c.bf16 %v733_v16, %v733_v16 }
  0x2b   : > { %853 = vrot.lane.b32.xlu1 %v1599_v28, %s1786_s7  ;;  %v269_v28 = vld [vmem:[%s1837_s22 + $0x28] sm:$0xff] }
  0x2c   : > { %851 = vrot.lane.b32.xlu0 %v1598_v32, %s1786_s7  ;;  %v1533_v32 = vpack.c.bf16 %v269_v28, %v269_v28  ;;  %v819_v28 = vld [vmem:[%s1837_s22 + $0x55] sm:$0xff] }
  0x2e   : > { %320 = vst.msk [vmem:[#allocation2 + $0x14] sm:$0xf] %vm314_vm0, %v1533_v32  ;;  %v1606_v32 = vpack.c.bf16 %v819_v28, %v819_v28 }
  0x2f   : > { %934 = vrot.lane.b32.xlu1 %v1609_v42, %s1787_s10  ;;  %v1615_v42 = vpack.c.bf16 %v899_v38, %v899_v38 }
  0x30   : > { %932 = vrot.lane.b32.xlu0 %v1608_v43, %s1787_s10  ;;  %v1614_v43 = vpack.c.bf16 %v898_v39, %v898_v39  ;;  %v901_v39 = vld [vmem:[%s1837_s22 + $0x5e] sm:$0xff] }
  0x31   : > { %v1617_v44 = vpack.c.bf16 %v901_v39, %v901_v39 }
  0x33   : > { %371 = vrot.lane.b32.xlu1 %v1541_v47, %s1779_s24  ;;  %v1542_v47 = vpack.c.bf16 %v329_v45, %v329_v45  ;;  %v1616_v45 = vpack.c.bf16 %v900_v40, %v900_v40 }
  0x34   : > { %369 = vrot.lane.b32.xlu0 %v1540_v48, %s1779_s24  ;;  %v334_v48 = vld [vmem:[%s1837_s22 + $0x49] sm:$0xff] }
  0x35   : > { %v1547_v50 = vpack.c.bf16 %v334_v48, %v334_v48 }
  0x37   : > { %379 = vrot.lane.b32.xlu1 %v1545_v52, %s1779_s24  ;;  %v411_v52 = vld [vmem:[%s1837_s22 + $0x2a] sm:$0xff] }
  0x38   : > { %377 = vrot.lane.b32.xlu0 %v1544_v53, %s1779_s24  ;;  %v1553_v53 = vpack.c.bf16 %v411_v52, %v411_v52 }
  0x3b   : > { %452 = vrot.lane.b32.xlu1 %v1551_v56, %s1778_s23 }
  0x3c   : > { %450 = vrot.lane.b32.xlu0 %v1848_v9, %s1778_s23  ;;  %v652_v9 = vld [vmem:[%s1837_s22 + $0x24] sm:$0xff] }
  0x3d   : > { %v1581_v10 = vpack.c.bf16 %v652_v9, %v652_v9  ;;  %v1583_v9 = vpack.c.bf16 %v654_v6, %v654_v6 }
  0x3f   : > { %460 = vrot.lane.b32.xlu1 %v1555_v59, %s1778_s23 }
  0x40   : > { %458 = vrot.lane.b32.xlu0 %v1930_v60, %s1778_s23 }
  0x43   : > { %533 = vrot.lane.b32.xlu1 %v1936_v62, %s1781_s25 }
  0x44   : > { %531 = vrot.lane.b32.xlu0 %v1551_v56, %s1781_s25  ;;  %v496_v56 = vld [vmem:[%s1837_s22 + $0x52] sm:$0xff] }
  0x45   : > { %v1567_v57 = vpack.c.bf16 %v496_v56, %v496_v56 }
  0x47   : > { %541 = vrot.lane.b32.xlu1 %v1942_v0, %s1781_s25 }
  0x48   : > { %539 = vrot.lane.b32.xlu0 %v1555_v59, %s1781_s25  ;;  %v572_v59 = vld [vmem:[%s1837_s22 + $0x2b] sm:$0xff] }
  0x4b   : > { %614 = vrot.lane.b32.xlu1 %v1571_v3, %s1782_s26 }
  0x4c   : > { %612 = vrot.lane.b32.xlu0 %v1570_v4, %s1782_s26 }
  0x4f   : > { %622 = vrot.lane.b32.xlu1 %v1575_v7, %s1782_s26 }
  0x50   : > { %620 = vrot.lane.b32.xlu0 %v1574_v8, %s1782_s26 }
  0x53   : > { %695 = vrot.lane.b32.xlu1 %v1581_v10, %s1783_s27 }
  0x54   : > { %693 = vrot.lane.b32.xlu0 %v1866_v24, %s1783_s27  ;;  %v818_v24 = vld [vmem:[%s1837_s22 + $0x4d] sm:$0xff] }
  0x55   : > { %v1605_v26 = vpack.c.bf16 %v818_v24, %v818_v24  ;;  %v815_v24 = vld [vmem:[%s1837_s22 + $0x35] sm:$0xff] }
  0x57   : > { %703 = vrot.lane.b32.xlu1 %v1585_v14, %s1783_s27 }
  0x58   : > { %701 = vrot.lane.b32.xlu0 %v1961_v15, %s1783_s27 }
  0x5b   : > { %776 = vrot.lane.b32.xlu1 %v1967_v17, %s1784_s30 }
  0x5c   : > { %774 = vrot.lane.b32.xlu0 %v1581_v10, %s1784_s30  ;;  %v658_v10 = vld [vmem:[%s1837_s22 + $0x54] sm:$0xff] }
  0x5f   : > { %784 = vrot.lane.b32.xlu1 %v1973_v19, %s1784_s30 }
  0x60   : > { %782 = vrot.lane.b32.xlu0 %v1585_v14, %s1784_s30  ;;  %v1587_v14 = vpack.c.bf16 %v658_v10, %v658_v10 }
  0x63   : > { %857 = vrot.lane.b32.xlu1 %v1601_v22, %s1786_s7 }
  0x64   : > { %855 = vrot.lane.b32.xlu0 %v1600_v23, %s1786_s7  ;;  %v816_v23 = vld [vmem:[%s1837_s22 + $0x3d] sm:$0xff] }
  0x67   : > { %865 = vrot.lane.b32.xlu1 %v1605_v26, %s1786_s7  ;;  %v1602_v26 = vpack.c.bf16 %v815_v24, %v815_v24 }
  0x68   : > { %863 = vrot.lane.b32.xlu0 %v1604_v27, %s1786_s7  ;;  %v820_v27 = vld [vmem:[%s1837_s22 + $0x5d] sm:$0xff] }
  0x69   : > { %v1607_v31 = vpack.c.bf16 %v820_v27, %v820_v27 }
  0x6b   : > { %938 = vrot.lane.b32.xlu1 %v1611_v34, %s1787_s10  ;;  %v896_v34 = vld [vmem:[%s1837_s22 + $0x36] sm:$0xff] }
  0x6c   : > { %936 = vrot.lane.b32.xlu0 %v1610_v35, %s1787_s10  ;;  %v1612_v38 = vpack.c.bf16 %v896_v34, %v896_v34 }
  0x6f   : > { %946 = vrot.lane.b32.xlu1 %v1615_v42, %s1787_s10 }
  0x70   : > { %944 = vrot.lane.b32.xlu0 %v1614_v43, %s1787_s10 }
  0x73   : > { %375 = vrot.lane.b32.xlu1 %v1543_v46, %s1779_s24 }
  0x74   : > { %373 = vrot.lane.b32.xlu0 %v1542_v47, %s1779_s24 }
  0x77   : > { %383 = vrot.lane.b32.xlu1 %v1547_v50, %s1779_s24 }
  0x78   : > { %381 = vrot.lane.b32.xlu0 %v1546_v51, %s1779_s24 }
  0x7b   : > { %456 = vrot.lane.b32.xlu1 %v1553_v53, %s1778_s23 }
  0x7c   : > { %454 = vrot.lane.b32.xlu0 %v1936_v62, %s1778_s23 }
  0x7f   : > { %464 = vrot.lane.b32.xlu1 %v1557_v55, %s1778_s23 }
  0x80   : > { %462 = vrot.lane.b32.xlu0 %v1942_v0, %s1778_s23  ;;  %v1572_v0 = vpack.c.bf16 %v572_v59, %v572_v59  ;;  %s1669_s23 = smul.u32 80, %s2228_s15 }
  0x83   : > { %537 = vrot.lane.b32.xlu1 %v1930_v60, %s1781_s25  ;;  %v577_v60 = vld [vmem:[%s1837_s22 + $0x53] sm:$0xff] }
  0x84   : > { %535 = vrot.lane.b32.xlu0 %v1553_v53, %s1781_s25  ;;  %v1577_v4 = vpack.c.bf16 %v577_v60, %v577_v60 }
  0x85   : > { %v447_v61 = vpop.permute.xlu1 %446 }
  0x86   : > { %v366_v62 = vpop.permute.xlu0 %365 }
  0x87   : > { %396 = vst.msk [vmem:[#allocation2] sm:$0xf] %vm395_vm3, %v366_v62  ;;  %545 = vrot.lane.b32.xlu1 %v1567_v57, %s1781_s25 }
  0x88   : > { %543 = vrot.lane.b32.xlu0 %v1557_v55, %s1781_s25  ;;  %477 = vst.msk [vmem:[#allocation2] sm:$0xf] %vm476_vm4, %v447_v61 }
  0x89   : > { %v449_v2 = vpop.permute.xlu1 %448 }
  0x8a   : > { %v368_v3 = vpop.permute.xlu0 %367 }
  0x8b   : > { %397 = vst.msk [vmem:[#allocation2 + $0x4] sm:$0xf] %vm395_vm3, %v368_v3  ;;  %618 = vrot.lane.b32.xlu1 %v1573_v63, %s1782_s26 }
  0x8c   : > { %616 = vrot.lane.b32.xlu0 %v1572_v0, %s1782_s26  ;;  %478 = vst.msk [vmem:[#allocation2 + $0x4] sm:$0xf] %vm476_vm4, %v449_v2 }
  0x8d   : > { %v530_v7 = vpop.permute.xlu1 %529 }
  0x8e   : > { %v528_v8 = vpop.permute.xlu0 %527  ;;  %559 = vst.msk [vmem:[#allocation2 + $0x4] sm:$0xf] %vm557_vm5, %v530_v7 }
  0x8f   : > { %558 = vst.msk [vmem:[#allocation2] sm:$0xf] %vm557_vm5, %v528_v8  ;;  %626 = vrot.lane.b32.xlu1 %v1577_v4, %s1782_s26 }
  0x90   : > { %624 = vrot.lane.b32.xlu0 %v1576_v5, %s1782_s26  ;;  %s2171_s26 = scalar_lea.vmem %s2222_s4, %s1669_s23 }
  0x91   : > { %v611_v11 = vpop.permute.xlu1 %610 }
  0x92   : > { %v609_v13 = vpop.permute.xlu0 %608  ;;  %640 = vst.msk [vmem:[#allocation2 + $0x4] sm:$0xf] %vm638_vm6, %v611_v11 }
  0x93   : > { %639 = vst.msk [vmem:[#allocation2] sm:$0xf] %vm638_vm6, %v609_v13  ;;  %699 = vrot.lane.b32.xlu1 %v1583_v9, %s1783_s27 }
  0x94   : > { %697 = vrot.lane.b32.xlu0 %v1967_v17, %s1783_s27  ;;  %v1597_v17 = vpack.c.bf16 %v739_v20, %v739_v20 }
  0x95   : > { %v692_v16 = vpop.permute.xlu1 %691 }
  0x96   : > { %v690_v18 = vpop.permute.xlu0 %689  ;;  %721 = vst.msk [vmem:[#allocation2 + $0x4] sm:$0xf] %vm719_vm7, %v692_v16 }
  0x97   : > { %720 = vst.msk [vmem:[#allocation2] sm:$0xf] %vm719_vm7, %v690_v18  ;;  %707 = vrot.lane.b32.xlu1 %v1587_v14, %s1783_s27 }
  0x98   : > { %705 = vrot.lane.b32.xlu0 %v1973_v19, %s1783_s27 }
  0x99   : > { %v773_v21 = vpop.permute.xlu1 %772 }
  0x9a   : > { %v771_v22 = vpop.permute.xlu0 %770  ;;  %802 = vst.msk [vmem:[#allocation2 + $0x4] sm:$0xf] %vm800_vm8, %v773_v21 }
  0x9b   : > { %801 = vst.msk [vmem:[#allocation2] sm:$0xf] %vm800_vm8, %v771_v22  ;;  %780 = vrot.lane.b32.xlu1 %v1961_v15, %s1784_s30  ;;  %v1603_v15 = vpack.c.bf16 %v816_v23, %v816_v23 }
  0x9c   : > { %778 = vrot.lane.b32.xlu0 %v1583_v9, %s1784_s30 }
  0x9d   : > { %v854_v19 = vpop.permute.xlu1 %853 }
  0x9e   : > { %v852_v25 = vpop.permute.xlu0 %851  ;;  %883 = vst.msk [vmem:[#allocation2 + $0x4] sm:$0xf] %vm881_vm9, %v854_v19 }
  0x9f   : > { %882 = vst.msk [vmem:[#allocation2] sm:$0xf] %vm881_vm9, %v852_v25  ;;  %788 = vrot.lane.b32.xlu1 %v1597_v17, %s1784_s30 }
  0xa0   : > { %786 = vrot.lane.b32.xlu0 %v1587_v14, %s1784_s30 }
  0xa1   : > { %v935_v29 = vpop.permute.xlu1 %934 }
  0xa2   : > { %v933_v30 = vpop.permute.xlu0 %932  ;;  %964 = vst.msk [vmem:[#allocation2 + $0x4] sm:$0xf] %vm962_vm10, %v935_v29 }
  0xa3   : > { %963 = vst.msk [vmem:[#allocation2] sm:$0xf] %vm962_vm10, %v933_v30  ;;  %861 = vrot.lane.b32.xlu1 %v1603_v15, %s1786_s7 }
  0xa4   : > { %859 = vrot.lane.b32.xlu0 %v1602_v26, %s1786_s7 }
  0xa5   : > { %v372_v35 = vpop.permute.xlu1 %371 }
  0xa6   : > { %v370_v36 = vpop.permute.xlu0 %369  ;;  %399 = vst.msk [vmem:[#allocation2 + $0xc] sm:$0xf] %vm395_vm3, %v372_v35 }
  0xa7   : > { %398 = vst.msk [vmem:[#allocation2 + $0x8] sm:$0xf] %vm395_vm3, %v370_v36  ;;  %869 = vrot.lane.b32.xlu1 %v1607_v31, %s1786_s7 }
  0xa8   : > { %867 = vrot.lane.b32.xlu0 %v1606_v32, %s1786_s7 }
  0xa9   : > { %v380_v41 = vpop.permute.xlu1 %379 }
  0xaa   : > { %v378_v42 = vpop.permute.xlu0 %377  ;;  %v1709_v43 = vld [vmem:[#allocation2] sm:$0xff]   ;;  %403 = vst.msk [vmem:[#allocation2 + $0x1c] sm:$0xf] %vm395_vm3, %v380_v41 }
  0xab   : > { %402 = vst.msk [vmem:[#allocation2 + $0x18] sm:$0xf] %vm395_vm3, %v378_v42  ;;  %942 = vrot.lane.b32.xlu1 %v1613_v37, %s1787_s10  ;;  %1639 = vmatmul.mubr.msk.bf16.vlgmr.msra.gmra.mxu0 %vm1044_vm11, %v1709_v43 }
  0xac   : > { %940 = vrot.lane.b32.xlu0 %v1612_v38, %s1787_s10  ;;  %1642 = vmatprep.mubr.msk.bf16.mxu0 %vm1785_vm2, %v1780_v12 }
  0xad   : > { %v453_v46 = vpop.permute.xlu1 %452 }
  0xae   : > { %v451_v47 = vpop.permute.xlu0 %450  ;;  %480 = vst.msk [vmem:[#allocation2 + $0xc] sm:$0xf] %vm476_vm4, %v453_v46  ;;  %v2156_v46 = vld [vmem:[%s2220_s2] ss:$0 sm:$0xff] }
  0xaf   : > { %479 = vst.msk [vmem:[#allocation2 + $0x8] sm:$0xf] %vm476_vm4, %v451_v47  ;;  %950 = vrot.lane.b32.xlu1 %v1617_v44, %s1787_s10 }
  0xb0   : > { %948 = vrot.lane.b32.xlu0 %v1616_v45, %s1787_s10 }
  0xb1   : > { %v461_v48 = vpop.permute.xlu1 %460 }
  0xb2   : > { %v459_v49 = vpop.permute.xlu0 %458  ;;  %484 = vst.msk [vmem:[#allocation2 + $0x1c] sm:$0xf] %vm476_vm4, %v461_v48  ;;  %v2161_v48 = vld [vmem:[%s2221_s3] ss:$0 sm:$0xff] }
  0xb3   : > { %483 = vst.msk [vmem:[#allocation2 + $0x18] sm:$0xf] %vm476_vm4, %v459_v49 }
  0xb5   : > { %v534_v50 = vpop.permute.xlu1 %533 }
  0xb6   : > { %v532_v51 = vpop.permute.xlu0 %531  ;;  %561 = vst.msk [vmem:[#allocation2 + $0xc] sm:$0xf] %vm557_vm5, %v534_v50 }
  0xb7   : > { %560 = vst.msk [vmem:[#allocation2 + $0x8] sm:$0xf] %vm557_vm5, %v532_v51 }
  0xb9   : > { %v542_v52 = vpop.permute.xlu1 %541 }
  0xba   : > { %v540_v53 = vpop.permute.xlu0 %539  ;;  %565 = vst.msk [vmem:[#allocation2 + $0x1c] sm:$0xf] %vm557_vm5, %v542_v52 }
  0xbb   : > { %564 = vst.msk [vmem:[#allocation2 + $0x18] sm:$0xf] %vm557_vm5, %v540_v53 }
  0xbd   : > { %v615_v54 = vpop.permute.xlu1 %614 }
  0xbe   : > { %v613_v55 = vpop.permute.xlu0 %612  ;;  %642 = vst.msk [vmem:[#allocation2 + $0xc] sm:$0xf] %vm638_vm6, %v615_v54 }
  0xbf   : > { %641 = vst.msk [vmem:[#allocation2 + $0x8] sm:$0xf] %vm638_vm6, %v613_v55 }
  0xc1   : > { %v623_v56 = vpop.permute.xlu1 %622 }
  0xc2   : > { %v621_v57 = vpop.permute.xlu0 %620  ;;  %646 = vst.msk [vmem:[#allocation2 + $0x1c] sm:$0xf] %vm638_vm6, %v623_v56 }
  0xc3   : > { %645 = vst.msk [vmem:[#allocation2 + $0x18] sm:$0xf] %vm638_vm6, %v621_v57 }
  0xc5   : > { %v696_v58 = vpop.permute.xlu1 %695 }
  0xc6   : > { %v694_v59 = vpop.permute.xlu0 %693  ;;  %723 = vst.msk [vmem:[#allocation2 + $0xc] sm:$0xf] %vm719_vm7, %v696_v58 }
  0xc7   : > { %722 = vst.msk [vmem:[#allocation2 + $0x8] sm:$0xf] %vm719_vm7, %v694_v59 }
  0xc9   : > { %v704_v61 = vpop.permute.xlu1 %703 }
  0xca   : > { %v702_v62 = vpop.permute.xlu0 %701  ;;  %727 = vst.msk [vmem:[#allocation2 + $0x1c] sm:$0xf] %vm719_vm7, %v704_v61 }
  0xcb   : > { %726 = vst.msk [vmem:[#allocation2 + $0x18] sm:$0xf] %vm719_vm7, %v702_v62 }
  0xcd   : > { %v777_v63 = vpop.permute.xlu1 %776 }
  0xce   : > { %v775_v0 = vpop.permute.xlu0 %774  ;;  %804 = vst.msk [vmem:[#allocation2 + $0xc] sm:$0xf] %vm800_vm8, %v777_v63 }
  0xcf   : > { %803 = vst.msk [vmem:[#allocation2 + $0x8] sm:$0xf] %vm800_vm8, %v775_v0 }
  0xd1   : > { %v785_v60 = vpop.permute.xlu1 %784 }
  0xd2   : > { %v783_v1 = vpop.permute.xlu0 %782  ;;  %808 = vst.msk [vmem:[#allocation2 + $0x1c] sm:$0xf] %vm800_vm8, %v785_v60 }
  0xd3   : > { %807 = vst.msk [vmem:[#allocation2 + $0x18] sm:$0xf] %vm800_vm8, %v783_v1 }
  0xd5   : > { %v858_v2 = vpop.permute.xlu1 %857 }
  0xd6   : > { %v856_v3 = vpop.permute.xlu0 %855  ;;  %885 = vst.msk [vmem:[#allocation2 + $0xc] sm:$0xf] %vm881_vm9, %v858_v2 }
  0xd7   : > { %884 = vst.msk [vmem:[#allocation2 + $0x8] sm:$0xf] %vm881_vm9, %v856_v3 }
  0xd9   : > { %v866_v4 = vpop.permute.xlu1 %865 }
  0xda   : > { %v864_v5 = vpop.permute.xlu0 %863  ;;  %889 = vst.msk [vmem:[#allocation2 + $0x1c] sm:$0xf] %vm881_vm9, %v866_v4 }
  0xdb   : > { %888 = vst.msk [vmem:[#allocation2 + $0x18] sm:$0xf] %vm881_vm9, %v864_v5 }
  0xdd   : > { %v939_v6 = vpop.permute.xlu1 %938 }
  0xde   : > { %v937_v7 = vpop.permute.xlu0 %936  ;;  %966 = vst.msk [vmem:[#allocation2 + $0xc] sm:$0xf] %vm962_vm10, %v939_v6 }
  0xdf   : > { %965 = vst.msk [vmem:[#allocation2 + $0x8] sm:$0xf] %vm962_vm10, %v937_v7 }
  0xe1   : > { %v947_v8 = vpop.permute.xlu1 %946 }
  0xe2   : > { %v945_v9 = vpop.permute.xlu0 %944  ;;  %970 = vst.msk [vmem:[#allocation2 + $0x1c] sm:$0xf] %vm962_vm10, %v947_v8 }
  0xe3   : > { %969 = vst.msk [vmem:[#allocation2 + $0x18] sm:$0xf] %vm962_vm10, %v945_v9 }
  0xe5   : > { %v376_v10 = vpop.permute.xlu1 %375 }
  0xe6   : > { %v374_v11 = vpop.permute.xlu0 %373  ;;  %v1710_v13 = vld [vmem:[#allocation2 + $0x8] sm:$0xff]   ;;  %401 = vst.msk [vmem:[#allocation2 + $0x14] sm:$0xf] %vm395_vm3, %v376_v10 }
  0xe7   : > { %400 = vst.msk [vmem:[#allocation2 + $0x10] sm:$0xf] %vm395_vm3, %v374_v11  ;;  %1643 = vmatmul.mubr.msk.bf16.gmra.mxu0 %vm1044_vm11, %v1710_v13 }
  0xe8   : > { %1646 = vmatprep.mubr.msk.bf16.mxu0 %vm1785_vm2, %v1780_v12 }
  0xe9   : > { %v384_v14 = vpop.permute.xlu1 %383 }
  0xea   : > { %v382_v16 = vpop.permute.xlu0 %381  ;;  %v1711_v18 = vld [vmem:[#allocation2 + $0x18] sm:$0xff]   ;;  %405 = vst.msk [vmem:[#allocation2 + $0x24] sm:$0xf] %vm395_vm3, %v384_v14 }
  0xeb   : > { %404 = vst.msk [vmem:[#allocation2 + $0x20] sm:$0xf] %vm395_vm3, %v382_v16  ;;  %1651 = vmatmul.mubr.msk.bf16.vlgmr.msra.gmra.mxu1 %vm1044_vm11, %v1711_v18 }
  0xec   : > { %1654 = vmatprep.mubr.msk.bf16.mxu1 %vm1785_vm2, %v1780_v12 }
  0xed   : > { %v457_v20 = vpop.permute.xlu1 %456 }
  0xee   : > { %v455_v21 = vpop.permute.xlu0 %454  ;;  %482 = vst.msk [vmem:[#allocation2 + $0x14] sm:$0xf] %vm476_vm4, %v457_v20 }
  0xef   : > { %481 = vst.msk [vmem:[#allocation2 + $0x10] sm:$0xf] %vm476_vm4, %v455_v21 }
  0xf1   : > { %v465_v22 = vpop.permute.xlu1 %464 }
  0xf2   : > { %v463_v17 = vpop.permute.xlu0 %462  ;;  %486 = vst.msk [vmem:[#allocation2 + $0x24] sm:$0xf] %vm476_vm4, %v465_v22 }
  0xf3   : > { %485 = vst.msk [vmem:[#allocation2 + $0x20] sm:$0xf] %vm476_vm4, %v463_v17 }
  0xf5   : > { %v538_v23 = vpop.permute.xlu1 %537 }
  0xf6   : > { %v536_v24 = vpop.permute.xlu0 %535  ;;  %563 = vst.msk [vmem:[#allocation2 + $0x14] sm:$0xf] %vm557_vm5, %v538_v23 }
  0xf7   : > { %562 = vst.msk [vmem:[#allocation2 + $0x10] sm:$0xf] %vm557_vm5, %v536_v24 }
  0xf9   : > { %v546_v19 = vpop.permute.xlu1 %545 }
  0xfa   : > { %v544_v12 = vpop.permute.xlu0 %543  ;;  %567 = vst.msk [vmem:[#allocation2 + $0x24] sm:$0xf] %vm557_vm5, %v546_v19 }
  0xfb   : > { %566 = vst.msk [vmem:[#allocation2 + $0x20] sm:$0xf] %vm557_vm5, %v544_v12 }
  0xfd   : > { %v619_v25 = vpop.permute.xlu1 %618 }
  0xfe   : > { %v617_v15 = vpop.permute.xlu0 %616  ;;  %644 = vst.msk [vmem:[#allocation2 + $0x14] sm:$0xf] %vm638_vm6, %v619_v25 }
  0xff   : > { %643 = vst.msk [vmem:[#allocation2 + $0x10] sm:$0xf] %vm638_vm6, %v617_v15 }
 0x101   : > { %v627_v26 = vpop.permute.xlu1 %626 }
 0x102   : > { %v625_v27 = vpop.permute.xlu0 %624  ;;  %648 = vst.msk [vmem:[#allocation2 + $0x24] sm:$0xf] %vm638_vm6, %v627_v26 }
 0x103   : > { %647 = vst.msk [vmem:[#allocation2 + $0x20] sm:$0xf] %vm638_vm6, %v625_v27 }
 0x105   : > { %v700_v28 = vpop.permute.xlu1 %699 }
 0x106   : > { %v698_v29 = vpop.permute.xlu0 %697  ;;  %725 = vst.msk [vmem:[#allocation2 + $0x14] sm:$0xf] %vm719_vm7, %v700_v28 }
 0x107   : > { %724 = vst.msk [vmem:[#allocation2 + $0x10] sm:$0xf] %vm719_vm7, %v698_v29 }
 0x109   : > { %v708_v30 = vpop.permute.xlu1 %707 }
 0x10a   : > { %v706_v31 = vpop.permute.xlu0 %705  ;;  %729 = vst.msk [vmem:[#allocation2 + $0x24] sm:$0xf] %vm719_vm7, %v708_v30 }
 0x10b   : > { %728 = vst.msk [vmem:[#allocation2 + $0x20] sm:$0xf] %vm719_vm7, %v706_v31 }
 0x10d   : > { %v781_v32 = vpop.permute.xlu1 %780 }
 0x10e   : > { %v779_v33 = vpop.permute.xlu0 %778  ;;  %806 = vst.msk [vmem:[#allocation2 + $0x14] sm:$0xf] %vm800_vm8, %v781_v32 }
 0x10f   : > { %805 = vst.msk [vmem:[#allocation2 + $0x10] sm:$0xf] %vm800_vm8, %v779_v33 }
 0x111   : > { %v789_v34 = vpop.permute.xlu1 %788 }
 0x112   : > { %v787_v35 = vpop.permute.xlu0 %786  ;;  %810 = vst.msk [vmem:[#allocation2 + $0x24] sm:$0xf] %vm800_vm8, %v789_v34 }
 0x113   : > { %809 = vst.msk [vmem:[#allocation2 + $0x20] sm:$0xf] %vm800_vm8, %v787_v35 }
 0x115   : > { %v862_v36 = vpop.permute.xlu1 %861 }
 0x116   : > { %v860_v37 = vpop.permute.xlu0 %859  ;;  %887 = vst.msk [vmem:[#allocation2 + $0x14] sm:$0xf] %vm881_vm9, %v862_v36 }
 0x117   : > { %886 = vst.msk [vmem:[#allocation2 + $0x10] sm:$0xf] %vm881_vm9, %v860_v37 }
 0x119   : > { %v870_v38 = vpop.permute.xlu1 %869 }
 0x11a   : > { %v868_v39 = vpop.permute.xlu0 %867  ;;  %891 = vst.msk [vmem:[#allocation2 + $0x24] sm:$0xf] %vm881_vm9, %v870_v38 }
 0x11b   : > { %890 = vst.msk [vmem:[#allocation2 + $0x20] sm:$0xf] %vm881_vm9, %v868_v39 }
 0x11d   : > { %v943_v40 = vpop.permute.xlu1 %942 }
 0x11e   : > { %v941_v41 = vpop.permute.xlu0 %940  ;;  %968 = vst.msk [vmem:[#allocation2 + $0x14] sm:$0xf] %vm962_vm10, %v943_v40 }
 0x11f   : > { %967 = vst.msk [vmem:[#allocation2 + $0x10] sm:$0xf] %vm962_vm10, %v941_v41 }
 0x121   : > { %v951_v42 = vpop.permute.xlu1 %950 }
 0x122   : > { %v949_v43 = vpop.permute.xlu0 %948  ;;  %972 = vst.msk [vmem:[#allocation2 + $0x24] sm:$0xf] %vm962_vm10, %v951_v42 }
 0x123   : > { %971 = vst.msk [vmem:[#allocation2 + $0x20] sm:$0xf] %vm962_vm10, %v949_v43 }
 0x126   : > { %v1712_v44 = vld [vmem:[#allocation2 + $0x10] sm:$0xff]  }
 0x127   : > { %1647 = vmatmul.mubr.msk.bf16.gmra.mxu0 %vm1044_vm11, %v1712_v44 }
 0x12a   : > { %v1713_v45 = vld [vmem:[#allocation2 + $0x20] sm:$0xff]  }
 0x12b   : > { %1655 = vmatmul.mubr.msk.bf16.gmra.mxu1 %vm1044_vm11, %v1713_v45 }
 0x16b   : > { %v1098_v47 = vpop.f32.mrf.mxu0 }
 0x16c   : > { %v1144_v49 = vmul.f32 %v2156_v46, %v1098_v47 }
 0x16d   : > { %v1640_v50 = vpop.f32.mrf.mxu0 }
 0x16e   : > { %v1161_v51 = vadd.f32 %v2161_v48, %v1144_v49 }
 0x16f   : > { %v1101_v52 = vpop.f32.mrf.mxu0 }
 0x170   : > { %v1171_v53 = vand.u32 2147483647, %v1161_v51  ;;  %v1145_v54 = vmul.f32 %v2156_v46, %v1101_v52  ;;  %vm1211_vm12 = vcmp.ge.f32.partialorder %v1161_v51, 0.0 }
 0x171   : > { %v1641_v55 = vpop.f32.mrf.mxu0 }
 0x172   : > { %v1181_v56 = vsub.f32 0.0, %v1171_v53  ;;  %v1162_v57 = vadd.f32 %v2161_v48, %v1145_v54 }
 0x174   : > { %v1191_v58 = vmul.f32 1.442695, %v1181_v56  ;;  %v1172_v59 = vand.u32 2147483647, %v1162_v57  ;;  %vm1212_vm14 = vcmp.ge.f32.partialorder %v1162_v57, 0.0 }
 0x176   : > { %1714 = vpow2.f32 %v1191_v58  ;;  %v1182_v61 = vsub.f32 0.0, %v1172_v59 }
 0x178   : > { %v1193_v62 = vmul.f32 1.442695, %v1182_v61 }
 0x17a   : > { %1716 = vpow2.f32 %v1193_v62 }
 0x183   : > { %v1715_v63 = vpop.eup %1714 }
 0x184   : > { %v1221_v0 = vadd.f32 1.0, %v1715_v63 }
 0x186   : > { %1718 = vrcp.f32 %v1221_v0 }
 0x187   : > { %v1717_v60 = vpop.eup %1716 }
 0x188   : > { %v1222_v1 = vadd.f32 1.0, %v1717_v60 }
 0x18a   : > { %1720 = vrcp.f32 %v1222_v1 }
 0x193   : > { %v1719_v2 = vpop.eup %1718 }
 0x194   : > { %v1251_v3 = vmul.f32 %v1719_v2, %v1715_v63 }
 0x196   : > { %v1261_v4 = vsel %vm1211_vm12, %v1719_v2, %v1251_v3 }
 0x197   : > { %v1721_v5 = vpop.eup %1720  ;;  %v1271_v6 = vmul.f32 %v1261_v4, %v1161_v51 }
 0x198   : > { %v1252_v7 = vmul.f32 %v1721_v5, %v1717_v60 }
 0x199   : > { %1282 = vst.msk [vmem:[%s2171_s26] sm:$0xff] %vm1281_vm13, %v1271_v6 }
 0x19a   : > { %v1262_v8 = vsel %vm1212_vm14, %v1721_v5, %v1252_v7 }
 0x19b   : > { %v1272_v9 = vmul.f32 %v1262_v8, %v1162_v57 }
 0x19d   : > { %1283 = vst.msk [vmem:[%s2171_s26 + $0x8] sm:$0xff] %vm1281_vm13, %v1272_v9 }
 0x1a7   : > { %v1106_v10 = vpop.f32.mrf.mxu0 }
 0x1a8   : > { %v1146_v11 = vmul.f32 %v2156_v46, %v1106_v10 }
 0x1a9   : > { %v1644_v13 = vpop.f32.mrf.mxu0 }
 0x1aa   : > { %v1163_v14 = vadd.f32 %v2161_v48, %v1146_v11 }
 0x1ab   : > { %v1109_v16 = vpop.f32.mrf.mxu0  ;;  %v1122_v18 = vpop.f32.mrf.mxu1 }
 0x1ac   : > { %v1173_v20 = vand.u32 2147483647, %v1163_v14  ;;  %v1147_v21 = vmul.f32 %v2156_v46, %v1109_v16  ;;  %v1150_v22 = vmul.f32 %v2156_v46, %v1122_v18  ;;  %vm1213_vm15 = vcmp.ge.f32.partialorder %v1163_v14, 0.0 }
 0x1ad   : > { %v1645_v17 = vpop.f32.mrf.mxu0  ;;  %v1652_v23 = vpop.f32.mrf.mxu1 }
 0x1ae   : > { %v1183_v24 = vsub.f32 0.0, %v1173_v20  ;;  %v1164_v19 = vadd.f32 %v2161_v48, %v1147_v21  ;;  %v1167_v12 = vadd.f32 %v2161_v48, %v1150_v22 }
 0x1af   : > { %v1125_v25 = vpop.f32.mrf.mxu1 }
 0x1b0   : > { %v1195_v15 = vmul.f32 1.442695, %v1183_v24  ;;  %v1174_v26 = vand.u32 2147483647, %v1164_v19  ;;  %v1177_v27 = vand.u32 2147483647, %v1167_v12  ;;  %v1151_v28 = vmul.f32 %v2156_v46, %v1125_v25 }
 0x1b1   : > { %v1653_v29 = vpop.f32.mrf.mxu1  ;;  %vm1214_vm0 = vcmp.ge.f32.partialorder %v1164_v19, 0.0  ;;  %vm1217_vm1 = vcmp.ge.f32.partialorder %v1167_v12, 0.0 }
 0x1b2   : > { %1722 = vpow2.f32 %v1195_v15  ;;  %v1184_v30 = vsub.f32 0.0, %v1174_v26  ;;  %v1187_v31 = vsub.f32 0.0, %v1177_v27  ;;  %v1168_v32 = vadd.f32 %v2161_v48, %v1151_v28 }
 0x1b4   : > { %v1197_v33 = vmul.f32 1.442695, %v1184_v30  ;;  %v1203_v34 = vmul.f32 1.442695, %v1187_v31  ;;  %v1178_v35 = vand.u32 2147483647, %v1168_v32 }
 0x1b5   : > { %vm1218_vm2 = vcmp.ge.f32.partialorder %v1168_v32, 0.0 }
 0x1b6   : > { %1724 = vpow2.f32 %v1197_v33  ;;  %v1188_v36 = vsub.f32 0.0, %v1178_v35 }
 0x1b7   : > { %1726 = vpow2.f32 %v1203_v34 }
 0x1b8   : > { %v1205_v37 = vmul.f32 1.442695, %v1188_v36 }
 0x1ba   : > { %1728 = vpow2.f32 %v1205_v37 }
 0x1bf   : > { %v1723_v38 = vpop.eup %1722 }
 0x1c0   : > { %v1223_v39 = vadd.f32 1.0, %v1723_v38 }
 0x1c2   : > { %1730 = vrcp.f32 %v1223_v39 }
 0x1c3   : > { %v1725_v40 = vpop.eup %1724 }
 0x1c4   : > { %v1727_v41 = vpop.eup %1726  ;;  %v1224_v42 = vadd.f32 1.0, %v1725_v40 }
 0x1c5   : > { %v1227_v43 = vadd.f32 1.0, %v1727_v41 }
 0x1c6   : > { %1732 = vrcp.f32 %v1224_v42 }
 0x1c7   : > { %1734 = vrcp.f32 %v1227_v43  ;;  %v1729_v44 = vpop.eup %1728 }
 0x1c8   : > { %v1228_v45 = vadd.f32 1.0, %v1729_v44 }
 0x1ca   : > { %1736 = vrcp.f32 %v1228_v45 }
 0x1cf   : > { %v1731_v47 = vpop.eup %1730 }
 0x1d0   : > { %v1253_v49 = vmul.f32 %v1731_v47, %v1723_v38 }
 0x1d2   : > { %v1263_v50 = vsel %vm1213_vm15, %v1731_v47, %v1253_v49 }
 0x1d3   : > { %v1733_v51 = vpop.eup %1732  ;;  %v1273_v52 = vmul.f32 %v1263_v50, %v1163_v14 }
 0x1d4   : > { %v1735_v53 = vpop.eup %1734  ;;  %v1254_v54 = vmul.f32 %v1733_v51, %v1725_v40 }
 0x1d5   : > { %1284 = vst.msk [vmem:[%s2171_s26 + $0x10] sm:$0xff] %vm1281_vm13, %v1273_v52  ;;  %v1257_v55 = vmul.f32 %v1735_v53, %v1727_v41 }
 0x1d6   : > { %v1264_v56 = vsel %vm1214_vm0, %v1733_v51, %v1254_v54 }
 0x1d7   : > { %v1274_v57 = vmul.f32 %v1264_v56, %v1164_v19  ;;  %v1267_v58 = vsel %vm1217_vm1, %v1735_v53, %v1257_v55  ;;  %v1737_v59 = vpop.eup %1736 }
 0x1d8   : > { %v1277_v61 = vmul.f32 %v1267_v58, %v1167_v12  ;;  %v1258_v62 = vmul.f32 %v1737_v59, %v1729_v44 }
 0x1d9   : > { %1285 = vst.msk [vmem:[%s2171_s26 + $0x18] sm:$0xff] %vm1281_vm13, %v1274_v57 }
 0x1da   : > { %1288 = vst.msk [vmem:[%s2171_s26 + $0x30] sm:$0xff] %vm1281_vm13, %v1277_v61  ;;  %v1268_v63 = vsel %vm1218_vm2, %v1737_v59, %v1258_v62 }
 0x1db   : > { %v1278_v0 = vmul.f32 %v1268_v63, %v1168_v32 }
 0x1dd   : > { %1289 = vst.msk [vmem:[%s2171_s26 + $0x38] sm:$0xff] %vm1281_vm13, %v1278_v0 }
 0x1e7   : > { %v1114_v60 = vpop.f32.mrf.mxu0 }
 0x1e8   : > { %v1148_v1 = vmul.f32 %v2156_v46, %v1114_v60 }
 0x1e9   : > { %v1648_v2 = vpop.f32.mrf.mxu0 }
 0x1ea   : > { %v1165_v3 = vadd.f32 %v2161_v48, %v1148_v1 }
 0x1eb   : > { %v1117_v4 = vpop.f32.mrf.mxu0  ;;  %v1130_v5 = vpop.f32.mrf.mxu1 }
 0x1ec   : > { %v1175_v6 = vand.u32 2147483647, %v1165_v3  ;;  %v1149_v7 = vmul.f32 %v2156_v46, %v1117_v4  ;;  %v1152_v8 = vmul.f32 %v2156_v46, %v1130_v5  ;;  %vm1215_vm3 = vcmp.ge.f32.partialorder %v1165_v3, 0.0 }
 0x1ed   : > { %v1649_v9 = vpop.f32.mrf.mxu0  ;;  %v1656_v10 = vpop.f32.mrf.mxu1 }
 0x1ee   : > { %v1185_v11 = vsub.f32 0.0, %v1175_v6  ;;  %v1166_v13 = vadd.f32 %v2161_v48, %v1149_v7  ;;  %v1169_v14 = vadd.f32 %v2161_v48, %v1152_v8 }
 0x1ef   : > { %v1133_v16 = vpop.f32.mrf.mxu1 }
 0x1f0   : > { %v1199_v18 = vmul.f32 1.442695, %v1185_v11  ;;  %v1176_v20 = vand.u32 2147483647, %v1166_v13  ;;  %v1179_v21 = vand.u32 2147483647, %v1169_v14  ;;  %v1153_v22 = vmul.f32 %v2156_v46, %v1133_v16 }
 0x1f1   : > { %v1657_v17 = vpop.f32.mrf.mxu1  ;;  %vm1216_vm4 = vcmp.ge.f32.partialorder %v1166_v13, 0.0  ;;  %vm1219_vm5 = vcmp.ge.f32.partialorder %v1169_v14, 0.0 }
 0x1f2   : > { %1738 = vpow2.f32 %v1199_v18  ;;  %v1186_v23 = vsub.f32 0.0, %v1176_v20  ;;  %v1189_v24 = vsub.f32 0.0, %v1179_v21  ;;  %v1170_v19 = vadd.f32 %v2161_v48, %v1153_v22 }
 0x1f4   : > { %v1201_v12 = vmul.f32 1.442695, %v1186_v23  ;;  %v1207_v25 = vmul.f32 1.442695, %v1189_v24  ;;  %v1180_v15 = vand.u32 2147483647, %v1170_v19 }
 0x1f5   : > { %vm1220_vm6 = vcmp.ge.f32.partialorder %v1170_v19, 0.0 }
 0x1f6   : > { %1740 = vpow2.f32 %v1201_v12  ;;  %v1190_v26 = vsub.f32 0.0, %v1180_v15 }
 0x1f7   : > { %1742 = vpow2.f32 %v1207_v25 }
 0x1f8   : > { %v1209_v27 = vmul.f32 1.442695, %v1190_v26 }
 0x1fa   : > { %1744 = vpow2.f32 %v1209_v27 }
 0x1ff   : > { %v1739_v28 = vpop.eup %1738 }
 0x200   : > { %v1225_v29 = vadd.f32 1.0, %v1739_v28 }
 0x202   : > { %1746 = vrcp.f32 %v1225_v29 }
 0x203   : > { %v1741_v30 = vpop.eup %1740 }
 0x204   : > { %v1743_v31 = vpop.eup %1742  ;;  %v1226_v46 = vadd.f32 1.0, %v1741_v30 }
 0x205   : > { %v1229_v32 = vadd.f32 1.0, %v1743_v31 }
 0x206   : > { %1748 = vrcp.f32 %v1226_v46 }
 0x207   : > { %1750 = vrcp.f32 %v1229_v32  ;;  %v1745_v33 = vpop.eup %1744 }
 0x208   : > { %v1230_v48 = vadd.f32 1.0, %v1745_v33 }
 0x20a   : > { %1752 = vrcp.f32 %v1230_v48 }
 0x20f   : > { %v1747_v34 = vpop.eup %1746 }
 0x210   : > { %v1255_v35 = vmul.f32 %v1747_v34, %v1739_v28 }
 0x212   : > { %v1265_v36 = vsel %vm1215_vm3, %v1747_v34, %v1255_v35 }
 0x213   : > { %v1749_v37 = vpop.eup %1748  ;;  %v1275_v38 = vmul.f32 %v1265_v36, %v1165_v3 }
 0x214   : > { %v1751_v39 = vpop.eup %1750  ;;  %v1256_v40 = vmul.f32 %v1749_v37, %v1741_v30 }
 0x215   : > { %1286 = vst.msk [vmem:[%s2171_s26 + $0x20] sm:$0xff] %vm1281_vm13, %v1275_v38  ;;  %v1259_v41 = vmul.f32 %v1751_v39, %v1743_v31 }
 0x216   : > { %v1266_v42 = vsel %vm1216_vm4, %v1749_v37, %v1256_v40 }
 0x217   : > { %v1276_v43 = vmul.f32 %v1266_v42, %v1166_v13  ;;  %v1269_v44 = vsel %vm1219_vm5, %v1751_v39, %v1259_v41  ;;  %v1753_v45 = vpop.eup %1752 }
 0x218   : > { %v1279_v47 = vmul.f32 %v1269_v44, %v1169_v14  ;;  %v1260_v49 = vmul.f32 %v1753_v45, %v1745_v33 }
 0x219   : > { %1287 = vst.msk [vmem:[%s2171_s26 + $0x28] sm:$0xff] %vm1281_vm13, %v1276_v43 }
 0x21a   : > { %1290 = vst.msk [vmem:[%s2171_s26 + $0x40] sm:$0xff] %vm1281_vm13, %v1279_v47  ;;  %v1270_v50 = vsel %vm1220_vm6, %v1753_v45, %v1260_v49 }
 0x21b   : > { %v1280_v51 = vmul.f32 %v1270_v50, %v1170_v19 }
 0x21d   : > { %1291 = vst.msk [vmem:[%s2171_s26 + $0x48] sm:$0xff] %vm1281_vm13, %v1280_v51 }
 0x21e PF: > { %s14_s17 = sadd.s32 1, %s1776_s17   ;;  %s2223_s15 = smov %s1772_s16 }
 0x21f   : > { %p11_p5 = scmp.ge.s32.totalorder %s14_s17, 4   ;;  %s2224_s16 = smov %s2226_s18 }
 0x221   :  { %13 = sbr.rel (!%p11_p5) target bundleno = 2 (0x2), region = 75 }

// kernel: bottleneck_forward.8
= control target key start
LH: loop header
LB: loop body
LE: loop exit
PB: predicated region body
PF: predicated region fallthrough
CT: control target
= control target key end

     0   :  { %s1783_s15 = smov 0   ;;  %s1785_s16 = smov 0   ;;  %s2178_s0 = inlined_call_operand.vmem [shape: f32[2,110,4], index: 0, kind: input, shape index: {}]   ;;  %s2179_s1 = inlined_call_operand.vmem [shape: bf16[36,8], index: 1, kind: input, shape index: {}]   ;;  %s2180_s2 = inlined_call_operand.vmem [shape: f32[1,8], index: 2, kind: input, shape index: {}]   ;;  %s2181_s3 = inlined_call_operand.vmem [shape: f32[1,8], index: 3, kind: input, shape index: {}]   ;;  %s2182_s4 = inlined_call_operand.vmem [shape: f32[2,80,8], index: 4, kind: output, shape index: {}]  }
   0x1   :  { %s1787_s17 = smov 0  }
   0x2 LB: > { %s26_s18 = sadd.s32 1, %s1742_s16  ;;  %p1400_p0 = scmp.ge.s32.totalorder %s1746_s17, 1  ;;  %s1746_s17 = sphi %s1787_s17, %s14_s17   ;;  %s1742_s16 = sphi %s1785_s16, %s2184_s16   ;;  %s1738_s15 = sphi %s1783_s15, %s2183_s15  }
   0x3   : > { %p28_p1 = scmp.ge.s32.totalorder %s26_s18, 2  ;;  %p201_p2 = scmp.lt.s32.totalorder %s1746_s17, 3 }
   0x5   : > { %s2186_s18 = smov (%p28_p1, %s26_s18), 0  ;;  %p202_p3 = pnand %p1400_p0, %p201_p2 }
   0x6   : > { %p240_p4 = scmp.lt.s32.totalorder (!%p202_p3), %s1738_s15, 1  ;;  %s1748_s23 = smov (!%p202_p3), 8  }
   0x7   : > { %205 = sbr.rel (%p202_p3) target bundleno = 542 (0x21e), region = 36  ;;  %s1749_s24 = smov (!%p202_p3), 4  }
   0x8   : > { %s1750_s25 = smov (!%p202_p3), 12   ;;  %s1751_s26 = smov (!%p202_p3), 16  }
   0x9   : > { %s1753_s27 = smov (!%p202_p3), 20   ;;  %s1754_s30 = smov (!%p202_p3), 24  }
   0xa   : > { %s1756_s7 = smov (!%p202_p3), 28   ;;  %s1757_s10 = smov (!%p202_p3), 32  }
   0xc   : > { %s2188_s15 = smov (!%p240_p4, %s1738_s15), 1  ;;  %vm314_vm0 = vcmask 27648   ;;  %v1752_v20 = vmov 0.0   ;;  %vm1044_vm1 = vcmask 1041408   ;;  %v1677_v38 = vld [vmem:[%s2179_s1 + $0x8] sm:$0xff]   ;;  %vm1755_vm2 = vmmov 0  }
   0xd   : > { %s1640_s19 = smul.u32 112, %s2188_s15  ;;  %1608 = vmatprep.subr.bf16.mxu0 %v1752_v20  ;;  %1634 = vmatprep.subr.bf16.mxu1 %v1752_v20  ;;  %v1676_v27 = vld [vmem:[%s2179_s1 + $0x10] ss:$0 sps:$4 sm:$0x33]   ;;  %v1678_v46 = vld [vmem:[%s2179_s1] sm:$0xff]   ;;  %vm395_vm3 = vcmask 60448  }
   0xe   : > { %v1046_v29 = vsel %vm1044_vm1, %v1676_v27, 0  ;;  %1614 = vmatprep.mubr.msk.bf16.mxu0 %vm1755_vm2, %v1752_v20  ;;  %1626 = vmatprep.mubr.msk.bf16.mxu1 %vm1755_vm2, %v1752_v20  ;;  %vm476_vm4 = vcmask 93248   ;;  %vm557_vm5 = vcmask 126048   ;;  %vm638_vm6 = vcmask 158848  }
   0xf   : > { %s1807_s22 = scalar_lea.vmem %s2178_s0, %s1640_s19  ;;  %1609 = vmatpush3.bf16.msra.mxu0 %v1046_v29  ;;  %1637 = vmatpush3.bf16.msra.mxu1 %v1046_v29  ;;  %vm719_vm7 = vcmask 191648   ;;  %vm800_vm8 = vcmask 224448   ;;  %vm881_vm9 = vcmask 257248   ;;  %vm962_vm10 = vcmask 290048   ;;  %s1641_s19 = smul.u32 80, %s2188_s15 }
  0x10   : > { %v406_v0 = vld [vmem:[%s1807_s22 + $0x2] sm:$0xff]  ;;  %v407_v2 = vld [vmem:[%s1807_s22 + $0xa] sm:$0xff]  ;;  %v488_v8 = vld [vmem:[%s1807_s22 + $0x12] sm:$0xff]  ;;  %1610 = vmatprep.subr.bf16.mxu0 %v1752_v20  ;;  %1635 = vmatprep.subr.bf16.mxu1 %v1752_v20  ;;  %vm1028_vm11 = vcmask 293888   ;;  %vm1265_vm13 = vcmask 64512  }
  0x11   : > { %v325_v1 = vld [vmem:[%s1807_s22 + $0x1] sm:$0xff]  ;;  %v1530_v3 = vpack.c.bf16 %v406_v0, %v406_v0  ;;  %v326_v5 = vld [vmem:[%s1807_s22 + $0x9] sm:$0xff]  ;;  %v1531_v6 = vpack.c.bf16 %v407_v2, %v407_v2  ;;  %v1818_v9 = vpack.c.bf16 %v488_v8, %v488_v8  ;;  %v569_v10 = vld [vmem:[%s1807_s22 + $0x13] sm:$0xff] }
  0x12   : > { %v1520_v4 = vpack.c.bf16 %v325_v1, %v325_v1  ;;  %v1521_v7 = vpack.c.bf16 %v326_v5, %v326_v5  ;;  %v568_v11 = vld [vmem:[%s1807_s22 + $0xb] sm:$0xff]  ;;  %v1551_v12 = vpack.c.bf16 %v569_v10, %v569_v10  ;;  %v650_v14 = vld [vmem:[%s1807_s22 + $0x14] sm:$0xff]  ;;  %v731_v18 = vld [vmem:[%s1807_s22 + $0x1c] sm:$0xff] }
  0x13   : > { %446 = vrot.lane.b32.xlu1 %v1530_v3, %s1748_s23  ;;  %v1550_v13 = vpack.c.bf16 %v568_v11, %v568_v11  ;;  %v649_v15 = vld [vmem:[%s1807_s22 + $0xc] sm:$0xff]  ;;  %v1561_v16 = vpack.c.bf16 %v650_v14, %v650_v14  ;;  %v264_v19 = vld [vmem:[%s1807_s22] sm:$0xff]  ;;  %v1836_v24 = vpack.c.bf16 %v731_v18, %v731_v18  ;;  %v811_v26 = vld [vmem:[%s1807_s22 + $0x15] sm:$0xff]  ;;  %1611 = vmatpush3.bf16.msra.mxu0 %v1677_v38 }
  0x14   : > { %365 = vrot.lane.b32.xlu0 %v1520_v4, %s1749_s24  ;;  %v1560_v17 = vpack.c.bf16 %v649_v15, %v649_v15  ;;  %v1510_v21 = vpack.c.bf16 %v264_v19, %v264_v19  ;;  %v265_v22 = vld [vmem:[%s1807_s22 + $0x8] sm:$0xff]  ;;  %v812_v25 = vld [vmem:[%s1807_s22 + $0x1d] sm:$0xff]  ;;  %v266_v31 = vld [vmem:[%s1807_s22 + $0x10] sm:$0xff]  ;;  %v1580_v33 = vpack.c.bf16 %v811_v26, %v811_v26  ;;  %1638 = vmatpush3.bf16.msra.mxu1 %v1677_v38 }
  0x15   : > { %v1511_v23 = vpack.c.bf16 %v265_v22, %v265_v22  ;;  %v267_v28 = vld [vmem:[%s1807_s22 + $0x18] sm:$0xff]  ;;  %v1581_v32 = vpack.c.bf16 %v812_v25, %v812_v25  ;;  %v1512_v35 = vpack.c.bf16 %v266_v31, %v266_v31  ;;  %v270_v40 = vld [vmem:[%s1807_s22 + $0x30] sm:$0xff]  ;;  %1612 = vmatprep.subr.bf16.mxu0 %v1752_v20  ;;  %1636 = vmatprep.subr.bf16.mxu1 %v1752_v20  ;;  %v490_v59 = vld [vmem:[%s1807_s22 + $0x22] sm:$0xff] }
  0x16   : > { %315 = vst.msk [vmem:[#allocation2] sm:$0xf] %vm314_vm0, %v1510_v21  ;;  %v1513_v30 = vpack.c.bf16 %v267_v28, %v267_v28  ;;  %v893_v34 = vld [vmem:[%s1807_s22 + $0x1e] sm:$0xff]  ;;  %v892_v37 = vld [vmem:[%s1807_s22 + $0x16] sm:$0xff]  ;;  %v1516_v41 = vpack.c.bf16 %v270_v40, %v270_v40  ;;  %v1896_v60 = vpack.c.bf16 %v490_v59, %v490_v59  ;;  %v737_v15 = vld [vmem:[%s1807_s22 + $0x4c] sm:$0xff] }
  0x17   : > { %448 = vrot.lane.b32.xlu1 %v1531_v6, %s1748_s23  ;;  %316 = vst.msk [vmem:[#allocation2 + $0x4] sm:$0xf] %vm314_vm0, %v1511_v23  ;;  %v271_v36 = vld [vmem:[%s1807_s22 + $0x38] sm:$0xff]  ;;  %317 = vst.msk [vmem:[#allocation2 + $0x8] sm:$0xf] %vm314_vm0, %v1512_v35  ;;  %v1591_v42 = vpack.c.bf16 %v893_v34, %v893_v34  ;;  %v1590_v43 = vpack.c.bf16 %v892_v37, %v892_v37  ;;  %1613 = vmatpush3.bf16.msra.mxu0 %v1678_v46  ;;  %v494_v61 = vld [vmem:[%s1807_s22 + $0x42] sm:$0xff] }
  0x18   : > { %367 = vrot.lane.b32.xlu0 %v1521_v7, %s1749_s24  ;;  %318 = vst.msk [vmem:[#allocation2 + $0xc] sm:$0xf] %vm314_vm0, %v1513_v30  ;;  %v1517_v39 = vpack.c.bf16 %v271_v36, %v271_v36  ;;  %321 = vst.msk [vmem:[#allocation2 + $0x18] sm:$0xf] %vm314_vm0, %v1516_v41  ;;  %v328_v44 = vld [vmem:[%s1807_s22 + $0x19] sm:$0xff]  ;;  %v327_v45 = vld [vmem:[%s1807_s22 + $0x11] sm:$0xff]  ;;  %1639 = vmatpush3.bf16.msra.mxu1 %v1678_v46  ;;  %v1902_v62 = vpack.c.bf16 %v494_v61, %v494_v61 }
  0x19   : > { %v1523_v47 = vpack.c.bf16 %v328_v44, %v328_v44  ;;  %v1522_v48 = vpack.c.bf16 %v327_v45, %v327_v45  ;;  %v332_v49 = vld [vmem:[%s1807_s22 + $0x39] sm:$0xff]  ;;  %v331_v50 = vld [vmem:[%s1807_s22 + $0x31] sm:$0xff]  ;;  %v571_v63 = vld [vmem:[%s1807_s22 + $0x23] sm:$0xff] }
  0x1a   : > { %322 = vst.msk [vmem:[#allocation2 + $0x1c] sm:$0xf] %vm314_vm0, %v1517_v39  ;;  %v1527_v51 = vpack.c.bf16 %v332_v49, %v332_v49  ;;  %v1526_v52 = vpack.c.bf16 %v331_v50, %v331_v50  ;;  %v409_v53 = vld [vmem:[%s1807_s22 + $0x1a] sm:$0xff]  ;;  %v412_v56 = vld [vmem:[%s1807_s22 + $0x32] sm:$0xff]  ;;  %v1553_v1 = vpack.c.bf16 %v571_v63, %v571_v63  ;;  %v575_v3 = vld [vmem:[%s1807_s22 + $0x43] sm:$0xff] }
  0x1b   : > { %529 = vrot.lane.b32.xlu1 %v1818_v9, %s1750_s25  ;;  %v1533_v54 = vpack.c.bf16 %v409_v53, %v409_v53  ;;  %v413_v55 = vld [vmem:[%s1807_s22 + $0x3a] sm:$0xff]  ;;  %v1890_v58 = vpack.c.bf16 %v412_v56, %v412_v56  ;;  %v1557_v5 = vpack.c.bf16 %v575_v3, %v575_v3  ;;  %v652_v7 = vld [vmem:[%s1807_s22 + $0x24] sm:$0xff]  ;;  %v818_v22 = vld [vmem:[%s1807_s22 + $0x4d] sm:$0xff] }
  0x1c   : > { %527 = vrot.lane.b32.xlu0 %v1531_v6, %s1750_s25  ;;  %v1537_v57 = vpack.c.bf16 %v413_v55, %v413_v55  ;;  %v570_v0 = vld [vmem:[%s1807_s22 + $0x1b] sm:$0xff]  ;;  %v1563_v8 = vpack.c.bf16 %v652_v7, %v652_v7  ;;  %v813_v18 = vld [vmem:[%s1807_s22 + $0x25] sm:$0xff]  ;;  %v895_v28 = vld [vmem:[%s1807_s22 + $0x2e] sm:$0xff] }
  0x1d   : > { %v1552_v2 = vpack.c.bf16 %v570_v0, %v570_v0  ;;  %v574_v4 = vld [vmem:[%s1807_s22 + $0x3b] sm:$0xff]  ;;  %v1582_v21 = vpack.c.bf16 %v813_v18, %v813_v18  ;;  %v817_v23 = vld [vmem:[%s1807_s22 + $0x45] sm:$0xff]  ;;  %v899_v36 = vld [vmem:[%s1807_s22 + $0x4e] sm:$0xff] }
  0x1e   : > { %v1556_v6 = vpack.c.bf16 %v574_v4, %v574_v4  ;;  %v655_v10 = vld [vmem:[%s1807_s22 + $0x3c] sm:$0xff]  ;;  %v1586_v25 = vpack.c.bf16 %v817_v23, %v817_v23  ;;  %v269_v26 = vld [vmem:[%s1807_s22 + $0x28] sm:$0xff]  ;;  %v1597_v40 = vpack.c.bf16 %v899_v36, %v899_v36  ;;  %v573_v56 = vld [vmem:[%s1807_s22 + $0x33] sm:$0xff] }
  0x1f   : > { %610 = vrot.lane.b32.xlu1 %v1551_v12, %s1751_s26  ;;  %v1921_v12 = vpack.c.bf16 %v655_v10, %v655_v10  ;;  %v268_v27 = vld [vmem:[%s1807_s22 + $0x20] sm:$0xff]  ;;  %v1515_v30 = vpack.c.bf16 %v269_v26, %v269_v26  ;;  %v273_v34 = vld [vmem:[%s1807_s22 + $0x48] sm:$0xff]  ;;  %v1555_v61 = vpack.c.bf16 %v573_v56, %v573_v56  ;;  %v654_v4 = vld [vmem:[%s1807_s22 + $0x34] sm:$0xff] }
  0x20   : > { %608 = vrot.lane.b32.xlu0 %v1550_v13, %s1751_s26  ;;  %v733_v13 = vld [vmem:[%s1807_s22 + $0x2c] sm:$0xff]  ;;  %v1514_v31 = vpack.c.bf16 %v268_v27, %v268_v27  ;;  %v272_v35 = vld [vmem:[%s1807_s22 + $0x40] sm:$0xff]  ;;  %v1519_v38 = vpack.c.bf16 %v273_v34, %v273_v34  ;;  %v1565_v7 = vpack.c.bf16 %v654_v4, %v654_v4  ;;  %v819_v26 = vld [vmem:[%s1807_s22 + $0x55] sm:$0xff] }
  0x21   : > { %v1927_v14 = vpack.c.bf16 %v733_v13, %v733_v13  ;;  %v894_v29 = vld [vmem:[%s1807_s22 + $0x26] sm:$0xff]  ;;  %320 = vst.msk [vmem:[#allocation2 + $0x14] sm:$0xf] %vm314_vm0, %v1515_v30  ;;  %v1518_v39 = vpack.c.bf16 %v272_v35, %v272_v35  ;;  %v1588_v30 = vpack.c.bf16 %v819_v26, %v819_v26 }
  0x22   : > { %319 = vst.msk [vmem:[#allocation2 + $0x10] sm:$0xf] %vm314_vm0, %v1514_v31  ;;  %v898_v37 = vld [vmem:[%s1807_s22 + $0x46] sm:$0xff]  ;;  %324 = vst.msk [vmem:[#allocation2 + $0x24] sm:$0xf] %vm314_vm0, %v1519_v38  ;;  %v897_v31 = vld [vmem:[%s1807_s22 + $0x3e] sm:$0xff] }
  0x23   : > { %691 = vrot.lane.b32.xlu1 %v1561_v16, %s1753_s27  ;;  %323 = vst.msk [vmem:[#allocation2 + $0x20] sm:$0xf] %vm314_vm0, %v1518_v39  ;;  %v1596_v41 = vpack.c.bf16 %v898_v37, %v898_v37  ;;  %v334_v46 = vld [vmem:[%s1807_s22 + $0x49] sm:$0xff]  ;;  %v1595_v35 = vpack.c.bf16 %v897_v31, %v897_v31  ;;  %v901_v37 = vld [vmem:[%s1807_s22 + $0x5e] sm:$0xff]  ;;  %v900_v38 = vld [vmem:[%s1807_s22 + $0x56] sm:$0xff] }
  0x24   : > { %689 = vrot.lane.b32.xlu0 %v1560_v17, %s1753_s27  ;;  %v814_v17 = vld [vmem:[%s1807_s22 + $0x2d] sm:$0xff] }
  0x25   : > { %v1583_v19 = vpack.c.bf16 %v814_v17, %v814_v17  ;;  %v411_v50 = vld [vmem:[%s1807_s22 + $0x2a] sm:$0xff]  ;;  %v739_v17 = vld [vmem:[%s1807_s22 + $0x5c] sm:$0xff] }
  0x26   : > { %v576_v63 = vld [vmem:[%s1807_s22 + $0x4b] sm:$0xff] }
  0x27   : > { %772 = vrot.lane.b32.xlu1 %v1836_v24, %s1754_s30  ;;  %v1558_v3 = vpack.c.bf16 %v576_v63, %v576_v63 }
  0x28   : > { %770 = vrot.lane.b32.xlu0 %v1561_v16, %s1754_s30  ;;  %v1933_v16 = vpack.c.bf16 %v737_v15, %v737_v15 }
  0x2b   : > { %853 = vrot.lane.b32.xlu1 %v1581_v32, %s1756_s7  ;;  %v1593_v32 = vpack.c.bf16 %v895_v28, %v895_v28 }
  0x2c   : > { %851 = vrot.lane.b32.xlu0 %v1580_v33, %s1756_s7  ;;  %v1592_v33 = vpack.c.bf16 %v894_v29, %v894_v29 }
  0x2f   : > { %934 = vrot.lane.b32.xlu1 %v1591_v42, %s1757_s10  ;;  %v330_v42 = vld [vmem:[%s1807_s22 + $0x29] sm:$0xff] }
  0x30   : > { %932 = vrot.lane.b32.xlu0 %v1590_v43, %s1757_s10  ;;  %v329_v43 = vld [vmem:[%s1807_s22 + $0x21] sm:$0xff]  ;;  %v1525_v44 = vpack.c.bf16 %v330_v42, %v330_v42  ;;  %v1599_v42 = vpack.c.bf16 %v901_v37, %v901_v37 }
  0x31   : > { %v1524_v45 = vpack.c.bf16 %v329_v43, %v329_v43  ;;  %v1598_v43 = vpack.c.bf16 %v900_v38, %v900_v38 }
  0x33   : > { %371 = vrot.lane.b32.xlu1 %v1523_v47, %s1749_s24  ;;  %v333_v47 = vld [vmem:[%s1807_s22 + $0x41] sm:$0xff] }
  0x34   : > { %369 = vrot.lane.b32.xlu0 %v1522_v48, %s1749_s24  ;;  %v1529_v48 = vpack.c.bf16 %v334_v46, %v334_v46  ;;  %v1528_v49 = vpack.c.bf16 %v333_v47, %v333_v47 }
  0x37   : > { %379 = vrot.lane.b32.xlu1 %v1527_v51, %s1749_s24  ;;  %v1535_v51 = vpack.c.bf16 %v411_v50, %v411_v50 }
  0x38   : > { %377 = vrot.lane.b32.xlu0 %v1526_v52, %s1749_s24  ;;  %v415_v52 = vld [vmem:[%s1807_s22 + $0x4a] sm:$0xff] }
  0x39   : > { %v1539_v53 = vpack.c.bf16 %v415_v52, %v415_v52 }
  0x3b   : > { %452 = vrot.lane.b32.xlu1 %v1533_v54, %s1748_s23 }
  0x3c   : > { %450 = vrot.lane.b32.xlu0 %v1818_v9, %s1748_s23  ;;  %v656_v9 = vld [vmem:[%s1807_s22 + $0x44] sm:$0xff] }
  0x3d   : > { %v1567_v11 = vpack.c.bf16 %v656_v9, %v656_v9 }
  0x3f   : > { %460 = vrot.lane.b32.xlu1 %v1537_v57, %s1748_s23 }
  0x40   : > { %458 = vrot.lane.b32.xlu0 %v1890_v58, %s1748_s23 }
  0x43   : > { %533 = vrot.lane.b32.xlu1 %v1896_v60, %s1750_s25 }
  0x44   : > { %531 = vrot.lane.b32.xlu0 %v1533_v54, %s1750_s25  ;;  %v496_v54 = vld [vmem:[%s1807_s22 + $0x52] sm:$0xff] }
  0x45   : > { %v1549_v55 = vpack.c.bf16 %v496_v54, %v496_v54 }
  0x47   : > { %541 = vrot.lane.b32.xlu1 %v1902_v62, %s1750_s25 }
  0x48   : > { %539 = vrot.lane.b32.xlu0 %v1537_v57, %s1750_s25  ;;  %v572_v57 = vld [vmem:[%s1807_s22 + $0x2b] sm:$0xff] }
  0x4b   : > { %614 = vrot.lane.b32.xlu1 %v1553_v1, %s1751_s26 }
  0x4c   : > { %612 = vrot.lane.b32.xlu0 %v1552_v2, %s1751_s26 }
  0x4f   : > { %622 = vrot.lane.b32.xlu1 %v1557_v5, %s1751_s26 }
  0x50   : > { %620 = vrot.lane.b32.xlu0 %v1556_v6, %s1751_s26 }
  0x53   : > { %695 = vrot.lane.b32.xlu1 %v1563_v8, %s1753_s27 }
  0x54   : > { %693 = vrot.lane.b32.xlu0 %v1836_v24, %s1753_s27  ;;  %v1587_v24 = vpack.c.bf16 %v818_v22, %v818_v22  ;;  %v815_v22 = vld [vmem:[%s1807_s22 + $0x35] sm:$0xff] }
  0x57   : > { %703 = vrot.lane.b32.xlu1 %v1567_v11, %s1753_s27 }
  0x58   : > { %701 = vrot.lane.b32.xlu0 %v1921_v12, %s1753_s27 }
  0x5b   : > { %776 = vrot.lane.b32.xlu1 %v1927_v14, %s1754_s30 }
  0x5c   : > { %774 = vrot.lane.b32.xlu0 %v1563_v8, %s1754_s30  ;;  %v658_v8 = vld [vmem:[%s1807_s22 + $0x54] sm:$0xff] }
  0x5f   : > { %784 = vrot.lane.b32.xlu1 %v1933_v16, %s1754_s30 }
  0x60   : > { %782 = vrot.lane.b32.xlu0 %v1567_v11, %s1754_s30  ;;  %v1569_v11 = vpack.c.bf16 %v658_v8, %v658_v8 }
  0x63   : > { %857 = vrot.lane.b32.xlu1 %v1583_v19, %s1756_s7 }
  0x64   : > { %855 = vrot.lane.b32.xlu0 %v1582_v21, %s1756_s7  ;;  %v816_v21 = vld [vmem:[%s1807_s22 + $0x3d] sm:$0xff] }
  0x67   : > { %865 = vrot.lane.b32.xlu1 %v1587_v24, %s1756_s7  ;;  %v1584_v24 = vpack.c.bf16 %v815_v22, %v815_v22 }
  0x68   : > { %863 = vrot.lane.b32.xlu0 %v1586_v25, %s1756_s7  ;;  %v820_v25 = vld [vmem:[%s1807_s22 + $0x5d] sm:$0xff] }
  0x69   : > { %v1589_v29 = vpack.c.bf16 %v820_v25, %v820_v25 }
  0x6b   : > { %938 = vrot.lane.b32.xlu1 %v1593_v32, %s1757_s10  ;;  %v896_v32 = vld [vmem:[%s1807_s22 + $0x36] sm:$0xff] }
  0x6c   : > { %936 = vrot.lane.b32.xlu0 %v1592_v33, %s1757_s10  ;;  %v1594_v36 = vpack.c.bf16 %v896_v32, %v896_v32 }
  0x6f   : > { %946 = vrot.lane.b32.xlu1 %v1597_v40, %s1757_s10 }
  0x70   : > { %944 = vrot.lane.b32.xlu0 %v1596_v41, %s1757_s10 }
  0x73   : > { %375 = vrot.lane.b32.xlu1 %v1525_v44, %s1749_s24 }
  0x74   : > { %373 = vrot.lane.b32.xlu0 %v1524_v45, %s1749_s24 }
  0x77   : > { %383 = vrot.lane.b32.xlu1 %v1529_v48, %s1749_s24 }
  0x78   : > { %381 = vrot.lane.b32.xlu0 %v1528_v49, %s1749_s24 }
  0x7b   : > { %456 = vrot.lane.b32.xlu1 %v1535_v51, %s1748_s23 }
  0x7c   : > { %454 = vrot.lane.b32.xlu0 %v1896_v60, %s1748_s23 }
  0x7f   : > { %464 = vrot.lane.b32.xlu1 %v1539_v53, %s1748_s23 }
  0x80   : > { %462 = vrot.lane.b32.xlu0 %v1902_v62, %s1748_s23  ;;  %v1554_v62 = vpack.c.bf16 %v572_v57, %v572_v57 }
  0x83   : > { %537 = vrot.lane.b32.xlu1 %v1890_v58, %s1750_s25  ;;  %v577_v58 = vld [vmem:[%s1807_s22 + $0x53] sm:$0xff]  ;;  %s2131_s22 = scalar_lea.vmem %s2182_s4, %s1641_s19 }
  0x84   : > { %535 = vrot.lane.b32.xlu0 %v1535_v51, %s1750_s25  ;;  %v1559_v2 = vpack.c.bf16 %v577_v58, %v577_v58 }
  0x85   : > { %v447_v59 = vpop.permute.xlu1 %446 }
  0x86   : > { %v366_v60 = vpop.permute.xlu0 %365 }
  0x87   : > { %396 = vst.msk [vmem:[#allocation2] sm:$0xf] %vm395_vm3, %v366_v60  ;;  %545 = vrot.lane.b32.xlu1 %v1549_v55, %s1750_s25 }
  0x88   : > { %543 = vrot.lane.b32.xlu0 %v1539_v53, %s1750_s25  ;;  %477 = vst.msk [vmem:[#allocation2] sm:$0xf] %vm476_vm4, %v447_v59 }
  0x89   : > { %v449_v0 = vpop.permute.xlu1 %448 }
  0x8a   : > { %v368_v1 = vpop.permute.xlu0 %367 }
  0x8b   : > { %397 = vst.msk [vmem:[#allocation2 + $0x4] sm:$0xf] %vm395_vm3, %v368_v1  ;;  %618 = vrot.lane.b32.xlu1 %v1555_v61, %s1751_s26 }
  0x8c   : > { %616 = vrot.lane.b32.xlu0 %v1554_v62, %s1751_s26  ;;  %478 = vst.msk [vmem:[#allocation2 + $0x4] sm:$0xf] %vm476_vm4, %v449_v0 }
  0x8d   : > { %v530_v5 = vpop.permute.xlu1 %529 }
  0x8e   : > { %v528_v6 = vpop.permute.xlu0 %527  ;;  %559 = vst.msk [vmem:[#allocation2 + $0x4] sm:$0xf] %vm557_vm5, %v530_v5 }
  0x8f   : > { %558 = vst.msk [vmem:[#allocation2] sm:$0xf] %vm557_vm5, %v528_v6  ;;  %626 = vrot.lane.b32.xlu1 %v1559_v2, %s1751_s26 }
  0x90   : > { %624 = vrot.lane.b32.xlu0 %v1558_v3, %s1751_s26 }
  0x91   : > { %v611_v9 = vpop.permute.xlu1 %610 }
  0x92   : > { %v609_v10 = vpop.permute.xlu0 %608  ;;  %640 = vst.msk [vmem:[#allocation2 + $0x4] sm:$0xf] %vm638_vm6, %v611_v9 }
  0x93   : > { %639 = vst.msk [vmem:[#allocation2] sm:$0xf] %vm638_vm6, %v609_v10  ;;  %699 = vrot.lane.b32.xlu1 %v1565_v7, %s1753_s27 }
  0x94   : > { %697 = vrot.lane.b32.xlu0 %v1927_v14, %s1753_s27  ;;  %v1579_v14 = vpack.c.bf16 %v739_v17, %v739_v17 }
  0x95   : > { %v692_v13 = vpop.permute.xlu1 %691 }
  0x96   : > { %v690_v15 = vpop.permute.xlu0 %689  ;;  %721 = vst.msk [vmem:[#allocation2 + $0x4] sm:$0xf] %vm719_vm7, %v692_v13 }
  0x97   : > { %720 = vst.msk [vmem:[#allocation2] sm:$0xf] %vm719_vm7, %v690_v15  ;;  %707 = vrot.lane.b32.xlu1 %v1569_v11, %s1753_s27 }
  0x98   : > { %705 = vrot.lane.b32.xlu0 %v1933_v16, %s1753_s27 }
  0x99   : > { %v773_v18 = vpop.permute.xlu1 %772 }
  0x9a   : > { %v771_v19 = vpop.permute.xlu0 %770  ;;  %802 = vst.msk [vmem:[#allocation2 + $0x4] sm:$0xf] %vm800_vm8, %v773_v18 }
  0x9b   : > { %801 = vst.msk [vmem:[#allocation2] sm:$0xf] %vm800_vm8, %v771_v19  ;;  %780 = vrot.lane.b32.xlu1 %v1921_v12, %s1754_s30  ;;  %v1585_v12 = vpack.c.bf16 %v816_v21, %v816_v21 }
  0x9c   : > { %778 = vrot.lane.b32.xlu0 %v1565_v7, %s1754_s30 }
  0x9d   : > { %v854_v16 = vpop.permute.xlu1 %853 }
  0x9e   : > { %v852_v23 = vpop.permute.xlu0 %851  ;;  %883 = vst.msk [vmem:[#allocation2 + $0x4] sm:$0xf] %vm881_vm9, %v854_v16 }
  0x9f   : > { %882 = vst.msk [vmem:[#allocation2] sm:$0xf] %vm881_vm9, %v852_v23  ;;  %788 = vrot.lane.b32.xlu1 %v1579_v14, %s1754_s30 }
  0xa0   : > { %786 = vrot.lane.b32.xlu0 %v1569_v11, %s1754_s30 }
  0xa1   : > { %v935_v27 = vpop.permute.xlu1 %934 }
  0xa2   : > { %v933_v28 = vpop.permute.xlu0 %932  ;;  %964 = vst.msk [vmem:[#allocation2 + $0x4] sm:$0xf] %vm962_vm10, %v935_v27 }
  0xa3   : > { %963 = vst.msk [vmem:[#allocation2] sm:$0xf] %vm962_vm10, %v933_v28  ;;  %861 = vrot.lane.b32.xlu1 %v1585_v12, %s1756_s7 }
  0xa4   : > { %859 = vrot.lane.b32.xlu0 %v1584_v24, %s1756_s7 }
  0xa5   : > { %v372_v33 = vpop.permute.xlu1 %371 }
  0xa6   : > { %v370_v34 = vpop.permute.xlu0 %369  ;;  %399 = vst.msk [vmem:[#allocation2 + $0xc] sm:$0xf] %vm395_vm3, %v372_v33 }
  0xa7   : > { %398 = vst.msk [vmem:[#allocation2 + $0x8] sm:$0xf] %vm395_vm3, %v370_v34  ;;  %869 = vrot.lane.b32.xlu1 %v1589_v29, %s1756_s7 }
  0xa8   : > { %867 = vrot.lane.b32.xlu0 %v1588_v30, %s1756_s7 }
  0xa9   : > { %v380_v39 = vpop.permute.xlu1 %379 }
  0xaa   : > { %v378_v40 = vpop.permute.xlu0 %377  ;;  %v1679_v41 = vld [vmem:[#allocation2] sm:$0xff]   ;;  %403 = vst.msk [vmem:[#allocation2 + $0x1c] sm:$0xf] %vm395_vm3, %v380_v39 }
  0xab   : > { %402 = vst.msk [vmem:[#allocation2 + $0x18] sm:$0xf] %vm395_vm3, %v378_v40  ;;  %942 = vrot.lane.b32.xlu1 %v1595_v35, %s1757_s10  ;;  %1615 = vmatmul.mubr.msk.bf16.vlgmr.msra.gmra.mxu0 %vm1028_vm11, %v1679_v41 }
  0xac   : > { %940 = vrot.lane.b32.xlu0 %v1594_v36, %s1757_s10  ;;  %1618 = vmatprep.mubr.msk.bf16.mxu0 %vm1755_vm2, %v1752_v20 }
  0xad   : > { %v453_v44 = vpop.permute.xlu1 %452 }
  0xae   : > { %v451_v45 = vpop.permute.xlu0 %450  ;;  %480 = vst.msk [vmem:[#allocation2 + $0xc] sm:$0xf] %vm476_vm4, %v453_v44  ;;  %v2116_v44 = vld [vmem:[%s2180_s2] ss:$0 sm:$0xff] }
  0xaf   : > { %479 = vst.msk [vmem:[#allocation2 + $0x8] sm:$0xf] %vm476_vm4, %v451_v45  ;;  %950 = vrot.lane.b32.xlu1 %v1599_v42, %s1757_s10 }
  0xb0   : > { %948 = vrot.lane.b32.xlu0 %v1598_v43, %s1757_s10 }
  0xb1   : > { %v461_v46 = vpop.permute.xlu1 %460 }
  0xb2   : > { %v459_v47 = vpop.permute.xlu0 %458  ;;  %484 = vst.msk [vmem:[#allocation2 + $0x1c] sm:$0xf] %vm476_vm4, %v461_v46  ;;  %v2121_v46 = vld [vmem:[%s2181_s3] ss:$0 sm:$0xff] }
  0xb3   : > { %483 = vst.msk [vmem:[#allocation2 + $0x18] sm:$0xf] %vm476_vm4, %v459_v47 }
  0xb5   : > { %v534_v48 = vpop.permute.xlu1 %533 }
  0xb6   : > { %v532_v49 = vpop.permute.xlu0 %531  ;;  %561 = vst.msk [vmem:[#allocation2 + $0xc] sm:$0xf] %vm557_vm5, %v534_v48 }
  0xb7   : > { %560 = vst.msk [vmem:[#allocation2 + $0x8] sm:$0xf] %vm557_vm5, %v532_v49 }
  0xb9   : > { %v542_v50 = vpop.permute.xlu1 %541 }
  0xba   : > { %v540_v51 = vpop.permute.xlu0 %539  ;;  %565 = vst.msk [vmem:[#allocation2 + $0x1c] sm:$0xf] %vm557_vm5, %v542_v50 }
  0xbb   : > { %564 = vst.msk [vmem:[#allocation2 + $0x18] sm:$0xf] %vm557_vm5, %v540_v51 }
  0xbd   : > { %v615_v52 = vpop.permute.xlu1 %614 }
  0xbe   : > { %v613_v53 = vpop.permute.xlu0 %612  ;;  %642 = vst.msk [vmem:[#allocation2 + $0xc] sm:$0xf] %vm638_vm6, %v615_v52 }
  0xbf   : > { %641 = vst.msk [vmem:[#allocation2 + $0x8] sm:$0xf] %vm638_vm6, %v613_v53 }
  0xc1   : > { %v623_v54 = vpop.permute.xlu1 %622 }
  0xc2   : > { %v621_v55 = vpop.permute.xlu0 %620  ;;  %646 = vst.msk [vmem:[#allocation2 + $0x1c] sm:$0xf] %vm638_vm6, %v623_v54 }
  0xc3   : > { %645 = vst.msk [vmem:[#allocation2 + $0x18] sm:$0xf] %vm638_vm6, %v621_v55 }
  0xc5   : > { %v696_v56 = vpop.permute.xlu1 %695 }
  0xc6   : > { %v694_v57 = vpop.permute.xlu0 %693  ;;  %723 = vst.msk [vmem:[#allocation2 + $0xc] sm:$0xf] %vm719_vm7, %v696_v56 }
  0xc7   : > { %722 = vst.msk [vmem:[#allocation2 + $0x8] sm:$0xf] %vm719_vm7, %v694_v57 }
  0xc9   : > { %v704_v59 = vpop.permute.xlu1 %703 }
  0xca   : > { %v702_v60 = vpop.permute.xlu0 %701  ;;  %727 = vst.msk [vmem:[#allocation2 + $0x1c] sm:$0xf] %vm719_vm7, %v704_v59 }
  0xcb   : > { %726 = vst.msk [vmem:[#allocation2 + $0x18] sm:$0xf] %vm719_vm7, %v702_v60 }
  0xcd   : > { %v777_v61 = vpop.permute.xlu1 %776 }
  0xce   : > { %v775_v62 = vpop.permute.xlu0 %774  ;;  %804 = vst.msk [vmem:[#allocation2 + $0xc] sm:$0xf] %vm800_vm8, %v777_v61 }
  0xcf   : > { %803 = vst.msk [vmem:[#allocation2 + $0x8] sm:$0xf] %vm800_vm8, %v775_v62 }
  0xd1   : > { %v785_v58 = vpop.permute.xlu1 %784 }
  0xd2   : > { %v783_v63 = vpop.permute.xlu0 %782  ;;  %808 = vst.msk [vmem:[#allocation2 + $0x1c] sm:$0xf] %vm800_vm8, %v785_v58 }
  0xd3   : > { %807 = vst.msk [vmem:[#allocation2 + $0x18] sm:$0xf] %vm800_vm8, %v783_v63 }
  0xd5   : > { %v858_v0 = vpop.permute.xlu1 %857 }
  0xd6   : > { %v856_v1 = vpop.permute.xlu0 %855  ;;  %885 = vst.msk [vmem:[#allocation2 + $0xc] sm:$0xf] %vm881_vm9, %v858_v0 }
  0xd7   : > { %884 = vst.msk [vmem:[#allocation2 + $0x8] sm:$0xf] %vm881_vm9, %v856_v1 }
  0xd9   : > { %v866_v2 = vpop.permute.xlu1 %865 }
  0xda   : > { %v864_v3 = vpop.permute.xlu0 %863  ;;  %889 = vst.msk [vmem:[#allocation2 + $0x1c] sm:$0xf] %vm881_vm9, %v866_v2 }
  0xdb   : > { %888 = vst.msk [vmem:[#allocation2 + $0x18] sm:$0xf] %vm881_vm9, %v864_v3 }
  0xdd   : > { %v939_v4 = vpop.permute.xlu1 %938 }
  0xde   : > { %v937_v5 = vpop.permute.xlu0 %936  ;;  %966 = vst.msk [vmem:[#allocation2 + $0xc] sm:$0xf] %vm962_vm10, %v939_v4 }
  0xdf   : > { %965 = vst.msk [vmem:[#allocation2 + $0x8] sm:$0xf] %vm962_vm10, %v937_v5 }
  0xe1   : > { %v947_v6 = vpop.permute.xlu1 %946 }
  0xe2   : > { %v945_v7 = vpop.permute.xlu0 %944  ;;  %970 = vst.msk [vmem:[#allocation2 + $0x1c] sm:$0xf] %vm962_vm10, %v947_v6 }
  0xe3   : > { %969 = vst.msk [vmem:[#allocation2 + $0x18] sm:$0xf] %vm962_vm10, %v945_v7 }
  0xe5   : > { %v376_v8 = vpop.permute.xlu1 %375 }
  0xe6   : > { %v374_v9 = vpop.permute.xlu0 %373  ;;  %v1680_v10 = vld [vmem:[#allocation2 + $0x8] sm:$0xff]   ;;  %401 = vst.msk [vmem:[#allocation2 + $0x14] sm:$0xf] %vm395_vm3, %v376_v8 }
  0xe7   : > { %400 = vst.msk [vmem:[#allocation2 + $0x10] sm:$0xf] %vm395_vm3, %v374_v9  ;;  %1619 = vmatmul.mubr.msk.bf16.gmra.mxu0 %vm1028_vm11, %v1680_v10 }
  0xe8   : > { %1622 = vmatprep.mubr.msk.bf16.mxu0 %vm1755_vm2, %v1752_v20 }
  0xe9   : > { %v384_v11 = vpop.permute.xlu1 %383 }
  0xea   : > { %v382_v13 = vpop.permute.xlu0 %381  ;;  %v1681_v15 = vld [vmem:[#allocation2 + $0x18] sm:$0xff]   ;;  %405 = vst.msk [vmem:[#allocation2 + $0x24] sm:$0xf] %vm395_vm3, %v384_v11 }
  0xeb   : > { %404 = vst.msk [vmem:[#allocation2 + $0x20] sm:$0xf] %vm395_vm3, %v382_v13  ;;  %1627 = vmatmul.mubr.msk.bf16.vlgmr.msra.gmra.mxu1 %vm1028_vm11, %v1681_v15 }
  0xec   : > { %1630 = vmatprep.mubr.msk.bf16.mxu1 %vm1755_vm2, %v1752_v20 }
  0xed   : > { %v457_v17 = vpop.permute.xlu1 %456 }
  0xee   : > { %v455_v18 = vpop.permute.xlu0 %454  ;;  %482 = vst.msk [vmem:[#allocation2 + $0x14] sm:$0xf] %vm476_vm4, %v457_v17 }
  0xef   : > { %481 = vst.msk [vmem:[#allocation2 + $0x10] sm:$0xf] %vm476_vm4, %v455_v18 }
  0xf1   : > { %v465_v19 = vpop.permute.xlu1 %464 }
  0xf2   : > { %v463_v14 = vpop.permute.xlu0 %462  ;;  %486 = vst.msk [vmem:[#allocation2 + $0x24] sm:$0xf] %vm476_vm4, %v465_v19 }
  0xf3   : > { %485 = vst.msk [vmem:[#allocation2 + $0x20] sm:$0xf] %vm476_vm4, %v463_v14 }
  0xf5   : > { %v538_v21 = vpop.permute.xlu1 %537 }
  0xf6   : > { %v536_v22 = vpop.permute.xlu0 %535  ;;  %563 = vst.msk [vmem:[#allocation2 + $0x14] sm:$0xf] %vm557_vm5, %v538_v21 }
  0xf7   : > { %562 = vst.msk [vmem:[#allocation2 + $0x10] sm:$0xf] %vm557_vm5, %v536_v22 }
  0xf9   : > { %v546_v16 = vpop.permute.xlu1 %545 }
  0xfa   : > { %v544_v20 = vpop.permute.xlu0 %543  ;;  %567 = vst.msk [vmem:[#allocation2 + $0x24] sm:$0xf] %vm557_vm5, %v546_v16 }
  0xfb   : > { %566 = vst.msk [vmem:[#allocation2 + $0x20] sm:$0xf] %vm557_vm5, %v544_v20 }
  0xfd   : > { %v619_v23 = vpop.permute.xlu1 %618 }
  0xfe   : > { %v617_v12 = vpop.permute.xlu0 %616  ;;  %644 = vst.msk [vmem:[#allocation2 + $0x14] sm:$0xf] %vm638_vm6, %v619_v23 }
  0xff   : > { %643 = vst.msk [vmem:[#allocation2 + $0x10] sm:$0xf] %vm638_vm6, %v617_v12 }
 0x101   : > { %v627_v24 = vpop.permute.xlu1 %626 }
 0x102   : > { %v625_v25 = vpop.permute.xlu0 %624  ;;  %648 = vst.msk [vmem:[#allocation2 + $0x24] sm:$0xf] %vm638_vm6, %v627_v24 }
 0x103   : > { %647 = vst.msk [vmem:[#allocation2 + $0x20] sm:$0xf] %vm638_vm6, %v625_v25 }
 0x105   : > { %v700_v26 = vpop.permute.xlu1 %699 }
 0x106   : > { %v698_v27 = vpop.permute.xlu0 %697  ;;  %725 = vst.msk [vmem:[#allocation2 + $0x14] sm:$0xf] %vm719_vm7, %v700_v26 }
 0x107   : > { %724 = vst.msk [vmem:[#allocation2 + $0x10] sm:$0xf] %vm719_vm7, %v698_v27 }
 0x109   : > { %v708_v28 = vpop.permute.xlu1 %707 }
 0x10a   : > { %v706_v29 = vpop.permute.xlu0 %705  ;;  %729 = vst.msk [vmem:[#allocation2 + $0x24] sm:$0xf] %vm719_vm7, %v708_v28 }
 0x10b   : > { %728 = vst.msk [vmem:[#allocation2 + $0x20] sm:$0xf] %vm719_vm7, %v706_v29 }
 0x10d   : > { %v781_v30 = vpop.permute.xlu1 %780 }
 0x10e   : > { %v779_v31 = vpop.permute.xlu0 %778  ;;  %806 = vst.msk [vmem:[#allocation2 + $0x14] sm:$0xf] %vm800_vm8, %v781_v30 }
 0x10f   : > { %805 = vst.msk [vmem:[#allocation2 + $0x10] sm:$0xf] %vm800_vm8, %v779_v31 }
 0x111   : > { %v789_v32 = vpop.permute.xlu1 %788 }
 0x112   : > { %v787_v33 = vpop.permute.xlu0 %786  ;;  %810 = vst.msk [vmem:[#allocation2 + $0x24] sm:$0xf] %vm800_vm8, %v789_v32 }
 0x113   : > { %809 = vst.msk [vmem:[#allocation2 + $0x20] sm:$0xf] %vm800_vm8, %v787_v33 }
 0x115   : > { %v862_v34 = vpop.permute.xlu1 %861 }
 0x116   : > { %v860_v35 = vpop.permute.xlu0 %859  ;;  %887 = vst.msk [vmem:[#allocation2 + $0x14] sm:$0xf] %vm881_vm9, %v862_v34 }
 0x117   : > { %886 = vst.msk [vmem:[#allocation2 + $0x10] sm:$0xf] %vm881_vm9, %v860_v35 }
 0x119   : > { %v870_v36 = vpop.permute.xlu1 %869 }
 0x11a   : > { %v868_v37 = vpop.permute.xlu0 %867  ;;  %891 = vst.msk [vmem:[#allocation2 + $0x24] sm:$0xf] %vm881_vm9, %v870_v36 }
 0x11b   : > { %890 = vst.msk [vmem:[#allocation2 + $0x20] sm:$0xf] %vm881_vm9, %v868_v37 }
 0x11d   : > { %v943_v38 = vpop.permute.xlu1 %942 }
 0x11e   : > { %v941_v39 = vpop.permute.xlu0 %940  ;;  %968 = vst.msk [vmem:[#allocation2 + $0x14] sm:$0xf] %vm962_vm10, %v943_v38 }
 0x11f   : > { %967 = vst.msk [vmem:[#allocation2 + $0x10] sm:$0xf] %vm962_vm10, %v941_v39 }
 0x121   : > { %v951_v40 = vpop.permute.xlu1 %950 }
 0x122   : > { %v949_v41 = vpop.permute.xlu0 %948  ;;  %972 = vst.msk [vmem:[#allocation2 + $0x24] sm:$0xf] %vm962_vm10, %v951_v40 }
 0x123   : > { %971 = vst.msk [vmem:[#allocation2 + $0x20] sm:$0xf] %vm962_vm10, %v949_v41 }
 0x126   : > { %v1682_v42 = vld [vmem:[#allocation2 + $0x10] sm:$0xff]  }
 0x127   : > { %1623 = vmatmul.mubr.msk.bf16.gmra.mxu0 %vm1028_vm11, %v1682_v42 }
 0x12a   : > { %v1683_v43 = vld [vmem:[#allocation2 + $0x20] sm:$0xff]  }
 0x12b   : > { %1631 = vmatmul.mubr.msk.bf16.gmra.mxu1 %vm1028_vm11, %v1683_v43 }
 0x16b   : > { %v1082_v45 = vpop.f32.mrf.mxu0 }
 0x16c   : > { %v1128_v47 = vmul.f32 %v2116_v44, %v1082_v45 }
 0x16d   : > { %v1616_v48 = vpop.f32.mrf.mxu0 }
 0x16e   : > { %v1145_v49 = vadd.f32 %v2121_v46, %v1128_v47 }
 0x16f   : > { %v1085_v50 = vpop.f32.mrf.mxu0 }
 0x170   : > { %v1155_v51 = vand.u32 2147483647, %v1145_v49  ;;  %v1129_v52 = vmul.f32 %v2116_v44, %v1085_v50  ;;  %vm1195_vm12 = vcmp.ge.f32.partialorder %v1145_v49, 0.0 }
 0x171   : > { %v1617_v53 = vpop.f32.mrf.mxu0 }
 0x172   : > { %v1165_v54 = vsub.f32 0.0, %v1155_v51  ;;  %v1146_v55 = vadd.f32 %v2121_v46, %v1129_v52 }
 0x174   : > { %v1175_v56 = vmul.f32 1.442695, %v1165_v54  ;;  %v1156_v57 = vand.u32 2147483647, %v1146_v55  ;;  %vm1196_vm14 = vcmp.ge.f32.partialorder %v1146_v55, 0.0 }
 0x176   : > { %1684 = vpow2.f32 %v1175_v56  ;;  %v1166_v59 = vsub.f32 0.0, %v1156_v57 }
 0x178   : > { %v1177_v60 = vmul.f32 1.442695, %v1166_v59 }
 0x17a   : > { %1686 = vpow2.f32 %v1177_v60 }
 0x183   : > { %v1685_v61 = vpop.eup %1684 }
 0x184   : > { %v1205_v62 = vadd.f32 1.0, %v1685_v61 }
 0x186   : > { %1688 = vrcp.f32 %v1205_v62 }
 0x187   : > { %v1687_v58 = vpop.eup %1686 }
 0x188   : > { %v1206_v63 = vadd.f32 1.0, %v1687_v58 }
 0x18a   : > { %1690 = vrcp.f32 %v1206_v63 }
 0x193   : > { %v1689_v0 = vpop.eup %1688 }
 0x194   : > { %v1235_v1 = vmul.f32 %v1689_v0, %v1685_v61 }
 0x196   : > { %v1245_v2 = vsel %vm1195_vm12, %v1689_v0, %v1235_v1 }
 0x197   : > { %v1691_v3 = vpop.eup %1690  ;;  %v1255_v4 = vmul.f32 %v1245_v2, %v1145_v49 }
 0x198   : > { %v1236_v5 = vmul.f32 %v1691_v3, %v1687_v58 }
 0x199   : > { %1266 = vst.msk [vmem:[%s2131_s22] sm:$0xff] %vm1265_vm13, %v1255_v4 }
 0x19a   : > { %v1246_v6 = vsel %vm1196_vm14, %v1691_v3, %v1236_v5 }
 0x19b   : > { %v1256_v7 = vmul.f32 %v1246_v6, %v1146_v55 }
 0x19d   : > { %1267 = vst.msk [vmem:[%s2131_s22 + $0x8] sm:$0xff] %vm1265_vm13, %v1256_v7 }
 0x1a7   : > { %v1090_v8 = vpop.f32.mrf.mxu0 }
 0x1a8   : > { %v1130_v9 = vmul.f32 %v2116_v44, %v1090_v8 }
 0x1a9   : > { %v1620_v10 = vpop.f32.mrf.mxu0 }
 0x1aa   : > { %v1147_v11 = vadd.f32 %v2121_v46, %v1130_v9 }
 0x1ab   : > { %v1093_v13 = vpop.f32.mrf.mxu0  ;;  %v1106_v15 = vpop.f32.mrf.mxu1 }
 0x1ac   : > { %v1157_v17 = vand.u32 2147483647, %v1147_v11  ;;  %v1131_v18 = vmul.f32 %v2116_v44, %v1093_v13  ;;  %v1134_v19 = vmul.f32 %v2116_v44, %v1106_v15  ;;  %vm1197_vm15 = vcmp.ge.f32.partialorder %v1147_v11, 0.0 }
 0x1ad   : > { %v1621_v14 = vpop.f32.mrf.mxu0  ;;  %v1628_v21 = vpop.f32.mrf.mxu1 }
 0x1ae   : > { %v1167_v22 = vsub.f32 0.0, %v1157_v17  ;;  %v1148_v16 = vadd.f32 %v2121_v46, %v1131_v18  ;;  %v1151_v20 = vadd.f32 %v2121_v46, %v1134_v19 }
 0x1af   : > { %v1109_v23 = vpop.f32.mrf.mxu1 }
 0x1b0   : > { %v1179_v12 = vmul.f32 1.442695, %v1167_v22  ;;  %v1158_v24 = vand.u32 2147483647, %v1148_v16  ;;  %v1161_v25 = vand.u32 2147483647, %v1151_v20  ;;  %v1135_v26 = vmul.f32 %v2116_v44, %v1109_v23 }
 0x1b1   : > { %v1629_v27 = vpop.f32.mrf.mxu1  ;;  %vm1198_vm0 = vcmp.ge.f32.partialorder %v1148_v16, 0.0  ;;  %vm1201_vm1 = vcmp.ge.f32.partialorder %v1151_v20, 0.0 }
 0x1b2   : > { %1692 = vpow2.f32 %v1179_v12  ;;  %v1168_v28 = vsub.f32 0.0, %v1158_v24  ;;  %v1171_v29 = vsub.f32 0.0, %v1161_v25  ;;  %v1152_v30 = vadd.f32 %v2121_v46, %v1135_v26 }
 0x1b4   : > { %v1181_v31 = vmul.f32 1.442695, %v1168_v28  ;;  %v1187_v32 = vmul.f32 1.442695, %v1171_v29  ;;  %v1162_v33 = vand.u32 2147483647, %v1152_v30 }
 0x1b5   : > { %vm1202_vm2 = vcmp.ge.f32.partialorder %v1152_v30, 0.0 }
 0x1b6   : > { %1694 = vpow2.f32 %v1181_v31  ;;  %v1172_v34 = vsub.f32 0.0, %v1162_v33 }
 0x1b7   : > { %1696 = vpow2.f32 %v1187_v32 }
 0x1b8   : > { %v1189_v35 = vmul.f32 1.442695, %v1172_v34 }
 0x1ba   : > { %1698 = vpow2.f32 %v1189_v35 }
 0x1bf   : > { %v1693_v36 = vpop.eup %1692 }
 0x1c0   : > { %v1207_v37 = vadd.f32 1.0, %v1693_v36 }
 0x1c2   : > { %1700 = vrcp.f32 %v1207_v37 }
 0x1c3   : > { %v1695_v38 = vpop.eup %1694 }
 0x1c4   : > { %v1697_v39 = vpop.eup %1696  ;;  %v1208_v40 = vadd.f32 1.0, %v1695_v38 }
 0x1c5   : > { %v1211_v41 = vadd.f32 1.0, %v1697_v39 }
 0x1c6   : > { %1702 = vrcp.f32 %v1208_v40 }
 0x1c7   : > { %1704 = vrcp.f32 %v1211_v41  ;;  %v1699_v42 = vpop.eup %1698 }
 0x1c8   : > { %v1212_v43 = vadd.f32 1.0, %v1699_v42 }
 0x1ca   : > { %1706 = vrcp.f32 %v1212_v43 }
 0x1cf   : > { %v1701_v45 = vpop.eup %1700 }
 0x1d0   : > { %v1237_v47 = vmul.f32 %v1701_v45, %v1693_v36 }
 0x1d2   : > { %v1247_v48 = vsel %vm1197_vm15, %v1701_v45, %v1237_v47 }
 0x1d3   : > { %v1703_v49 = vpop.eup %1702  ;;  %v1257_v50 = vmul.f32 %v1247_v48, %v1147_v11 }
 0x1d4   : > { %v1705_v51 = vpop.eup %1704  ;;  %v1238_v52 = vmul.f32 %v1703_v49, %v1695_v38 }
 0x1d5   : > { %1268 = vst.msk [vmem:[%s2131_s22 + $0x10] sm:$0xff] %vm1265_vm13, %v1257_v50  ;;  %v1241_v53 = vmul.f32 %v1705_v51, %v1697_v39 }
 0x1d6   : > { %v1248_v54 = vsel %vm1198_vm0, %v1703_v49, %v1238_v52 }
 0x1d7   : > { %v1258_v55 = vmul.f32 %v1248_v54, %v1148_v16  ;;  %v1251_v56 = vsel %vm1201_vm1, %v1705_v51, %v1241_v53  ;;  %v1707_v57 = vpop.eup %1706 }
 0x1d8   : > { %v1261_v59 = vmul.f32 %v1251_v56, %v1151_v20  ;;  %v1242_v60 = vmul.f32 %v1707_v57, %v1699_v42 }
 0x1d9   : > { %1269 = vst.msk [vmem:[%s2131_s22 + $0x18] sm:$0xff] %vm1265_vm13, %v1258_v55 }
 0x1da   : > { %1272 = vst.msk [vmem:[%s2131_s22 + $0x30] sm:$0xff] %vm1265_vm13, %v1261_v59  ;;  %v1252_v61 = vsel %vm1202_vm2, %v1707_v57, %v1242_v60 }
 0x1db   : > { %v1262_v62 = vmul.f32 %v1252_v61, %v1152_v30 }
 0x1dd   : > { %1273 = vst.msk [vmem:[%s2131_s22 + $0x38] sm:$0xff] %vm1265_vm13, %v1262_v62 }
 0x1e7   : > { %v1098_v58 = vpop.f32.mrf.mxu0 }
 0x1e8   : > { %v1132_v63 = vmul.f32 %v2116_v44, %v1098_v58 }
 0x1e9   : > { %v1624_v0 = vpop.f32.mrf.mxu0 }
 0x1ea   : > { %v1149_v1 = vadd.f32 %v2121_v46, %v1132_v63 }
 0x1eb   : > { %v1101_v2 = vpop.f32.mrf.mxu0  ;;  %v1114_v3 = vpop.f32.mrf.mxu1 }
 0x1ec   : > { %v1159_v4 = vand.u32 2147483647, %v1149_v1  ;;  %v1133_v5 = vmul.f32 %v2116_v44, %v1101_v2  ;;  %v1136_v6 = vmul.f32 %v2116_v44, %v1114_v3  ;;  %vm1199_vm3 = vcmp.ge.f32.partialorder %v1149_v1, 0.0 }
 0x1ed   : > { %v1625_v7 = vpop.f32.mrf.mxu0  ;;  %v1632_v8 = vpop.f32.mrf.mxu1 }
 0x1ee   : > { %v1169_v9 = vsub.f32 0.0, %v1159_v4  ;;  %v1150_v10 = vadd.f32 %v2121_v46, %v1133_v5  ;;  %v1153_v11 = vadd.f32 %v2121_v46, %v1136_v6 }
 0x1ef   : > { %v1117_v13 = vpop.f32.mrf.mxu1 }
 0x1f0   : > { %v1183_v15 = vmul.f32 1.442695, %v1169_v9  ;;  %v1160_v17 = vand.u32 2147483647, %v1150_v10  ;;  %v1163_v18 = vand.u32 2147483647, %v1153_v11  ;;  %v1137_v19 = vmul.f32 %v2116_v44, %v1117_v13 }
 0x1f1   : > { %v1633_v14 = vpop.f32.mrf.mxu1  ;;  %vm1200_vm4 = vcmp.ge.f32.partialorder %v1150_v10, 0.0  ;;  %vm1203_vm5 = vcmp.ge.f32.partialorder %v1153_v11, 0.0 }
 0x1f2   : > { %1708 = vpow2.f32 %v1183_v15  ;;  %v1170_v21 = vsub.f32 0.0, %v1160_v17  ;;  %v1173_v22 = vsub.f32 0.0, %v1163_v18  ;;  %v1154_v16 = vadd.f32 %v2121_v46, %v1137_v19 }
 0x1f4   : > { %v1185_v20 = vmul.f32 1.442695, %v1170_v21  ;;  %v1191_v23 = vmul.f32 1.442695, %v1173_v22  ;;  %v1164_v12 = vand.u32 2147483647, %v1154_v16 }
 0x1f5   : > { %vm1204_vm6 = vcmp.ge.f32.partialorder %v1154_v16, 0.0 }
 0x1f6   : > { %1710 = vpow2.f32 %v1185_v20  ;;  %v1174_v24 = vsub.f32 0.0, %v1164_v12 }
 0x1f7   : > { %1712 = vpow2.f32 %v1191_v23 }
 0x1f8   : > { %v1193_v25 = vmul.f32 1.442695, %v1174_v24 }
 0x1fa   : > { %1714 = vpow2.f32 %v1193_v25 }
 0x1ff   : > { %v1709_v26 = vpop.eup %1708 }
 0x200   : > { %v1209_v27 = vadd.f32 1.0, %v1709_v26 }
 0x202   : > { %1716 = vrcp.f32 %v1209_v27 }
 0x203   : > { %v1711_v28 = vpop.eup %1710 }
 0x204   : > { %v1713_v29 = vpop.eup %1712  ;;  %v1210_v44 = vadd.f32 1.0, %v1711_v28 }
 0x205   : > { %v1213_v30 = vadd.f32 1.0, %v1713_v29 }
 0x206   : > { %1718 = vrcp.f32 %v1210_v44 }
 0x207   : > { %1720 = vrcp.f32 %v1213_v30  ;;  %v1715_v31 = vpop.eup %1714 }
 0x208   : > { %v1214_v46 = vadd.f32 1.0, %v1715_v31 }
 0x20a   : > { %1722 = vrcp.f32 %v1214_v46 }
 0x20f   : > { %v1717_v32 = vpop.eup %1716 }
 0x210   : > { %v1239_v33 = vmul.f32 %v1717_v32, %v1709_v26 }
 0x212   : > { %v1249_v34 = vsel %vm1199_vm3, %v1717_v32, %v1239_v33 }
 0x213   : > { %v1719_v35 = vpop.eup %1718  ;;  %v1259_v36 = vmul.f32 %v1249_v34, %v1149_v1 }
 0x214   : > { %v1721_v37 = vpop.eup %1720  ;;  %v1240_v38 = vmul.f32 %v1719_v35, %v1711_v28 }
 0x215   : > { %1270 = vst.msk [vmem:[%s2131_s22 + $0x20] sm:$0xff] %vm1265_vm13, %v1259_v36  ;;  %v1243_v39 = vmul.f32 %v1721_v37, %v1713_v29 }
 0x216   : > { %v1250_v40 = vsel %vm1200_vm4, %v1719_v35, %v1240_v38 }
 0x217   : > { %v1260_v41 = vmul.f32 %v1250_v40, %v1150_v10  ;;  %v1253_v42 = vsel %vm1203_vm5, %v1721_v37, %v1243_v39  ;;  %v1723_v43 = vpop.eup %1722 }
 0x218   : > { %v1263_v45 = vmul.f32 %v1253_v42, %v1153_v11  ;;  %v1244_v47 = vmul.f32 %v1723_v43, %v1715_v31 }
 0x219   : > { %1271 = vst.msk [vmem:[%s2131_s22 + $0x28] sm:$0xff] %vm1265_vm13, %v1260_v41 }
 0x21a   : > { %1274 = vst.msk [vmem:[%s2131_s22 + $0x40] sm:$0xff] %vm1265_vm13, %v1263_v45  ;;  %v1254_v48 = vsel %vm1204_vm6, %v1723_v43, %v1244_v47 }
 0x21b   : > { %v1264_v49 = vmul.f32 %v1254_v48, %v1154_v16 }
 0x21d   : > { %1275 = vst.msk [vmem:[%s2131_s22 + $0x48] sm:$0xff] %vm1265_vm13, %v1264_v49 }
 0x21e PF: > { %s14_s17 = sadd.s32 1, %s1746_s17   ;;  %s2183_s15 = smov %s1742_s16 }
 0x21f   : > { %p11_p5 = scmp.ge.s32.totalorder %s14_s17, 4   ;;  %s2184_s16 = smov %s2186_s18 }
 0x221   :  { %13 = sbr.rel (!%p11_p5) target bundleno = 2 (0x2), region = 75 }

// kernel: bottleneck_forward.10
= control target key start
LH: loop header
LB: loop body
LE: loop exit
PB: predicated region body
PF: predicated region fallthrough
CT: control target
= control target key end

     0   :  { %s917_s9 = smov 0   ;;  %s919_s10 = smov 0   ;;  %s1300_s0 = inlined_call_operand.vmem [shape: f32[2,10,10,40], index: 0, kind: input, shape index: {}]   ;;  %s1301_s1 = inlined_call_operand.vmem [shape: f32[9,40], index: 1, kind: input, shape index: {}]   ;;  %s1302_s2 = inlined_call_operand.vmem [shape: f32[2,8,8,40], index: 2, kind: output, shape index: {}]  }
   0x1   :  { %s921_s11 = smov 0  }
   0x2 LB: > { %s24_s12 = sadd.s32 1, %s896_s10  ;;  %p845_p0 = scmp.ge.s32.totalorder %s900_s11, 1  ;;  %s900_s11 = sphi %s921_s11, %s12_s11   ;;  %s896_s10 = sphi %s919_s10, %s1304_s10   ;;  %s892_s9 = sphi %s917_s9, %s1303_s9  }
   0x3   : > { %p26_p1 = scmp.ge.s32.totalorder %s24_s12, 2  ;;  %p140_p2 = scmp.lt.s32.totalorder %s900_s11, 3 }
   0x5   : > { %s1306_s12 = smov (%p26_p1, %s24_s12), 0  ;;  %p141_p3 = pnand %p845_p0, %p140_p2 }
   0x6   : > { %p172_p4 = scmp.lt.s32.totalorder (!%p141_p3), %s892_s9, 1 }
   0x7   : > { %144 = sbr.rel (%p141_p3) target bundleno = 112 (0x70), region = 28 }
   0xc   : > { %v214_v0 = vlaneseq  ;;  %s1308_s9 = smov (!%p172_p4, %s892_s9), 1  ;;  %v212_v2 = vld [vmem:[%s1301_s1] sm:$0xff]  ;;  %vm270_vm0 = vcmask 1046528   ;;  %vm347_vm1 = vcmask 1045504   ;;  %v981_v36 = vld [vmem:[%s1301_s1 + $0x8] ss:$0 sm:$0xff] }
   0xd   : > { %s853_s15 = smul.u32 160, %s1308_s9  ;;  %vm732_vm2 = vcmask 326656   ;;  %s852_s21 = sshll.u32 %s1308_s9, 6 }
   0xe   : > { %v215_v1 = vshrl.u32 %v214_v0, 7  ;;  %s1042_s24 = scalar_lea.vmem %s1302_s2, %s852_s21 }
   0xf   : > { %s944_s18 = scalar_lea.vmem %s1300_s0, %s853_s15 }
  0x10   : > { %v216_v3 = vsub.s32 0, %v215_v1  ;;  %v236_v4 = vsub.s32 1, %v215_v1  ;;  %v313_v5 = vsub.s32 2, %v215_v1  ;;  %v390_v6 = vsub.s32 3, %v215_v1  ;;  %v192_v15 = vld [vmem:[%s944_s18] sm:$0xff]  ;;  %v194_v21 = vld [vmem:[%s944_s18 + $0x10] sm:$0xff] }
  0x11   : > { %v410_v7 = vsub.s32 4, %v215_v1  ;;  %v486_v8 = vsub.s32 5, %v215_v1  ;;  %v562_v9 = vsub.s32 6, %v215_v1  ;;  %v582_v10 = vsub.s32 7, %v215_v1  ;;  %v193_v16 = vld [vmem:[%s944_s18 + $0x8] sm:$0x3] }
  0x12   : > { %v946_v11 = vrot.slane %v212_v2, %v216_v3  ;;  %v948_v12 = vrot.slane %v212_v2, %v236_v4  ;;  %v950_v13 = vrot.slane %v212_v2, %v313_v5  ;;  %v952_v14 = vrot.slane %v212_v2, %v390_v6  ;;  %v195_v22 = vld [vmem:[%s944_s18 + $0x18] sm:$0x3]  ;;  %v976_v35 = vld [vmem:[%s944_s18 + $0x20] sm:$0xff]  ;;  %v990_v45 = vld [vmem:[%s944_s18 + $0x28] sm:$0x3] }
  0x13   : > { %v956_v17 = vrot.slane %v212_v2, %v410_v7  ;;  %v958_v18 = vrot.slane %v212_v2, %v486_v8  ;;  %v960_v19 = vrot.slane %v212_v2, %v562_v9  ;;  %v962_v20 = vrot.slane %v212_v2, %v582_v10 }
  0x14   : > { %v218_v23 = vmul.f32 %v946_v11, %v192_v15  ;;  %v238_v24 = vmul.f32 %v948_v12, %v192_v15  ;;  %v239_v25 = vmul.f32 %v948_v12, %v193_v16  ;;  %v315_v26 = vmul.f32 %v950_v13, %v192_v15 }
  0x15   : > { %v316_v27 = vmul.f32 %v950_v13, %v193_v16  ;;  %v392_v28 = vmul.f32 %v952_v14, %v194_v21  ;;  %v412_v29 = vmul.f32 %v956_v17, %v194_v21  ;;  %v413_v30 = vmul.f32 %v956_v17, %v195_v22 }
  0x16   : > { %v271_v31 = vrot.slane %v238_v24, 1  ;;  %v272_v32 = vrot.slane %v239_v25, 1  ;;  %v348_v33 = vrot.slane %v315_v26, 2  ;;  %v488_v34 = vmul.f32 %v958_v18, %v194_v21 }
  0x17   : > { %v349_v37 = vrot.slane %v316_v27, 2  ;;  %v444_v38 = vrot.slane %v412_v29, 1  ;;  %v445_v39 = vrot.slane %v413_v30, 1  ;;  %v489_v40 = vmul.f32 %v958_v18, %v195_v22  ;;  %v1024_v27 = vld [vmem:[%s944_s18 + $0x38] sm:$0x3] }
  0x18   : > { %v273_v41 = vsel %vm270_vm0, %v271_v31, %v272_v32  ;;  %v520_v42 = vrot.slane %v488_v34, 2  ;;  %v564_v43 = vmul.f32 %v960_v19, %v976_v35  ;;  %v584_v44 = vmul.f32 %v962_v20, %v976_v35 }
  0x19   : > { %v303_v46 = vadd.f32 %v273_v41, %v218_v23  ;;  %v350_v47 = vsel %vm347_vm1, %v348_v33, %v349_v37  ;;  %v446_v48 = vsel %vm270_vm0, %v444_v38, %v445_v39  ;;  %v521_v49 = vrot.slane %v489_v40, 2  ;;  %v1020_v23 = vld [vmem:[%s944_s18 + $0x30] sm:$0xff] }
  0x1a   : > { %v585_v50 = vmul.f32 %v962_v20, %v990_v45  ;;  %v616_v51 = vrot.slane %v584_v44, 1  ;;  %v660_v52 = vmul.f32 %v981_v36, %v976_v35  ;;  %v661_v53 = vmul.f32 %v981_v36, %v990_v45 }
  0x1b   : > { %v380_v54 = vadd.f32 %v350_v47, %v303_v46  ;;  %v522_v55 = vsel %vm347_vm1, %v520_v42, %v521_v49  ;;  %v219_v56 = vmul.f32 %v946_v11, %v194_v21  ;;  %v240_v57 = vmul.f32 %v948_v12, %v194_v21 }
  0x1c   : > { %v617_v58 = vrot.slane %v585_v50, 1  ;;  %v692_v59 = vrot.slane %v660_v52, 2  ;;  %v693_v60 = vrot.slane %v661_v53, 2  ;;  %v241_v61 = vmul.f32 %v948_v12, %v195_v22 }
  0x1d   : > { %v400_v62 = vadd.f32 %v392_v28, %v380_v54  ;;  %v274_v63 = vrot.slane %v240_v57, 1  ;;  %v317_v0 = vmul.f32 %v950_v13, %v194_v21  ;;  %v318_v1 = vmul.f32 %v950_v13, %v195_v22 }
  0x1e   : > { %v618_v2 = vsel %vm270_vm0, %v616_v51, %v617_v58  ;;  %v694_v3 = vsel %vm347_vm1, %v692_v59, %v693_v60  ;;  %v275_v4 = vrot.slane %v241_v61, 1  ;;  %v393_v5 = vmul.f32 %v952_v14, %v976_v35 }
  0x1f   : > { %v476_v6 = vadd.f32 %v446_v48, %v400_v62  ;;  %v351_v7 = vrot.slane %v317_v0, 2  ;;  %v352_v8 = vrot.slane %v318_v1, 2  ;;  %v414_v9 = vmul.f32 %v956_v17, %v976_v35 }
  0x20   : > { %v276_v10 = vsel %vm270_vm0, %v274_v63, %v275_v4  ;;  %v415_v15 = vmul.f32 %v956_v17, %v990_v45  ;;  %v490_v16 = vmul.f32 %v958_v18, %v976_v35  ;;  %v491_v21 = vmul.f32 %v958_v18, %v990_v45 }
  0x21   : > { %v552_v22 = vadd.f32 %v522_v55, %v476_v6  ;;  %v304_v24 = vadd.f32 %v276_v10, %v219_v56  ;;  %v353_v25 = vsel %vm347_vm1, %v351_v7, %v352_v8  ;;  %v447_v26 = vrot.slane %v414_v9, 1 }
  0x22   : > { %v448_v28 = vrot.slane %v415_v15, 1  ;;  %v523_v29 = vrot.slane %v490_v16, 2  ;;  %v524_v30 = vrot.slane %v491_v21, 2  ;;  %v565_v31 = vmul.f32 %v960_v19, %v1020_v23  ;;  %v1074_v15 = vld [vmem:[%s944_s18 + $0x48] sm:$0x3] }
  0x23   : > { %v572_v32 = vadd.f32 %v564_v43, %v552_v22  ;;  %v381_v33 = vadd.f32 %v353_v25, %v304_v24  ;;  %v586_v34 = vmul.f32 %v962_v20, %v1020_v23  ;;  %v587_v37 = vmul.f32 %v962_v20, %v1024_v27 }
  0x24   : > { %v449_v38 = vsel %vm270_vm0, %v447_v26, %v448_v28  ;;  %v525_v39 = vsel %vm347_vm1, %v523_v29, %v524_v30  ;;  %v662_v40 = vmul.f32 %v981_v36, %v1020_v23  ;;  %v663_v41 = vmul.f32 %v981_v36, %v1024_v27 }
  0x25   : > { %v648_v42 = vadd.f32 %v618_v2, %v572_v32  ;;  %v401_v44 = vadd.f32 %v393_v5, %v381_v33  ;;  %v619_v43 = vrot.slane %v586_v34, 1  ;;  %v620_v46 = vrot.slane %v587_v37, 1  ;;  %v1070_v5 = vld [vmem:[%s944_s18 + $0x40] sm:$0xff] }
  0x26   : > { %v695_v47 = vrot.slane %v662_v40, 2  ;;  %v696_v48 = vrot.slane %v663_v41, 2  ;;  %v220_v49 = vmul.f32 %v946_v11, %v976_v35  ;;  %v242_v50 = vmul.f32 %v948_v12, %v976_v35 }
  0x27   : > { %v724_v51 = vadd.f32 %v694_v3, %v648_v42  ;;  %v477_v52 = vadd.f32 %v449_v38, %v401_v44  ;;  %v621_v53 = vsel %vm270_vm0, %v619_v43, %v620_v46  ;;  %v243_v54 = vmul.f32 %v948_v12, %v990_v45 }
  0x28   : > { %v697_v55 = vsel %vm347_vm1, %v695_v47, %v696_v48  ;;  %v277_v56 = vrot.slane %v242_v50, 1  ;;  %v319_v57 = vmul.f32 %v950_v13, %v976_v35  ;;  %v320_v58 = vmul.f32 %v950_v13, %v990_v45 }
  0x29   : > { %733 = vst.msk [vmem:[%s1042_s24] sm:$0xff] %vm732_vm2, %v724_v51  ;;  %v553_v59 = vadd.f32 %v525_v39, %v477_v52  ;;  %v278_v60 = vrot.slane %v243_v54, 1  ;;  %v394_v61 = vmul.f32 %v952_v14, %v1020_v23  ;;  %v416_v62 = vmul.f32 %v956_v17, %v1020_v23 }
  0x2a   : > { %v354_v63 = vrot.slane %v319_v57, 2  ;;  %v355_v0 = vrot.slane %v320_v58, 2  ;;  %v417_v1 = vmul.f32 %v956_v17, %v1024_v27  ;;  %v492_v35 = vmul.f32 %v958_v18, %v1020_v23  ;;  %v1114_v58 = vld [vmem:[%s944_s18 + $0x50] sm:$0xff] }
  0x2b   : > { %v573_v45 = vadd.f32 %v565_v31, %v553_v59  ;;  %v279_v2 = vsel %vm270_vm0, %v277_v56, %v278_v60  ;;  %v450_v3 = vrot.slane %v416_v62, 1  ;;  %v493_v4 = vmul.f32 %v958_v18, %v1024_v27  ;;  %v1118_v62 = vld [vmem:[%s944_s18 + $0x58] sm:$0x3] }
  0x2c   : > { %v305_v6 = vadd.f32 %v279_v2, %v220_v49  ;;  %v356_v7 = vsel %vm347_vm1, %v354_v63, %v355_v0  ;;  %v451_v8 = vrot.slane %v417_v1, 1  ;;  %v526_v9 = vrot.slane %v492_v35, 2 }
  0x2d   : > { %v649_v10 = vadd.f32 %v621_v53, %v573_v45  ;;  %v527_v16 = vrot.slane %v493_v4, 2  ;;  %v588_v21 = vmul.f32 %v962_v20, %v1070_v5  ;;  %v566_v24 = vmul.f32 %v960_v19, %v1070_v5 }
  0x2e   : > { %v382_v22 = vadd.f32 %v356_v7, %v305_v6  ;;  %v589_v25 = vmul.f32 %v962_v20, %v1074_v15  ;;  %v664_v26 = vmul.f32 %v981_v36, %v1070_v5  ;;  %v452_v29 = vsel %vm270_vm0, %v450_v3, %v451_v8 }
  0x2f   : > { %v725_v28 = vadd.f32 %v697_v55, %v649_v10  ;;  %v622_v30 = vrot.slane %v588_v21, 1  ;;  %v665_v31 = vmul.f32 %v981_v36, %v1074_v15  ;;  %v528_v33 = vsel %vm347_vm1, %v526_v9, %v527_v16 }
  0x30   : > { %v402_v32 = vadd.f32 %v394_v61, %v382_v22  ;;  %v623_v34 = vrot.slane %v589_v25, 1  ;;  %v698_v37 = vrot.slane %v664_v26, 2  ;;  %v244_v39 = vmul.f32 %v948_v12, %v1020_v23 }
  0x31   : > { %734 = vst.msk [vmem:[%s1042_s24 + $0x8] sm:$0xff] %vm732_vm2, %v725_v28  ;;  %v699_v38 = vrot.slane %v665_v31, 2  ;;  %v245_v40 = vmul.f32 %v948_v12, %v1024_v27  ;;  %v321_v41 = vmul.f32 %v950_v13, %v1020_v23  ;;  %v221_v43 = vmul.f32 %v946_v11, %v1020_v23 }
  0x32   : > { %v478_v42 = vadd.f32 %v452_v29, %v402_v32  ;;  %v624_v44 = vsel %vm270_vm0, %v622_v30, %v623_v34  ;;  %v322_v46 = vmul.f32 %v950_v13, %v1024_v27  ;;  %v280_v47 = vrot.slane %v244_v39, 1 }
  0x33   : > { %v281_v48 = vrot.slane %v245_v40, 1  ;;  %v357_v49 = vrot.slane %v321_v41, 2  ;;  %v395_v50 = vmul.f32 %v952_v14, %v1070_v5  ;;  %v418_v53 = vmul.f32 %v956_v17, %v1070_v5 }
  0x34   : > { %v554_v51 = vadd.f32 %v528_v33, %v478_v42  ;;  %v358_v52 = vrot.slane %v322_v46, 2  ;;  %v419_v54 = vmul.f32 %v956_v17, %v1074_v15  ;;  %v700_v23 = vsel %vm347_vm1, %v698_v37, %v699_v38 }
  0x35   : > { %v282_v55 = vsel %vm270_vm0, %v280_v47, %v281_v48  ;;  %v494_v27 = vmul.f32 %v958_v18, %v1070_v5  ;;  %v495_v56 = vmul.f32 %v958_v18, %v1074_v15  ;;  %v453_v61 = vrot.slane %v418_v53, 1 }
  0x36   : > { %v574_v57 = vadd.f32 %v566_v24, %v554_v51  ;;  %v306_v59 = vadd.f32 %v282_v55, %v221_v43  ;;  %v359_v60 = vsel %vm347_vm1, %v357_v49, %v358_v52  ;;  %v454_v63 = vrot.slane %v419_v54, 1  ;;  %v1159_v51 = vld [vmem:[%s944_s18 + $0x60] sm:$0xff]  ;;  %v1162_v52 = vld [vmem:[%s944_s18 + $0x68] sm:$0x3] }
  0x37   : > { %v529_v0 = vrot.slane %v494_v27, 2  ;;  %v530_v1 = vrot.slane %v495_v56, 2  ;;  %v590_v35 = vmul.f32 %v962_v20, %v1114_v58  ;;  %v591_v3 = vmul.f32 %v962_v20, %v1118_v62 }
  0x38   : > { %v650_v45 = vadd.f32 %v624_v44, %v574_v57  ;;  %v383_v2 = vadd.f32 %v359_v60, %v306_v59  ;;  %v666_v4 = vmul.f32 %v981_v36, %v1114_v58  ;;  %v455_v6 = vsel %vm270_vm0, %v453_v61, %v454_v63 }
  0x39   : > { %v567_v7 = vmul.f32 %v960_v19, %v1114_v58  ;;  %v625_v8 = vrot.slane %v590_v35, 1  ;;  %v667_v9 = vmul.f32 %v981_v36, %v1118_v62  ;;  %v531_v21 = vsel %vm347_vm1, %v529_v0, %v530_v1 }
  0x3a   : > { %v726_v10 = vadd.f32 %v700_v23, %v650_v45  ;;  %v403_v16 = vadd.f32 %v395_v50, %v383_v2  ;;  %v626_v22 = vrot.slane %v591_v3, 1  ;;  %v701_v24 = vrot.slane %v666_v4, 2 }
  0x3b   : > { %v702_v25 = vrot.slane %v667_v9, 2  ;;  %v246_v26 = vmul.f32 %v948_v12, %v1070_v5  ;;  %v247_v28 = vmul.f32 %v948_v12, %v1074_v15  ;;  %v222_v30 = vmul.f32 %v946_v11, %v1070_v5 }
  0x3c   : > { %735 = vst.msk [vmem:[%s1042_s24 + $0x10] sm:$0xff] %vm732_vm2, %v726_v10  ;;  %v479_v29 = vadd.f32 %v455_v6, %v403_v16  ;;  %v323_v31 = vmul.f32 %v950_v13, %v1070_v5  ;;  %v324_v32 = vmul.f32 %v950_v13, %v1074_v15  ;;  %v627_v33 = vsel %vm270_vm0, %v625_v8, %v626_v22 }
  0x3d   : > { %v283_v34 = vrot.slane %v246_v26, 1  ;;  %v284_v37 = vrot.slane %v247_v28, 1  ;;  %v396_v38 = vmul.f32 %v952_v14, %v1114_v58  ;;  %v420_v42 = vmul.f32 %v956_v17, %v1114_v58 }
  0x3e   : > { %v555_v39 = vadd.f32 %v531_v21, %v479_v29  ;;  %v360_v40 = vrot.slane %v323_v31, 2  ;;  %v361_v41 = vrot.slane %v324_v32, 2  ;;  %v421_v15 = vmul.f32 %v956_v17, %v1118_v62 }
  0x3f   : > { %v285_v5 = vsel %vm270_vm0, %v283_v34, %v284_v37  ;;  %v496_v44 = vmul.f32 %v958_v18, %v1114_v58  ;;  %v497_v43 = vmul.f32 %v958_v18, %v1118_v62  ;;  %v456_v49 = vrot.slane %v420_v42, 1 }
  0x40   : > { %v575_v46 = vadd.f32 %v567_v7, %v555_v39  ;;  %v307_v47 = vadd.f32 %v285_v5, %v222_v30  ;;  %v362_v48 = vsel %vm347_vm1, %v360_v40, %v361_v41  ;;  %v703_v50 = vsel %vm347_vm1, %v701_v24, %v702_v25  ;;  %v1205_v39 = vld [vmem:[%s944_s18 + $0x78] sm:$0x3] }
  0x41   : > { %v457_v53 = vrot.slane %v421_v15, 1  ;;  %v532_v54 = vrot.slane %v496_v44, 2  ;;  %v533_v23 = vrot.slane %v497_v43, 2  ;;  %v592_v56 = vmul.f32 %v962_v20, %v1159_v51 }
  0x42   : > { %v651_v55 = vadd.f32 %v627_v33, %v575_v46  ;;  %v384_v27 = vadd.f32 %v362_v48, %v307_v47  ;;  %v593_v57 = vmul.f32 %v962_v20, %v1162_v52  ;;  %v568_v60 = vmul.f32 %v960_v19, %v1159_v51 }
  0x43   : > { %v458_v59 = vsel %vm270_vm0, %v456_v49, %v457_v53  ;;  %v668_v61 = vmul.f32 %v981_v36, %v1159_v51  ;;  %v669_v63 = vmul.f32 %v981_v36, %v1162_v52  ;;  %v628_v35 = vrot.slane %v592_v56, 1 }
  0x44   : > { %v727_v0 = vadd.f32 %v703_v50, %v651_v55  ;;  %v404_v1 = vadd.f32 %v396_v38, %v384_v27  ;;  %v629_v45 = vrot.slane %v593_v57, 1  ;;  %v534_v2 = vsel %vm347_vm1, %v532_v54, %v533_v23  ;;  %v1202_v38 = vld [vmem:[%s944_s18 + $0x70] sm:$0xff] }
  0x45   : > { %v704_v3 = vrot.slane %v668_v61, 2  ;;  %v705_v4 = vrot.slane %v669_v63, 2  ;;  %v248_v6 = vmul.f32 %v948_v12, %v1114_v58  ;;  %v223_v8 = vmul.f32 %v946_v11, %v1114_v58 }
  0x46   : > { %736 = vst.msk [vmem:[%s1042_s24 + $0x18] sm:$0xff] %vm732_vm2, %v727_v0  ;;  %v480_v7 = vadd.f32 %v458_v59, %v404_v1  ;;  %v249_v9 = vmul.f32 %v948_v12, %v1118_v62  ;;  %v325_v10 = vmul.f32 %v950_v13, %v1114_v58  ;;  %v630_v16 = vsel %vm270_vm0, %v628_v35, %v629_v45 }
  0x47   : > { %v706_v21 = vsel %vm347_vm1, %v704_v3, %v705_v4  ;;  %v286_v22 = vrot.slane %v248_v6, 1  ;;  %v326_v24 = vmul.f32 %v950_v13, %v1118_v62  ;;  %v422_v29 = vmul.f32 %v956_v17, %v1159_v51 }
  0x48   : > { %v556_v25 = vadd.f32 %v534_v2, %v480_v7  ;;  %v287_v26 = vrot.slane %v249_v9, 1  ;;  %v363_v28 = vrot.slane %v325_v10, 2  ;;  %v423_v58 = vmul.f32 %v956_v17, %v1162_v52 }
  0x49   : > { %v364_v30 = vrot.slane %v326_v24, 2  ;;  %v498_v31 = vmul.f32 %v958_v18, %v1159_v51  ;;  %v499_v32 = vmul.f32 %v958_v18, %v1162_v52  ;;  %v397_v62 = vmul.f32 %v952_v14, %v1159_v51 }
  0x4a   : > { %v576_v33 = vadd.f32 %v568_v60, %v556_v25  ;;  %v288_v34 = vsel %vm270_vm0, %v286_v22, %v287_v26  ;;  %v459_v37 = vrot.slane %v422_v29, 1  ;;  %v460_v42 = vrot.slane %v423_v58, 1  ;;  %v208_v25 = vld [vmem:[%s944_s18 + $0x80] sm:$0xff]  ;;  %v209_v26 = vld [vmem:[%s944_s18 + $0x88] sm:$0x3] }
  0x4b   : > { %v308_v40 = vadd.f32 %v288_v34, %v223_v8  ;;  %v365_v41 = vsel %vm347_vm1, %v363_v28, %v364_v30  ;;  %v535_v5 = vrot.slane %v498_v31, 2  ;;  %v536_v44 = vrot.slane %v499_v32, 2 }
  0x4c   : > { %v652_v15 = vadd.f32 %v630_v16, %v576_v33  ;;  %v594_v43 = vmul.f32 %v962_v20, %v1202_v38  ;;  %v595_v46 = vmul.f32 %v962_v20, %v1205_v39  ;;  %v569_v48 = vmul.f32 %v960_v19, %v1202_v38 }
  0x4d   : > { %v385_v47 = vadd.f32 %v365_v41, %v308_v40  ;;  %v670_v49 = vmul.f32 %v981_v36, %v1202_v38  ;;  %v671_v50 = vmul.f32 %v981_v36, %v1205_v39  ;;  %v461_v54 = vsel %vm270_vm0, %v459_v37, %v460_v42 }
  0x4e   : > { %v728_v53 = vadd.f32 %v706_v21, %v652_v15  ;;  %v631_v23 = vrot.slane %v594_v43, 1  ;;  %v632_v55 = vrot.slane %v595_v46, 1  ;;  %v537_v56 = vsel %vm347_vm1, %v535_v5, %v536_v44 }
  0x4f   : > { %v405_v27 = vadd.f32 %v397_v62, %v385_v47  ;;  %v707_v57 = vrot.slane %v670_v49, 2  ;;  %v708_v59 = vrot.slane %v671_v50, 2  ;;  %v224_v60 = vmul.f32 %v946_v11, %v1159_v51 }
  0x50   : > { %737 = vst.msk [vmem:[%s1042_s24 + $0x20] sm:$0xff] %vm732_vm2, %v728_v53  ;;  %v250_v61 = vmul.f32 %v948_v12, %v1159_v51  ;;  %v251_v63 = vmul.f32 %v948_v12, %v1162_v52  ;;  %v327_v0 = vmul.f32 %v950_v13, %v1159_v51  ;;  %v633_v35 = vsel %vm270_vm0, %v631_v23, %v632_v55 }
  0x51   : > { %v481_v1 = vadd.f32 %v461_v54, %v405_v27  ;;  %v709_v45 = vsel %vm347_vm1, %v707_v57, %v708_v59  ;;  %v328_v2 = vmul.f32 %v950_v13, %v1162_v52  ;;  %v424_v7 = vmul.f32 %v956_v17, %v1202_v38 }
  0x52   : > { %v289_v3 = vrot.slane %v250_v61, 1  ;;  %v290_v4 = vrot.slane %v251_v63, 1  ;;  %v366_v6 = vrot.slane %v327_v0, 2  ;;  %v425_v51 = vmul.f32 %v956_v17, %v1205_v39  ;;  %v210_v61 = vld [vmem:[%s944_s18 + $0x90] sm:$0xff] }
  0x53   : > { %v557_v8 = vadd.f32 %v537_v56, %v481_v1  ;;  %v367_v9 = vrot.slane %v328_v2, 2  ;;  %v500_v10 = vmul.f32 %v958_v18, %v1202_v38  ;;  %v398_v21 = vmul.f32 %v952_v14, %v1202_v38  ;;  %v211_v1 = vld [vmem:[%s944_s18 + $0x98] sm:$0x3] }
  0x54   : > { %v291_v16 = vsel %vm270_vm0, %v289_v3, %v290_v4  ;;  %v462_v52 = vrot.slane %v424_v7, 1  ;;  %v501_v22 = vmul.f32 %v958_v18, %v1205_v39  ;;  %v463_v30 = vrot.slane %v425_v51, 1 }
  0x55   : > { %v577_v24 = vadd.f32 %v569_v48, %v557_v8  ;;  %v309_v28 = vadd.f32 %v291_v16, %v224_v60  ;;  %v368_v29 = vsel %vm347_vm1, %v366_v6, %v367_v9  ;;  %v538_v58 = vrot.slane %v500_v10, 2 }
  0x56   : > { %v539_v31 = vrot.slane %v501_v22, 2  ;;  %v596_v32 = vmul.f32 %v962_v20, %v208_v25  ;;  %v597_v33 = vmul.f32 %v962_v20, %v209_v26  ;;  %v570_v37 = vmul.f32 %v960_v19, %v208_v25 }
  0x57   : > { %v653_v34 = vadd.f32 %v633_v35, %v577_v24  ;;  %v386_v62 = vadd.f32 %v368_v29, %v309_v28  ;;  %v672_v40 = vmul.f32 %v981_v36, %v208_v25  ;;  %v464_v41 = vsel %vm270_vm0, %v462_v52, %v463_v30 }
  0x58   : > { %v634_v42 = vrot.slane %v596_v32, 1  ;;  %v635_v5 = vrot.slane %v597_v33, 1  ;;  %v673_v15 = vmul.f32 %v981_v36, %v209_v26  ;;  %v540_v46 = vsel %vm347_vm1, %v538_v58, %v539_v31 }
  0x59   : > { %v729_v44 = vadd.f32 %v709_v45, %v653_v34  ;;  %v406_v43 = vadd.f32 %v398_v21, %v386_v62  ;;  %v710_v47 = vrot.slane %v672_v40, 2  ;;  %v225_v49 = vmul.f32 %v946_v11, %v1202_v38 }
  0x5a   : > { %v636_v48 = vsel %vm270_vm0, %v634_v42, %v635_v5  ;;  %v252_v50 = vmul.f32 %v948_v12, %v1202_v38  ;;  %v253_v53 = vmul.f32 %v948_v12, %v1205_v39  ;;  %v711_v23 = vrot.slane %v673_v15, 2 }
  0x5b   : > { %738 = vst.msk [vmem:[%s1042_s24 + $0x28] sm:$0xff] %vm732_vm2, %v729_v44  ;;  %v482_v54 = vadd.f32 %v464_v41, %v406_v43  ;;  %v329_v55 = vmul.f32 %v950_v13, %v1202_v38  ;;  %v330_v27 = vmul.f32 %v950_v13, %v1205_v39  ;;  %v399_v11 = vmul.f32 %v952_v14, %v208_v25 }
  0x5c   : > { %v292_v56 = vrot.slane %v252_v50, 1  ;;  %v293_v57 = vrot.slane %v253_v53, 1  ;;  %v426_v59 = vmul.f32 %v956_v17, %v208_v25  ;;  %v427_v0 = vmul.f32 %v956_v17, %v209_v26 }
  0x5d   : > { %v558_v60 = vadd.f32 %v540_v46, %v482_v54  ;;  %v369_v63 = vrot.slane %v329_v55, 2  ;;  %v370_v12 = vrot.slane %v330_v27, 2  ;;  %v502_v38 = vmul.f32 %v958_v18, %v208_v25 }
  0x5e   : > { %v294_v35 = vsel %vm270_vm0, %v292_v56, %v293_v57  ;;  %v465_v45 = vrot.slane %v426_v59, 1  ;;  %v503_v13 = vmul.f32 %v958_v18, %v209_v26  ;;  %v466_v3 = vrot.slane %v427_v0, 1 }
  0x5f   : > { %v578_v39 = vadd.f32 %v570_v37, %v558_v60  ;;  %v310_v2 = vadd.f32 %v294_v35, %v225_v49  ;;  %v371_v14 = vsel %vm347_vm1, %v369_v63, %v370_v12  ;;  %v712_v4 = vsel %vm347_vm1, %v710_v47, %v711_v23 }
  0x60   : > { %v541_v6 = vrot.slane %v502_v38, 2  ;;  %v542_v7 = vrot.slane %v503_v13, 2  ;;  %v598_v17 = vmul.f32 %v962_v20, %v210_v61  ;;  %v599_v51 = vmul.f32 %v962_v20, %v211_v1 }
  0x61   : > { %v654_v8 = vadd.f32 %v636_v48, %v578_v39  ;;  %v387_v9 = vadd.f32 %v371_v14, %v310_v2  ;;  %v467_v10 = vsel %vm270_vm0, %v465_v45, %v466_v3  ;;  %v674_v18 = vmul.f32 %v981_v36, %v210_v61 }
  0x62   : > { %v675_v16 = vmul.f32 %v981_v36, %v211_v1  ;;  %v543_v22 = vsel %vm347_vm1, %v541_v6, %v542_v7  ;;  %v637_v24 = vrot.slane %v598_v17, 1  ;;  %v638_v25 = vrot.slane %v599_v51, 1 }
  0x63   : > { %v730_v21 = vadd.f32 %v712_v4, %v654_v8  ;;  %v407_v52 = vadd.f32 %v399_v11, %v387_v9  ;;  %v571_v28 = vmul.f32 %v960_v19, %v210_v61  ;;  %v713_v29 = vrot.slane %v674_v18, 2 }
  0x64   : > { %v714_v20 = vrot.slane %v675_v16, 2  ;;  %v639_v58 = vsel %vm270_vm0, %v637_v24, %v638_v25 }
  0x65   : > { %739 = vst.msk [vmem:[%s1042_s24 + $0x30] sm:$0xff] %vm732_vm2, %v730_v21  ;;  %v483_v26 = vadd.f32 %v467_v10, %v407_v52 }
  0x66   : > { %v715_v36 = vsel %vm347_vm1, %v713_v29, %v714_v20 }
  0x67   : > { %v559_v30 = vadd.f32 %v543_v22, %v483_v26 }
  0x69   : > { %v579_v31 = vadd.f32 %v571_v28, %v559_v30 }
  0x6b   : > { %v655_v32 = vadd.f32 %v639_v58, %v579_v31 }
  0x6d   : > { %v731_v33 = vadd.f32 %v715_v36, %v655_v32 }
  0x6f   : > { %740 = vst.msk [vmem:[%s1042_s24 + $0x38] sm:$0xff] %vm732_vm2, %v731_v33 }
  0x70 PF: > { %s12_s11 = sadd.s32 1, %s900_s11   ;;  %s1303_s9 = smov %s896_s10 }
  0x71   : > { %p9_p5 = scmp.ge.s32.totalorder %s12_s11, 4   ;;  %s1304_s10 = smov %s1306_s12 }
  0x73   :  { %11 = sbr.rel (!%p9_p5) target bundleno = 2 (0x2), region = 61 }

// kernel: bottleneck_forward.9
= control target key start
LH: loop header
LB: loop body
LE: loop exit
PB: predicated region body
PF: predicated region fallthrough
CT: control target
= control target key end

     0   :  { %s487_s1 = inlined_call_operand.vmem [shape: f32[128,128], index: 1, kind: input, shape index: {}]   ;;  %s488_s0 = inlined_call_operand.vmem [shape: f32[128,128], index: 0, kind: input, shape index: {}]   ;;  %s489_s2 = inlined_call_operand.vmem [shape: f32[128,128], index: 2, kind: output, shape index: {}]  }
   0x1   :  { %v86_v0 = vld [vmem:[%s487_s1 + $0x70] sm:$0xff]  ;;  %v87_v1 = vld [vmem:[%s487_s1 + $0x78] sm:$0xff]  ;;  %v84_v2 = vld [vmem:[%s487_s1 + $0x60] sm:$0xff] }
   0x2   :  { %v95_v3 = vpack.c.bf16 %v87_v1, %v86_v0  ;;  %v85_v4 = vld [vmem:[%s487_s1 + $0x68] sm:$0xff]  ;;  %v82_v6 = vld [vmem:[%s487_s1 + $0x50] sm:$0xff]  ;;  %v83_v7 = vld [vmem:[%s487_s1 + $0x58] sm:$0xff] }
   0x3   :  { %v94_v5 = vpack.c.bf16 %v85_v4, %v84_v2  ;;  %v93_v8 = vpack.c.bf16 %v83_v7, %v82_v6  ;;  %v80_v9 = vld [vmem:[%s487_s1 + $0x40] sm:$0xff]  ;;  %v49_v11 = vld [vmem:[%s488_s0 + $0x8] sm:$0xff]  ;;  %v78_v18 = vld [vmem:[%s487_s1 + $0x30] sm:$0xff] }
   0x4   :  { %280 = vmatprep.subr.bf16.mxu0 %v95_v3  ;;  %312 = vmatprep.subr.bf16.mxu1 %v95_v3  ;;  %v48_v10 = vld [vmem:[%s488_s0] sm:$0xff]  ;;  %v81_v12 = vld [vmem:[%s487_s1 + $0x48] sm:$0xff]  ;;  %v79_v19 = vld [vmem:[%s487_s1 + $0x38] sm:$0xff] }
   0x5   :  { %281 = vmatpush3.bf16.msra.mxu0 %v95_v3  ;;  %320 = vmatpush3.bf16.msra.mxu1 %v95_v3  ;;  %v64_v13 = vpack.c.bf16 %v49_v11, %v48_v10  ;;  %v56_v14 = vld [vmem:[%s488_s0 + $0x40] sm:$0xff]  ;;  %v57_v15 = vld [vmem:[%s488_s0 + $0x48] sm:$0xff]  ;;  %v92_v17 = vpack.c.bf16 %v81_v12, %v80_v9  ;;  %v91_v20 = vpack.c.bf16 %v79_v19, %v78_v18  ;;  %v74_v24 = vld [vmem:[%s487_s1 + $0x10] sm:$0xff] }
   0x6   :  { %282 = vmatprep.subr.bf16.mxu0 %v94_v5  ;;  %313 = vmatprep.subr.bf16.mxu1 %v94_v5  ;;  %v68_v16 = vpack.c.bf16 %v57_v15, %v56_v14  ;;  %v76_v21 = vld [vmem:[%s487_s1 + $0x20] sm:$0xff]  ;;  %v77_v22 = vld [vmem:[%s487_s1 + $0x28] sm:$0xff]  ;;  %v75_v25 = vld [vmem:[%s487_s1 + $0x18] sm:$0xff] }
   0x7   :  { %296 = vmatprep.mubr.bf16.mxu0 %v64_v13  ;;  %v90_v23 = vpack.c.bf16 %v77_v22, %v76_v21  ;;  %v89_v26 = vpack.c.bf16 %v75_v25, %v74_v24  ;;  %v72_v27 = vld [vmem:[%s487_s1] sm:$0xff]  ;;  %v73_v28 = vld [vmem:[%s487_s1 + $0x8] sm:$0xff]  ;;  %v50_v30 = vld [vmem:[%s488_s0 + $0x10] sm:$0xff] }
   0x8   :  { %304 = vmatprep.mubr.bf16.mxu1 %v68_v16  ;;  %v88_v29 = vpack.c.bf16 %v73_v28, %v72_v27  ;;  %v51_v31 = vld [vmem:[%s488_s0 + $0x18] sm:$0xff]  ;;  %v58_v32 = vld [vmem:[%s488_s0 + $0x50] sm:$0xff]  ;;  %v52_v34 = vld [vmem:[%s488_s0 + $0x20] sm:$0xff] }
   0x9   :  { %283 = vmatpush3.bf16.msra.mxu0 %v94_v5  ;;  %321 = vmatpush3.bf16.msra.mxu1 %v94_v5  ;;  %v59_v33 = vld [vmem:[%s488_s0 + $0x58] sm:$0xff]  ;;  %v53_v35 = vld [vmem:[%s488_s0 + $0x28] sm:$0xff]  ;;  %v60_v36 = vld [vmem:[%s488_s0 + $0x60] sm:$0xff]  ;;  %v65_v38 = vpack.c.bf16 %v51_v31, %v50_v30 }
   0xa   :  { %284 = vmatprep.subr.bf16.mxu0 %v93_v8  ;;  %314 = vmatprep.subr.bf16.mxu1 %v93_v8  ;;  %v61_v37 = vld [vmem:[%s488_s0 + $0x68] sm:$0xff]  ;;  %v69_v39 = vpack.c.bf16 %v59_v33, %v58_v32  ;;  %v66_v40 = vpack.c.bf16 %v53_v35, %v52_v34  ;;  %v54_v42 = vld [vmem:[%s488_s0 + $0x30] sm:$0xff]  ;;  %v55_v43 = vld [vmem:[%s488_s0 + $0x38] sm:$0xff] }
   0xb   :  { %v70_v41 = vpack.c.bf16 %v61_v37, %v60_v36  ;;  %v62_v44 = vld [vmem:[%s488_s0 + $0x70] sm:$0xff]  ;;  %v63_v45 = vld [vmem:[%s488_s0 + $0x78] sm:$0xff]  ;;  %v67_v46 = vpack.c.bf16 %v55_v43, %v54_v42 }
   0xc   :  { %v71_v47 = vpack.c.bf16 %v63_v45, %v62_v44 }
   0xd   :  { %285 = vmatpush3.bf16.msra.mxu0 %v93_v8  ;;  %322 = vmatpush3.bf16.msra.mxu1 %v93_v8 }
   0xe   :  { %286 = vmatprep.subr.bf16.mxu0 %v92_v17  ;;  %315 = vmatprep.subr.bf16.mxu1 %v92_v17 }
  0x11   :  { %287 = vmatpush3.bf16.msra.mxu0 %v92_v17  ;;  %323 = vmatpush3.bf16.msra.mxu1 %v92_v17 }
  0x12   :  { %288 = vmatprep.subr.bf16.mxu0 %v91_v20  ;;  %316 = vmatprep.subr.bf16.mxu1 %v91_v20 }
  0x15   :  { %289 = vmatpush3.bf16.msra.mxu0 %v91_v20  ;;  %324 = vmatpush3.bf16.msra.mxu1 %v91_v20 }
  0x16   :  { %290 = vmatprep.subr.bf16.mxu0 %v90_v23  ;;  %317 = vmatprep.subr.bf16.mxu1 %v90_v23 }
  0x19   :  { %291 = vmatpush3.bf16.msra.mxu0 %v90_v23  ;;  %325 = vmatpush3.bf16.msra.mxu1 %v90_v23 }
  0x1a   :  { %292 = vmatprep.subr.bf16.mxu0 %v89_v26  ;;  %318 = vmatprep.subr.bf16.mxu1 %v89_v26 }
  0x1d   :  { %293 = vmatpush3.bf16.msra.mxu0 %v89_v26  ;;  %326 = vmatpush3.bf16.msra.mxu1 %v89_v26 }
  0x1e   :  { %294 = vmatprep.subr.bf16.mxu0 %v88_v29  ;;  %319 = vmatprep.subr.bf16.mxu1 %v88_v29 }
  0x21   :  { %295 = vmatpush3.bf16.msra.mxu0 %v88_v29  ;;  %327 = vmatpush3.bf16.msra.mxu1 %v88_v29 }
  0x24   :  { %297 = vmatmul.mubr.bf16.vlgmr.msra.gmra.mxu0 %v65_v38  ;;  %305 = vmatmul.mubr.bf16.vlgmr.msra.gmra.mxu1 %v69_v39 }
  0x25   :  { %300 = vmatprep.mubr.bf16.mxu0 %v66_v40  ;;  %308 = vmatprep.mubr.bf16.mxu1 %v70_v41 }
  0x2c   :  { %301 = vmatmul.mubr.bf16.gmra.mxu0 %v67_v46  ;;  %309 = vmatmul.mubr.bf16.gmra.mxu1 %v71_v47 }
  0xe4   :  { %v298_v48 = vpop.f32.mrf.mxu0  ;;  %v306_v49 = vpop.f32.mrf.mxu1 }
  0xe5   :  { %246 = vst [vmem:[%s489_s2 + $0x10] sm:$0xff] %v298_v48  ;;  %254 = vst [vmem:[%s489_s2 + $0x50] sm:$0xff] %v306_v49 }
  0xe6   :  { %v130_v50 = vpop.f32.mrf.mxu0  ;;  %v162_v51 = vpop.f32.mrf.mxu1 }
  0xe7   :  { %244 = vst [vmem:[%s489_s2] sm:$0xff] %v130_v50  ;;  %252 = vst [vmem:[%s489_s2 + $0x40] sm:$0xff] %v162_v51 }
  0xe8   :  { %v299_v52 = vpop.f32.mrf.mxu0  ;;  %v307_v53 = vpop.f32.mrf.mxu1 }
  0xe9   :  { %247 = vst [vmem:[%s489_s2 + $0x18] sm:$0xff] %v299_v52  ;;  %255 = vst [vmem:[%s489_s2 + $0x58] sm:$0xff] %v307_v53 }
  0xea   :  { %v133_v54 = vpop.f32.mrf.mxu0  ;;  %v165_v55 = vpop.f32.mrf.mxu1 }
  0xeb   :  { %245 = vst [vmem:[%s489_s2 + $0x8] sm:$0xff] %v133_v54  ;;  %253 = vst [vmem:[%s489_s2 + $0x48] sm:$0xff] %v165_v55 }
  0xec   :  { %v302_v56 = vpop.f32.mrf.mxu0  ;;  %v310_v57 = vpop.f32.mrf.mxu1 }
  0xed   :  { %250 = vst [vmem:[%s489_s2 + $0x30] sm:$0xff] %v302_v56  ;;  %258 = vst [vmem:[%s489_s2 + $0x70] sm:$0xff] %v310_v57 }
  0xee   :  { %v146_v58 = vpop.f32.mrf.mxu0  ;;  %v178_v59 = vpop.f32.mrf.mxu1 }
  0xef   :  { %248 = vst [vmem:[%s489_s2 + $0x20] sm:$0xff] %v146_v58  ;;  %256 = vst [vmem:[%s489_s2 + $0x60] sm:$0xff] %v178_v59 }
  0xf0   :  { %v303_v60 = vpop.f32.mrf.mxu0  ;;  %v311_v61 = vpop.f32.mrf.mxu1 }
  0xf1   :  { %251 = vst [vmem:[%s489_s2 + $0x38] sm:$0xff] %v303_v60  ;;  %259 = vst [vmem:[%s489_s2 + $0x78] sm:$0xff] %v311_v61 }
  0xf2   :  { %v149_v62 = vpop.f32.mrf.mxu0  ;;  %v181_v63 = vpop.f32.mrf.mxu1 }
  0xf3   :  { %249 = vst [vmem:[%s489_s2 + $0x28] sm:$0xff] %v149_v62  ;;  %257 = vst [vmem:[%s489_s2 + $0x68] sm:$0xff] %v181_v63 }

// kernel: bottleneck_forward.12
= control target key start
LH: loop header
LB: loop body
LE: loop exit
PB: predicated region body
PF: predicated region fallthrough
CT: control target
= control target key end

     0   :  { %s1749_s15 = smov 0   ;;  %s2369_s0 = inlined_call_operand.vmem [shape: bf16[8,8,128], index: 0, kind: input, shape index: {}]   ;;  %s2370_s1 = inlined_call_operand.vmem [shape: bf16[8,128,8], index: 1, kind: input, shape index: {}]   ;;  %s2371_s2 = inlined_call_operand.vmem [shape: bf16[8,8,128], index: 2, kind: input, shape index: {}]   ;;  %s2372_s3 = inlined_call_operand.vmem [shape: f32[8,1,1], index: 3, kind: input, shape index: {}]   ;;  %s2373_s4 = inlined_call_operand.vmem [shape: bf16[8,8,128], index: 4, kind: output, shape index: {}]  }
   0x1 LB: > { %s1307_s16 = sadd.s32 4294967295, %s1719_s15   ;;  %p1311_p0 = scmp.ge.s32.totalorder %s1719_s15, 1  ;;  %s1719_s15 = sphi %s1749_s15, %s14_s15  }
   0x2   : > { %p196_p1 = scmp.lt.s32.totalorder %s1719_s15, 3 }
   0x4   : > { %p197_p2 = pnand %p1311_p0, %p196_p1 }
   0x6   : > { %200 = sbr.rel (%p197_p2) target bundleno = 928 (0x3a0), region = 36 }
   0xb   : > { %s1312_s17 = sshll.u32 %s1307_s16, 2  ;;  %v2374_v0 = vmov 0.0   ;;  %vm500_vm0 = vcmask 64512   ;;  %vm1722_vm1 = vmmov 0   ;;  %vm1028_vm2 = vcmask 1043456  }
   0xc   : > { %p238_p3 = scmp.lt.s32.totalorder %s1312_s17, 7  ;;  %1556 = vmatprep.subr.bf16.mxu0 %v2374_v0  ;;  %1576 = vmatprep.subr.bf16.mxu1 %v2374_v0 }
   0xd   : > { %1572 = vmatprep.mubr.msk.bf16.mxu0 %vm1722_vm1, %v2374_v0  ;;  %1592 = vmatprep.mubr.msk.bf16.mxu1 %vm1722_vm1, %v2374_v0 }
   0xe   : > { %s2411_s17 = smov (!%p238_p3, %s1312_s17), 7 }
   0xf   : > { %s1762_s18 = sshll.u32 %s2411_s17, 2  ;;  %s1332_s19 = sshll.u32 %s2411_s17, 6 }
  0x10   : > { %s241_s22 = scalar_lea.vmem %s2369_s0, %s1762_s18  ;;  %s1772_s25 = scalar_lea.vmem %s2370_s1, %s1332_s19 }
  0x11   : > { %v1334_v1 = vld [vmem:[%s241_s22] sm:$0xff]   ;;  %v1479_v2 = vld [vmem:[%s241_s22 + $0x8] sm:$0xff]   ;;  %v1481_v14 = vld [vmem:[%s1772_s25 + $0x10] sm:$0xff]   ;;  %s2076_s28 = scalar_lea.vmem %s2372_s3, %s2411_s17  ;;  %s254_s5 = scalar_lea.vmem %s2371_s2, %s1762_s18 }
  0x12   : > { %v1342_v3 = vld [vmem:[%s1772_s25] sm:$0xff]   ;;  %v1775_v4 = vunpack.c.l.bf16 %v1334_v1  ;;  %v1777_v5 = vunpack.c.h.bf16 %v1334_v1  ;;  %v1779_v6 = vunpack.c.l.bf16 %v1479_v2  ;;  %v1781_v7 = vunpack.c.h.bf16 %v1479_v2  ;;  %v1480_v8 = vld [vmem:[%s1772_s25 + $0x8] sm:$0xff]   ;;  %v1482_v22 = vld [vmem:[%s1772_s25 + $0x18] sm:$0xff]   ;;  %s265_s8 = scalar_lea.vmem %s2373_s4, %s1762_s18 }
  0x13   : > { %v1784_v9 = vunpack.c.l.bf16 %v1342_v3  ;;  %v1790_v12 = vunpack.c.h.bf16 %v1342_v3  ;;  %v1792_v13 = vunpack.c.l.bf16 %v1480_v8  ;;  %v1799_v17 = vunpack.c.h.bf16 %v1480_v8  ;;  %v1483_v30 = vld [vmem:[%s1772_s25 + $0x20] sm:$0xff]   ;;  %v1488_v37 = vld [vmem:[%s1772_s25 + $0x48] sm:$0xff]   ;;  %v1489_v50 = vld [vmem:[%s1772_s25 + $0x50] sm:$0xff]  }
  0x14   : > { %2387 = vst [vmem:[#allocation2_spill] sm:$0xff] %v1779_v6  ;;  %2388 = vst [vmem:[#allocation3_spill] sm:$0xff] %v1781_v7  ;;  %v408_v10 = vmul.f32 %v1775_v4, %v1775_v4  ;;  %v410_v11 = vmul.f32 %v1779_v6, %v1779_v6  ;;  %v409_v15 = vmul.f32 %v1777_v5, %v1777_v5  ;;  %v1801_v18 = vunpack.c.l.bf16 %v1481_v14  ;;  %v1487_v35 = vld [vmem:[%s1772_s25 + $0x40] sm:$0xff]   ;;  %v1484_v42 = vld [vmem:[%s1772_s25 + $0x28] sm:$0xff]  }
  0x15   : > { %v411_v16 = vmul.f32 %v1781_v7, %v1781_v7  ;;  %v436_v19 = vmul.f32 %v1784_v9, %v1784_v9  ;;  %v437_v20 = vmul.f32 %v1790_v12, %v1790_v12  ;;  %v438_v21 = vmul.f32 %v1792_v13, %v1792_v13  ;;  %v1485_v52 = vld [vmem:[%s1772_s25 + $0x30] sm:$0xff]   ;;  %v1486_v53 = vld [vmem:[%s1772_s25 + $0x38] sm:$0xff]  }
  0x16   : > { %412 = vadd.xlane.f32.xlu0 %v408_v10  ;;  %416 = vadd.xlane.f32.xlu1 %v410_v11  ;;  %v1810_v23 = vunpack.c.h.bf16 %v1481_v14  ;;  %v439_v24 = vmul.f32 %v1799_v17, %v1799_v17  ;;  %v1815_v26 = vunpack.c.l.bf16 %v1482_v22  ;;  %v440_v27 = vmul.f32 %v1801_v18, %v1801_v18  ;;  %v1490_v11 = vld [vmem:[%s1772_s25 + $0x58] sm:$0xff]   ;;  %v1505_v0 = vld [vmem:[%s1772_s25 + $0xd0] sm:$0xff]  }
  0x17   : > { %v501_v25 = vsel %vm500_vm0, %v436_v19, 0.0  ;;  %v502_v28 = vsel %vm500_vm0, %v437_v20, 0.0  ;;  %v504_v29 = vsel %vm500_vm0, %v438_v21, 0.0  ;;  %v1822_v32 = vunpack.c.h.bf16 %v1482_v22 }
  0x18   : > { %v503_v31 = vadd.f32 %v502_v28, %v501_v25  ;;  %v441_v33 = vmul.f32 %v1810_v23, %v1810_v23  ;;  %v506_v34 = vsel %vm500_vm0, %v439_v24, 0.0  ;;  %v1829_v38 = vunpack.c.l.bf16 %v1483_v30 }
  0x19   : > { %v442_v39 = vmul.f32 %v1815_v26, %v1815_v26  ;;  %v508_v40 = vsel %vm500_vm0, %v440_v27, 0.0  ;;  %v1834_v41 = vunpack.c.h.bf16 %v1483_v30  ;;  %v1837_v44 = vunpack.c.l.bf16 %v1487_v35 }
  0x1a   : > { %414 = vadd.xlane.f32.xlu0 %v409_v15  ;;  %418 = vadd.xlane.f32.xlu1 %v411_v16  ;;  %v505_v36 = vadd.f32 %v504_v29, %v503_v31  ;;  %v443_v45 = vmul.f32 %v1822_v32, %v1822_v32  ;;  %v510_v46 = vsel %vm500_vm0, %v441_v33, 0.0  ;;  %v1842_v47 = vunpack.c.h.bf16 %v1487_v35 }
  0x1b   : > { %v1844_v48 = vunpack.c.l.bf16 %v1488_v37  ;;  %v1847_v51 = vunpack.c.l.bf16 %v1484_v42  ;;  %v444_v54 = vmul.f32 %v1829_v38, %v1829_v38  ;;  %v512_v55 = vsel %vm500_vm0, %v442_v39, 0.0 }
  0x1c   : > { %v507_v43 = vadd.f32 %v506_v34, %v505_v36  ;;  %v1854_v56 = vunpack.c.h.bf16 %v1488_v37  ;;  %v1856_v57 = vunpack.c.h.bf16 %v1484_v42  ;;  %v445_v58 = vmul.f32 %v1834_v41, %v1834_v41  ;;  %v1491_v34 = vld [vmem:[%s1772_s25 + $0x60] sm:$0xff]  }
  0x1d   : > { %v452_v60 = vmul.f32 %v1837_v44, %v1837_v44  ;;  %v514_v61 = vsel %vm500_vm0, %v443_v45, 0.0  ;;  %v1863_v62 = vunpack.c.l.bf16 %v1489_v50  ;;  %v453_v63 = vmul.f32 %v1842_v47, %v1842_v47 }
  0x1e   : > { %v509_v49 = vadd.f32 %v508_v40, %v507_v43  ;;  %v454_v1 = vmul.f32 %v1844_v48, %v1844_v48  ;;  %v1869_v2 = vunpack.c.l.bf16 %v1485_v52  ;;  %v1871_v3 = vunpack.c.h.bf16 %v1485_v52 }
  0x1f   : > { %v1873_v8 = vunpack.c.l.bf16 %v1486_v53  ;;  %v446_v14 = vmul.f32 %v1847_v51, %v1847_v51  ;;  %v516_v15 = vsel %vm500_vm0, %v444_v54, 0.0  ;;  %v1879_v16 = vunpack.c.h.bf16 %v1489_v50 }
  0x20   : > { %v511_v59 = vadd.f32 %v510_v46, %v509_v49  ;;  %v455_v19 = vmul.f32 %v1854_v56, %v1854_v56  ;;  %v447_v20 = vmul.f32 %v1856_v57, %v1856_v57  ;;  %v518_v22 = vsel %vm500_vm0, %v445_v58, 0.0 }
  0x21   : > { %v538_v24 = vsel %vm500_vm0, %v452_v60, 0.0  ;;  %v1887_v25 = vunpack.c.l.bf16 %v1490_v11  ;;  %v456_v27 = vmul.f32 %v1863_v62, %v1863_v62  ;;  %v539_v28 = vsel %vm500_vm0, %v453_v63, 0.0 }
  0x22   : > { %v513_v10 = vadd.f32 %v512_v55, %v511_v59  ;;  %v541_v29 = vsel %vm500_vm0, %v454_v1, 0.0  ;;  %v1893_v30 = vunpack.c.h.bf16 %v1486_v53  ;;  %v448_v31 = vmul.f32 %v1869_v2, %v1869_v2  ;;  %v1492_v55 = vld [vmem:[%s1772_s25 + $0x68] sm:$0xff]  }
  0x23   : > { %v540_v35 = vadd.f32 %v539_v28, %v538_v24  ;;  %v520_v36 = vsel %vm500_vm0, %v446_v14, 0.0  ;;  %v1899_v37 = vunpack.c.h.bf16 %v1490_v11  ;;  %v457_v39 = vmul.f32 %v1879_v16, %v1879_v16 }
  0x24   : > { %v515_v21 = vadd.f32 %v514_v61, %v513_v10  ;;  %v543_v40 = vsel %vm500_vm0, %v455_v19, 0.0  ;;  %v449_v42 = vmul.f32 %v1871_v3, %v1871_v3  ;;  %v522_v45 = vsel %vm500_vm0, %v447_v20, 0.0 }
  0x25   : > { %v542_v46 = vadd.f32 %v541_v29, %v540_v35  ;;  %v1907_v49 = vunpack.c.l.bf16 %v1491_v34  ;;  %v458_v50 = vmul.f32 %v1887_v25, %v1887_v25  ;;  %v545_v52 = vsel %vm500_vm0, %v456_v27, 0.0 }
  0x26   : > { %v517_v33 = vadd.f32 %v516_v15, %v515_v21  ;;  %v450_v53 = vmul.f32 %v1873_v8, %v1873_v8  ;;  %v524_v59 = vsel %vm500_vm0, %v448_v31, 0.0  ;;  %v1920_v60 = vunpack.c.h.bf16 %v1491_v34 }
  0x27   : > { %v544_v58 = vadd.f32 %v543_v40, %v542_v46  ;;  %v459_v61 = vmul.f32 %v1899_v37, %v1899_v37  ;;  %v547_v63 = vsel %vm500_vm0, %v457_v39, 0.0  ;;  %v451_v1 = vmul.f32 %v1893_v30, %v1893_v30  ;;  %v1494_v39 = vld [vmem:[%s1772_s25 + $0x78] sm:$0xff]   ;;  %v1495_v46 = vld [vmem:[%s1772_s25 + $0x80] sm:$0xff]  }
  0x28   : > { %v519_v43 = vadd.f32 %v518_v22, %v517_v33  ;;  %v526_v14 = vsel %vm500_vm0, %v449_v42, 0.0  ;;  %v1928_v15 = vunpack.c.l.bf16 %v1492_v55  ;;  %v460_v19 = vmul.f32 %v1907_v49, %v1907_v49  ;;  %v1493_v22 = vld [vmem:[%s1772_s25 + $0x70] sm:$0xff]  }
  0x29   : > { %v546_v11 = vadd.f32 %v545_v52, %v544_v58  ;;  %v549_v20 = vsel %vm500_vm0, %v458_v50, 0.0  ;;  %v528_v27 = vsel %vm500_vm0, %v450_v53, 0.0  ;;  %v1935_v28 = vunpack.c.h.bf16 %v1492_v55 }
  0x2a   : > { %v521_v54 = vadd.f32 %v520_v36, %v519_v43  ;;  %v461_v29 = vmul.f32 %v1920_v60, %v1920_v60  ;;  %v551_v31 = vsel %vm500_vm0, %v459_v61, 0.0  ;;  %v530_v35 = vsel %vm500_vm0, %v451_v1, 0.0 }
  0x2b   : > { %v548_v24 = vadd.f32 %v547_v63, %v546_v11  ;;  %v1941_v36 = vunpack.c.l.bf16 %v1493_v22  ;;  %v462_v40 = vmul.f32 %v1928_v15, %v1928_v15  ;;  %v553_v42 = vsel %vm500_vm0, %v460_v19, 0.0 }
  0x2c   : > { %v523_v10 = vadd.f32 %v522_v45, %v521_v54  ;;  %v1948_v50 = vunpack.c.h.bf16 %v1493_v22  ;;  %v463_v52 = vmul.f32 %v1935_v28, %v1935_v28  ;;  %v555_v53 = vsel %vm500_vm0, %v461_v29, 0.0 }
  0x2d   : > { %v550_v34 = vadd.f32 %v549_v20, %v548_v24  ;;  %v1953_v55 = vunpack.c.l.bf16 %v1494_v39  ;;  %v557_v61 = vsel %vm500_vm0, %v462_v40, 0.0  ;;  %v1958_v63 = vunpack.c.l.bf16 %v1495_v46 }
  0x2e   : > { %v525_v21 = vadd.f32 %v524_v59, %v523_v10  ;;  %v464_v59 = vmul.f32 %v1941_v36, %v1941_v36  ;;  %v1960_v1 = vunpack.c.h.bf16 %v1495_v46  ;;  %v1963_v19 = vunpack.c.h.bf16 %v1494_v39 }
  0x2f   : > { %v552_v45 = vadd.f32 %v551_v31, %v550_v34  ;;  %2389 = vst [vmem:[#allocation4_spill] sm:$0xff] %v1958_v63  ;;  %v465_v20 = vmul.f32 %v1948_v50, %v1948_v50  ;;  %v466_v24 = vmul.f32 %v1953_v55, %v1953_v55 }
  0x30   : > { %v527_v33 = vadd.f32 %v526_v14, %v525_v21  ;;  %2390 = vst [vmem:[#allocation5_spill] sm:$0xff] %v1960_v1  ;;  %v1496_v14 = vld [vmem:[%s1772_s25 + $0x88] sm:$0xff]   ;;  %v559_v21 = vsel %vm500_vm0, %v463_v52, 0.0  ;;  %v561_v29 = vsel %vm500_vm0, %v464_v59, 0.0  ;;  %v469_v34 = vmul.f32 %v1960_v1, %v1960_v1  ;;  %v1503_v52 = vld [vmem:[%s1772_s25 + $0xc0] sm:$0xff]   ;;  %v1506_v1 = vld [vmem:[%s1772_s25 + $0xd8] sm:$0xff]  }
  0x31   : > { %v554_v58 = vadd.f32 %v553_v42, %v552_v45  ;;  %v1971_v31 = vunpack.c.l.bf16 %v1496_v14  ;;  %v467_v40 = vmul.f32 %v1963_v19, %v1963_v19  ;;  %v563_v42 = vsel %vm500_vm0, %v465_v20, 0.0 }
  0x32   : > { %v529_v43 = vadd.f32 %v528_v27, %v527_v33  ;;  %v468_v33 = vmul.f32 %v1958_v63, %v1958_v63  ;;  %v565_v46 = vsel %vm500_vm0, %v466_v24, 0.0  ;;  %v576_v59 = vsel %vm500_vm0, %v469_v34, 0.0 }
  0x33   : > { %v556_v11 = vadd.f32 %v555_v53, %v554_v58  ;;  %v1982_v53 = vunpack.c.h.bf16 %v1496_v14  ;;  %v567_v20 = vsel %vm500_vm0, %v467_v40, 0.0  ;;  %v1993_v24 = vunpack.c.h.bf16 %v1503_v52 }
  0x34   : > { %v531_v54 = vadd.f32 %v530_v35, %v529_v43  ;;  %v575_v58 = vsel %vm500_vm0, %v468_v33, 0.0 }
  0x35   : > { %v558_v27 = vadd.f32 %v557_v61, %v556_v11  ;;  %2391 = vst [vmem:[#allocation6_spill] sm:$0xff] %v1982_v53  ;;  %v1504_v61 = vld [vmem:[%s1772_s25 + $0xc8] sm:$0xff]   ;;  %2393 = vst [vmem:[#allocation8_spill] sm:$0xff] %v1993_v24  ;;  %v471_v34 = vmul.f32 %v1982_v53, %v1982_v53  ;;  %v1499_v53 = vld [vmem:[%s1772_s25 + $0xa0] sm:$0xff]  }
  0x36   : > { %v532_v10 = vrot.slane %v531_v54, 4 }
  0x37   : > { %v560_v39 = vadd.f32 %v559_v21, %v558_v27  ;;  %v1497_v21 = vld [vmem:[%s1772_s25 + $0x90] sm:$0xff]  }
  0x38   : > { %v533_v22 = vadd.f32 %v532_v10, %v531_v54  ;;  %v470_v54 = vmul.f32 %v1971_v31, %v1971_v31  ;;  %v1997_v33 = vunpack.c.l.bf16 %v1497_v21 }
  0x39   : > { %v562_v45 = vadd.f32 %v561_v29, %v560_v39  ;;  %v577_v29 = vadd.f32 %v576_v59, %v575_v58  ;;  %v1498_v59 = vld [vmem:[%s1772_s25 + $0x98] sm:$0xff]  }
  0x3a   : > { %v534_v35 = vrot.slane %v533_v22, 2  ;;  %v578_v39 = vsel %vm500_vm0, %v470_v54, 0.0 }
  0x3b   : > { %v564_v11 = vadd.f32 %v563_v42, %v562_v45  ;;  %v2002_v42 = vunpack.c.h.bf16 %v1504_v61 }
  0x3c   : > { %v535_v43 = vadd.f32 %v534_v35, %v533_v22  ;;  %v1991_v22 = vunpack.c.l.bf16 %v1503_v52  ;;  %v1995_v35 = vunpack.c.l.bf16 %v1504_v61  ;;  %v2005_v52 = vunpack.c.h.bf16 %v1497_v21 }
  0x3d   : > { %v566_v27 = vadd.f32 %v565_v46, %v564_v11  ;;  %2395 = vst [vmem:[#allocation10_spill] sm:$0xff] %v2002_v42  ;;  %v485_v46 = vmul.f32 %v1993_v24, %v1993_v24  ;;  %v472_v61 = vmul.f32 %v1997_v33, %v1997_v33  ;;  %v580_v11 = vsel %vm500_vm0, %v471_v34, 0.0 }
  0x3e   : > { %v536_v10 = vrot.slane %v535_v43, 1  ;;  %2392 = vst [vmem:[#allocation7_spill] sm:$0xff] %v1991_v22  ;;  %2394 = vst [vmem:[#allocation9_spill] sm:$0xff] %v1995_v35  ;;  %v486_v54 = vmul.f32 %v1995_v35, %v1995_v35  ;;  %v2017_v21 = vunpack.c.l.bf16 %v1505_v0  ;;  %v2029_v35 = vunpack.c.h.bf16 %v1505_v0 }
  0x3f   : > { %v568_v45 = vadd.f32 %v567_v20, %v566_v27  ;;  %v487_v20 = vmul.f32 %v2002_v42, %v2002_v42  ;;  %v2021_v27 = vunpack.c.l.bf16 %v1498_v59  ;;  %v582_v6 = vsel %vm500_vm0, %v472_v61, 0.0 }
  0x40   : > { %v537_v14 = vadd.f32 %v536_v10, %v535_v43  ;;  %v484_v43 = vmul.f32 %v1991_v22, %v1991_v22  ;;  %v579_v10 = vadd.f32 %v578_v39, %v577_v29  ;;  %2396 = vst [vmem:[#allocation11_spill] sm:$0xff] %v2017_v21  ;;  %v473_v29 = vmul.f32 %v2005_v52, %v2005_v52 }
  0x41   : > { %v569_v58 = vrot.slane %v568_v45, 4  ;;  %v615_v22 = vsel %vm500_vm0, %v486_v54, 0.0  ;;  %2397 = vst [vmem:[#allocation12_spill] sm:$0xff] %v2029_v35  ;;  %v2041_v61 = vunpack.c.l.bf16 %v1506_v1 }
  0x42   : > { %v649_v40 = vmax.f32 %v537_v14, 1e-24  ;;  %v612_v39 = vsel %vm500_vm0, %v484_v43, 0.0  ;;  %v581_v24 = vadd.f32 %v580_v11, %v579_v10  ;;  %v2035_v43 = vunpack.c.h.bf16 %v1498_v59 }
  0x43   : > { %v570_v14 = vadd.f32 %v569_v58, %v568_v45  ;;  %v488_v45 = vmul.f32 %v2017_v21, %v2017_v21  ;;  %v617_v58 = vsel %vm500_vm0, %v487_v20, 0.0  ;;  %v474_v10 = vmul.f32 %v2021_v27, %v2021_v27 }
  0x44   : > { %1673 = vrsqrt.f32 %v649_v40  ;;  %v613_v40 = vsel %vm500_vm0, %v485_v46, 0.0  ;;  %v583_v54 = vadd.f32 %v582_v6, %v581_v24  ;;  %v584_v0 = vsel %vm500_vm0, %v473_v29, 0.0 }
  0x45   : > { %v571_v7 = vrot.slane %v570_v14, 2  ;;  %v614_v34 = vadd.f32 %v613_v40, %v612_v39  ;;  %v489_v39 = vmul.f32 %v2029_v35, %v2029_v35  ;;  %v2046_v59 = vunpack.c.l.bf16 %v1499_v53  ;;  %v1323_v35 = vld [vmem:[%s2076_s28 + $0x1] ss:$0 sm:$0xff] }
  0x46   : > { %v585_v6 = vadd.f32 %v584_v0, %v583_v54  ;;  %v586_v29 = vsel %vm500_vm0, %v474_v10, 0.0  ;;  %v2053_v40 = vunpack.c.h.bf16 %v1506_v1  ;;  %v1507_v54 = vld [vmem:[%s1772_s25 + $0xe0] sm:$0xff]   ;;  %v2067_v1 = vunpack.c.h.bf16 %v1499_v53  ;;  %v1500_v0 = vld [vmem:[%s1772_s25 + $0xa8] sm:$0xff]  }
  0x47   : > { %v572_v42 = vadd.f32 %v571_v7, %v570_v14  ;;  %v616_v63 = vadd.f32 %v615_v22, %v614_v34  ;;  %v619_v7 = vsel %vm500_vm0, %v488_v45, 0.0  ;;  %v475_v14 = vmul.f32 %v2035_v43, %v2035_v43 }
  0x48   : > { %v490_v34 = vmul.f32 %v2041_v61, %v2041_v61 }
  0x49   : > { %v573_v46 = vrot.slane %v572_v42, 1  ;;  %v618_v11 = vadd.f32 %v617_v58, %v616_v63 }
  0x4a   : > { %v623_v53 = vsel %vm500_vm0, %v490_v34, 0.0  ;;  %v477_v34 = vmul.f32 %v2067_v1, %v2067_v1 }
  0x4b   : > { %v574_v22 = vadd.f32 %v573_v46, %v572_v42  ;;  %v620_v63 = vadd.f32 %v619_v7, %v618_v11  ;;  %v621_v42 = vsel %vm500_vm0, %v489_v39, 0.0  ;;  %v476_v39 = vmul.f32 %v2046_v59, %v2046_v59 }
  0x4c   : > { %v587_v7 = vadd.f32 %v586_v29, %v585_v6  ;;  %v2089_v29 = vunpack.c.l.bf16 %v1500_v0 }
  0x4d   : > { %v650_v20 = vmax.f32 %v574_v22, 1e-24 }
  0x4f   : > { %1675 = vrsqrt.f32 %v650_v20 }
  0x51   : > { %v2050_v24 = vpop.eup %1673 }
  0x52   : > { %v671_v45 = vmul.f32 %v2050_v24, %v1873_v8  ;;  %v672_v58 = vmul.f32 %v2050_v24, %v1893_v30  ;;  %v669_v46 = vmul.f32 %v2050_v24, %v1869_v2  ;;  %v670_v10 = vmul.f32 %v2050_v24, %v1871_v3 }
  0x53   : > { %v622_v8 = vadd.f32 %v621_v42, %v620_v63  ;;  %v588_v2 = vsel %vm500_vm0, %v475_v14, 0.0  ;;  %v2079_v3 = vunpack.c.l.bf16 %v1507_v54  ;;  %v491_v30 = vmul.f32 %v2053_v40, %v2053_v40  ;;  %v1322_v14 = vld [vmem:[%s2076_s28] ss:$0 sm:$0xff] }
  0x54   : > { %v728_v11 = vpack.c.bf16 %v672_v58, %v671_v45  ;;  %v727_v22 = vpack.c.bf16 %v670_v10, %v669_v46  ;;  %v667_v20 = vmul.f32 %v2050_v24, %v1847_v51  ;;  %v668_v6 = vmul.f32 %v2050_v24, %v1856_v57  ;;  %v1508_v51 = vld [vmem:[%s1772_s25 + $0xe8] sm:$0xff]  }
  0x55   : > { %v2398_v63 = vmov 0.0   ;;  %v589_v42 = vadd.f32 %v588_v2, %v587_v7  ;;  %v2092_v45 = vunpack.c.h.bf16 %v1507_v54  ;;  %v624_v58 = vadd.f32 %v623_v53, %v622_v8 }
  0x56   : > { %1557 = vmatpush3.bf16.msra.mxu0 %v728_v11  ;;  %v590_v46 = vsel %vm500_vm0, %v476_v39, 0.0  ;;  %v492_v57 = vmul.f32 %v2079_v3, %v2079_v3  ;;  %v625_v10 = vsel %vm500_vm0, %v491_v30, 0.0  ;;  %v1723_v11 = vmov 0   ;;  %v1501_v30 = vld [vmem:[%s1772_s25 + $0xb0] sm:$0xff]  }
  0x57   : > { %1558 = vmatprep.subr.bf16.mxu0 %v2398_v63  ;;  %1671 = vset.pattern.permute.xlu0 %v1723_v11  ;;  %v726_v54 = vpack.c.bf16 %v668_v6, %v667_v20  ;;  %v665_v7 = vmul.f32 %v2050_v24, %v1829_v38  ;;  %v666_v8 = vmul.f32 %v2050_v24, %v1834_v41  ;;  %v2107_v39 = vunpack.c.h.bf16 %v1500_v0  ;;  %v1324_v20 = vld [vmem:[%s2076_s28 + $0x2] ss:$0 sm:$0xff] }
  0x58   : > { %1672 = vset.pattern.permute.xlu1 %v1723_v11  ;;  %934 = vperm.xlu0 %1671, %v1322_v14   ;;  %v478_v2 = vmul.f32 %v2089_v29, %v2089_v29  ;;  %v591_v53 = vadd.f32 %v590_v46, %v589_v42  ;;  %v2112_v11 = vunpack.c.l.bf16 %v1508_v51  ;;  %v626_v38 = vadd.f32 %v625_v10, %v624_v58 }
  0x59   : > { %938 = vperm.xlu1 %1672, %v1323_v35   ;;  %v592_v41 = vsel %vm500_vm0, %v477_v34, 0.0  ;;  %v627_v6 = vsel %vm500_vm0, %v492_v57, 0.0  ;;  %v725_v0 = vpack.c.bf16 %v666_v8, %v665_v7  ;;  %v663_v14 = vmul.f32 %v2050_v24, %v1815_v26 }
  0x5a   : > { %1559 = vmatpush3.bf16.msra.mxu0 %v727_v22  ;;  %v493_v22 = vmul.f32 %v2092_v45, %v2092_v45  ;;  %v664_v35 = vmul.f32 %v2050_v24, %v1822_v32  ;;  %v2124_v42 = vunpack.c.l.bf16 %v1501_v30  ;;  %v479_v58 = vmul.f32 %v2107_v39, %v2107_v39 }
  0x5b   : > { %1560 = vmatprep.subr.bf16.mxu0 %v2398_v63  ;;  %v594_v34 = vsel %vm500_vm0, %v478_v2, 0.0  ;;  %v2129_v46 = vunpack.c.h.bf16 %v1508_v51  ;;  %v593_v26 = vadd.f32 %v592_v41, %v591_v53  ;;  %v494_v32 = vmul.f32 %v2112_v11, %v2112_v11  ;;  %v1509_v53 = vld [vmem:[%s1772_s25 + $0xf0] sm:$0xff]  }
  0x5c   : > { %v2131_v57 = vpop.eup %1675  ;;  %v628_v10 = vadd.f32 %v627_v6, %v626_v38  ;;  %v724_v41 = vpack.c.bf16 %v664_v35, %v663_v14  ;;  %v662_v38 = vmul.f32 %v2050_v24, %v1810_v23  ;;  %v1502_v6 = vld [vmem:[%s1772_s25 + $0xb8] sm:$0xff]  }
  0x5d   : > { %942 = vperm.xlu1 %1672, %v1324_v20   ;;  %v687_v7 = vmul.f32 %v2131_v57, %v1953_v55  ;;  %v688_v8 = vmul.f32 %v2131_v57, %v1963_v19  ;;  %v685_v51 = vmul.f32 %v2131_v57, %v1941_v36  ;;  %v686_v2 = vmul.f32 %v2131_v57, %v1948_v50  ;;  %v1325_v20 = vld [vmem:[%s2076_s28 + $0x3] ss:$0 sm:$0xff] }
  0x5e   : > { %1561 = vmatpush3.bf16.msra.mxu0 %v726_v54  ;;  %v629_v54 = vsel %vm500_vm0, %v493_v22, 0.0  ;;  %v661_v22 = vmul.f32 %v2050_v24, %v1801_v18  ;;  %v2151_v19 = vunpack.c.h.bf16 %v1501_v30  ;;  %v480_v36 = vmul.f32 %v2124_v42, %v2124_v42 }
  0x5f   : > { %1562 = vmatprep.subr.bf16.mxu0 %v2398_v63  ;;  %v736_v55 = vpack.c.bf16 %v688_v8, %v687_v7  ;;  %v596_v50 = vsel %vm500_vm0, %v479_v58, 0.0  ;;  %v595_v21 = vadd.f32 %v594_v34, %v593_v26  ;;  %v495_v18 = vmul.f32 %v2129_v46, %v2129_v46 }
  0x60   : > { %v630_v14 = vadd.f32 %v629_v54, %v628_v10  ;;  %v735_v23 = vpack.c.bf16 %v686_v2, %v685_v51  ;;  %v683_v30 = vmul.f32 %v2131_v57, %v1928_v15  ;;  %v684_v35 = vmul.f32 %v2131_v57, %v1935_v28 }
  0x61   : > { %946 = vperm.xlu1 %1672, %v1325_v20   ;;  %1577 = vmatpush3.bf16.msra.mxu1 %v736_v55  ;;  %v631_v7 = vsel %vm500_vm0, %v494_v32, 0.0  ;;  %v723_v58 = vpack.c.bf16 %v662_v38, %v661_v22  ;;  %v659_v34 = vmul.f32 %v2050_v24, %v1792_v13  ;;  %v660_v26 = vmul.f32 %v2050_v24, %v1799_v17  ;;  %v1510_v20 = vld [vmem:[%s1772_s25 + $0xf8] sm:$0xff]  }
  0x62   : > { %1563 = vmatpush3.bf16.msra.mxu0 %v725_v0  ;;  %v2157_v0 = vunpack.c.l.bf16 %v1509_v53  ;;  %1578 = vmatprep.subr.bf16.mxu1 %v2398_v63  ;;  %v2172_v10 = vunpack.c.l.bf16 %v1502_v6  ;;  %v481_v15 = vmul.f32 %v2151_v19, %v2151_v19  ;;  %v598_v28 = vsel %vm500_vm0, %v480_v36, 0.0 }
  0x63   : > { %1564 = vmatprep.subr.bf16.mxu0 %v2398_v63  ;;  %v597_v32 = vadd.f32 %v596_v50, %v595_v21  ;;  %v2177_v54 = vunpack.c.h.bf16 %v1509_v53  ;;  %v632_v51 = vadd.f32 %v631_v7, %v630_v14  ;;  %v734_v13 = vpack.c.bf16 %v684_v35, %v683_v30 }
  0x64   : > { %v496_v8 = vmul.f32 %v2157_v0, %v2157_v0  ;;  %v681_v17 = vmul.f32 %v2131_v57, %v1907_v49  ;;  %v682_v2 = vmul.f32 %v2131_v57, %v1920_v60  ;;  %v722_v21 = vpack.c.bf16 %v660_v26, %v659_v34 }
  0x65   : > { %1579 = vmatpush3.bf16.msra.mxu1 %v735_v23  ;;  %v657_v53 = vmul.f32 %v2050_v24, %v1784_v9  ;;  %v658_v22 = vmul.f32 %v2050_v24, %v1790_v12  ;;  %v2193_v38 = vunpack.c.h.bf16 %v1502_v6  ;;  %v482_v49 = vmul.f32 %v2172_v10, %v2172_v10 }
  0x66   : > { %1565 = vmatpush3.bf16.msra.mxu0 %v724_v41  ;;  %v633_v41 = vsel %vm500_vm0, %v495_v18, 0.0  ;;  %1580 = vmatprep.subr.bf16.mxu1 %v2398_v63  ;;  %v600_v60 = vsel %vm500_vm0, %v481_v15, 0.0  ;;  %v599_v55 = vadd.f32 %v598_v28, %v597_v32  ;;  %v2198_v36 = vunpack.c.l.bf16 %v1510_v20 }
  0x67   : > { %1566 = vmatprep.subr.bf16.mxu0 %v2398_v63  ;;  %v497_v50 = vmul.f32 %v2177_v54, %v2177_v54  ;;  %v634_v18 = vadd.f32 %v633_v41, %v632_v51  ;;  %v733_v9 = vpack.c.bf16 %v682_v2, %v681_v17  ;;  %v679_v12 = vmul.f32 %v2131_v57, %v1887_v25 }
  0x68   : > { %v680_v24 = vmul.f32 %v2131_v57, %v1899_v37  ;;  %v635_v6 = vsel %vm500_vm0, %v496_v8, 0.0  ;;  %v721_v14 = vpack.c.bf16 %v658_v22, %v657_v53  ;;  %v483_v23 = vmul.f32 %v2193_v38, %v2193_v38 }
  0x69   : > { %1581 = vmatpush3.bf16.msra.mxu1 %v734_v13  ;;  %v602_v30 = vsel %vm500_vm0, %v482_v49, 0.0  ;;  %v601_v35 = vadd.f32 %v600_v60, %v599_v55  ;;  %v2212_v7 = vunpack.c.h.bf16 %v1510_v20  ;;  %v498_v25 = vmul.f32 %v2198_v36, %v2198_v36 }
  0x6a   : > { %1567 = vmatpush3.bf16.msra.mxu0 %v723_v58  ;;  %1582 = vmatprep.subr.bf16.mxu1 %v2398_v63  ;;  %v636_v37 = vadd.f32 %v635_v6, %v634_v18  ;;  %v732_v58 = vpack.c.bf16 %v680_v24, %v679_v12  ;;  %v677_v34 = vmul.f32 %v2131_v57, %v1863_v62  ;;  %v637_v15 = vsel %vm500_vm0, %v497_v50, 0.0 }
  0x6b   : > { %1568 = vmatprep.subr.bf16.mxu0 %v2398_v63  ;;  %v678_v26 = vmul.f32 %v2131_v57, %v1879_v16  ;;  %v603_v28 = vadd.f32 %v602_v30, %v601_v35  ;;  %v604_v32 = vsel %vm500_vm0, %v483_v23, 0.0  ;;  %v499_v8 = vmul.f32 %v2212_v7, %v2212_v7 }
  0x6c   : > { %v638_v51 = vadd.f32 %v637_v15, %v636_v37  ;;  %v675_v62 = vmul.f32 %v2131_v57, %v1844_v48  ;;  %v676_v16 = vmul.f32 %v2131_v57, %v1854_v56  ;;  %v639_v17 = vsel %vm500_vm0, %v498_v25, 0.0 }
  0x6d   : > { %1583 = vmatpush3.bf16.msra.mxu1 %v733_v9  ;;  %v731_v13 = vpack.c.bf16 %v678_v26, %v677_v34  ;;  %v605_v2 = vadd.f32 %v604_v32, %v603_v28  ;;  %v674_v53 = vmul.f32 %v2131_v57, %v1842_v47  ;;  %v641_v22 = vsel %vm500_vm0, %v499_v8, 0.0 }
  0x6e   : > { %1569 = vmatpush3.bf16.msra.mxu0 %v722_v21  ;;  %1584 = vmatprep.subr.bf16.mxu1 %v2398_v63  ;;  %v640_v20 = vadd.f32 %v639_v17, %v638_v51  ;;  %v730_v41 = vpack.c.bf16 %v676_v16, %v675_v62  ;;  %v673_v21 = vmul.f32 %v2131_v57, %v1837_v44 }
  0x6f   : > { %1570 = vmatprep.subr.bf16.mxu0 %v2398_v63  ;;  %v606_v48 = vrot.slane %v605_v2, 4 }
  0x70   : > { %v642_v56 = vadd.f32 %v641_v22, %v640_v20  ;;  %v729_v49 = vpack.c.bf16 %v674_v53, %v673_v21 }
  0x71   : > { %1585 = vmatpush3.bf16.msra.mxu1 %v732_v58  ;;  %v607_v60 = vadd.f32 %v606_v48, %v605_v2 }
  0x72   : > { %1571 = vmatpush3.bf16.msra.mxu0 %v721_v14  ;;  %1586 = vmatprep.subr.bf16.mxu1 %v2398_v63  ;;  %v643_v55 = vrot.slane %v642_v56, 4 }
  0x73   : > { %1596 = vmatprep.subr.bf16.mxu0 %v2398_v63  ;;  %v608_v50 = vrot.slane %v607_v60, 2 }
  0x74   : > { %v644_v44 = vadd.f32 %v643_v55, %v642_v56 }
  0x75   : > { %1587 = vmatpush3.bf16.msra.mxu1 %v731_v13  ;;  %v609_v18 = vadd.f32 %v608_v50, %v607_v60 }
  0x76   : > { %1588 = vmatprep.subr.bf16.mxu1 %v2398_v63  ;;  %v645_v9 = vrot.slane %v644_v44, 2 }
  0x77   : > { %v610_v47 = vrot.slane %v609_v18, 1 }
  0x78   : > { %v646_v57 = vadd.f32 %v645_v9, %v644_v44  ;;  %v2399_v44 = vld [vmem:[#allocation6_spill] sm:$0xff]  ;;  %v2400_v9 = vld [vmem:[#allocation11_spill] sm:$0xff] }
  0x79   : > { %1589 = vmatpush3.bf16.msra.mxu1 %v730_v41  ;;  %v611_v12 = vadd.f32 %v610_v47, %v609_v18  ;;  %v2401_v47 = vld [vmem:[#allocation12_spill] sm:$0xff] }
  0x7a   : > { %1590 = vmatprep.subr.bf16.mxu1 %v2398_v63  ;;  %v647_v24 = vrot.slane %v646_v57, 1 }
  0x7b   : > { %v651_v6 = vmax.f32 %v611_v12, 1e-24  ;;  %v2402_v12 = vld [vmem:[#allocation4_spill] sm:$0xff] }
  0x7c   : > { %v648_v14 = vadd.f32 %v647_v24, %v646_v57  ;;  %v2403_v24 = vld [vmem:[#allocation5_spill] sm:$0xff] }
  0x7d   : > { %1591 = vmatpush3.bf16.msra.mxu1 %v729_v49  ;;  %1677 = vrsqrt.f32 %v651_v6 }
  0x7e   : > { %1616 = vmatprep.subr.bf16.mxu1 %v2398_v63  ;;  %v652_v23 = vmax.f32 %v648_v14, 1e-24 }
  0x80   : > { %1679 = vrsqrt.f32 %v652_v23 }
  0x8a   : > { %v2240_v58 = vpop.eup %1677 }
  0x8b   : > { %v703_v34 = vmul.f32 %v2240_v58, %v2172_v10  ;;  %v704_v26 = vmul.f32 %v2240_v58, %v2193_v38  ;;  %v701_v8 = vmul.f32 %v2240_v58, %v2124_v42  ;;  %v702_v51 = vmul.f32 %v2240_v58, %v2151_v19 }
  0x8c   : > { %v699_v42 = vmul.f32 %v2240_v58, %v2089_v29  ;;  %v700_v19 = vmul.f32 %v2240_v58, %v2107_v39  ;;  %v697_v39 = vmul.f32 %v2240_v58, %v2046_v59  ;;  %v698_v21 = vmul.f32 %v2240_v58, %v2067_v1 }
  0x8d   : > { %v2246_v15 = vpop.eup %1679  ;;  %v744_v13 = vpack.c.bf16 %v704_v26, %v703_v34  ;;  %v695_v59 = vmul.f32 %v2240_v58, %v2021_v27  ;;  %v693_v60 = vmul.f32 %v2240_v58, %v1997_v33  ;;  %v691_v33 = vmul.f32 %v2240_v58, %v1971_v31  ;;  %v2406_v26 = vld [vmem:[#allocation2_spill] sm:$0xff] }
  0x8e   : > { %v719_v62 = vmul.f32 %v2246_v15, %v2198_v36  ;;  %v720_v10 = vmul.f32 %v2246_v15, %v2212_v7  ;;  %v717_v36 = vmul.f32 %v2246_v15, %v2157_v0  ;;  %v718_v7 = vmul.f32 %v2246_v15, %v2177_v54 }
  0x8f   : > { %v742_v41 = vpack.c.bf16 %v700_v19, %v699_v42  ;;  %v715_v54 = vmul.f32 %v2246_v15, %v2112_v11  ;;  %v716_v53 = vmul.f32 %v2246_v15, %v2129_v46  ;;  %v741_v1 = vpack.c.bf16 %v698_v21, %v697_v39 }
  0x90   : > { %v752_v20 = vpack.c.bf16 %v720_v10, %v719_v62  ;;  %v751_v0 = vpack.c.bf16 %v718_v7, %v717_v36  ;;  %v696_v11 = vmul.f32 %v2240_v58, %v2035_v43  ;;  %v713_v56 = vmul.f32 %v2246_v15, %v2079_v3 }
  0x91   : > { %v750_v46 = vpack.c.bf16 %v716_v53, %v715_v54  ;;  %v714_v49 = vmul.f32 %v2246_v15, %v2092_v45  ;;  %v694_v43 = vmul.f32 %v2240_v58, %v2005_v52  ;;  %v711_v3 = vmul.f32 %v2246_v15, %v2041_v61 }
  0x92   : > { %v740_v27 = vpack.c.bf16 %v696_v11, %v695_v59  ;;  %v712_v45 = vmul.f32 %v2246_v15, %v2053_v40  ;;  %v692_v52 = vmul.f32 %v2240_v58, %v2399_v44  ;;  %v709_v61 = vmul.f32 %v2246_v15, %v2400_v9 }
  0x93   : > { %v749_v55 = vpack.c.bf16 %v714_v49, %v713_v56  ;;  %v739_v50 = vpack.c.bf16 %v694_v43, %v693_v60  ;;  %v710_v40 = vmul.f32 %v2246_v15, %v2401_v47  ;;  %v689_v31 = vmul.f32 %v2240_v58, %v2402_v12 }
  0x94   : > { %v748_v18 = vpack.c.bf16 %v712_v45, %v711_v3  ;;  %v738_v57 = vpack.c.bf16 %v692_v52, %v691_v33  ;;  %v690_v6 = vmul.f32 %v2240_v58, %v2403_v24 }
  0x95   : > { %v747_v23 = vpack.c.bf16 %v710_v40, %v709_v61 }
  0x96   : > { %v737_v34 = vpack.c.bf16 %v690_v6, %v689_v31 }
  0x9f   : > { %v413_v30 = vpop.xlane.xlu0 %412  ;;  %v417_v17 = vpop.xlane.xlu1 %416 }
  0xa0   : > { %v420_v35 = vmax.f32 %v413_v30, 1e-24  ;;  %v422_v29 = vmax.f32 %v417_v17, 1e-24  ;;  %v2404_v30 = vld [vmem:[#allocation9_spill] sm:$0xff] }
  0xa2   : > { %1681 = vrsqrt.f32 %v420_v35  ;;  %v707_v35 = vmul.f32 %v2246_v15, %v2404_v30 }
  0xa3   : > { %v415_v25 = vpop.xlane.xlu0 %414  ;;  %v419_v22 = vpop.xlane.xlu1 %418 }
  0xa4   : > { %v421_v37 = vmax.f32 %v415_v25, 1e-24  ;;  %v423_v48 = vmax.f32 %v419_v22, 1e-24  ;;  %v2405_v25 = vld [vmem:[#allocation10_spill] sm:$0xff] }
  0xa6   : > { %1683 = vrsqrt.f32 %v421_v37  ;;  %v708_v37 = vmul.f32 %v2246_v15, %v2405_v25  ;;  %v1021_v25 = vld [vmem:[%s254_s5] sm:$0xf] }
  0xa7   : > { %1685 = vrsqrt.f32 %v422_v29 }
  0xa8   : > { %1687 = vrsqrt.f32 %v423_v48  ;;  %v746_v58 = vpack.c.bf16 %v708_v37, %v707_v35  ;;  %v1030_v37 = vsel %vm1028_vm2, %v1021_v25, 0 }
  0xaf   : > { %v1682_v28 = vpop.eup %1681 }
  0xb0   : > { %v428_v32 = vmul.f32 %v1682_v28, %v1775_v4  ;;  %v743_v4 = vpack.c.bf16 %v702_v51, %v701_v8  ;;  %v2407_v8 = vld [vmem:[#allocation7_spill] sm:$0xff] }
  0xb1   : > { %v705_v51 = vmul.f32 %v2246_v15, %v2407_v8 }
  0xb2   : > { %v432_v16 = vpack.c.bf16 %v428_v32, %v428_v32 }
  0xb3   : > { %v1684_v38 = vpop.eup %1683 }
  0xb4   : > { %1573 = vmatmul.mubr.bf16.vlgmr.msra.gmra.mxu0 %v432_v16  ;;  %v429_v2 = vmul.f32 %v1684_v38, %v1777_v5  ;;  %v1686_v14 = vpop.eup %1685  ;;  %v2409_v16 = vld [vmem:[#allocation3_spill] sm:$0xff] }
  0xb5   : > { %1597 = vmatpush3.bf16.msra.mxu0 %v744_v13  ;;  %1612 = vmatprep.mubr.msk.bf16.mxu0 %vm1722_vm1, %v2398_v63  ;;  %v430_v28 = vmul.f32 %v1686_v14, %v2406_v26  ;;  %v1688_v32 = vpop.eup %1687  ;;  %v2408_v13 = vld [vmem:[#allocation8_spill] sm:$0xff] }
  0xb6   : > { %1598 = vmatprep.subr.bf16.mxu0 %v2398_v63  ;;  %v433_v5 = vpack.c.bf16 %v429_v2, %v429_v2  ;;  %v706_v62 = vmul.f32 %v2246_v15, %v2408_v13  ;;  %v431_v38 = vmul.f32 %v1688_v32, %v2409_v16  ;;  %v1023_v13 = vld [vmem:[%s254_s5 + $0x8] sm:$0xf] }
  0xb7   : > { %v434_v10 = vpack.c.bf16 %v430_v28, %v430_v28  ;;  %v1022_v28 = vld [vmem:[%s254_s5 + $0x4] sm:$0xf] }
  0xb8   : > { %1593 = vmatmul.mubr.bf16.vlgmr.msra.gmra.mxu1 %v433_v5  ;;  %v745_v17 = vpack.c.bf16 %v706_v62, %v705_v51  ;;  %v435_v2 = vpack.c.bf16 %v431_v38, %v431_v38  ;;  %v1024_v62 = vld [vmem:[%s254_s5 + $0xc] sm:$0xf] }
  0xb9   : > { %1599 = vmatpush3.bf16.msra.mxu0 %v743_v4  ;;  %1617 = vmatpush3.bf16.msra.mxu1 %v752_v20  ;;  %v1168_v16 = vsel %vm1028_vm2, %v1024_v62, 0 }
  0xba   : > { %1600 = vmatprep.subr.bf16.mxu0 %v2398_v63  ;;  %1618 = vmatprep.subr.bf16.mxu1 %v2398_v63 }
  0xbb   : > { %1632 = vmatprep.mubr.msk.bf16.mxu1 %vm1722_vm1, %v2398_v63 }
  0xbd   : > { %1601 = vmatpush3.bf16.msra.mxu0 %v742_v41  ;;  %1619 = vmatpush3.bf16.msra.mxu1 %v751_v0 }
  0xbe   : > { %1602 = vmatprep.subr.bf16.mxu0 %v2398_v63  ;;  %1620 = vmatprep.subr.bf16.mxu1 %v2398_v63 }
  0xc1   : > { %1603 = vmatpush3.bf16.msra.mxu0 %v741_v1  ;;  %1621 = vmatpush3.bf16.msra.mxu1 %v750_v46 }
  0xc2   : > { %1604 = vmatprep.subr.bf16.mxu0 %v2398_v63  ;;  %1622 = vmatprep.subr.bf16.mxu1 %v2398_v63 }
  0xc5   : > { %1605 = vmatpush3.bf16.msra.mxu0 %v740_v27  ;;  %1623 = vmatpush3.bf16.msra.mxu1 %v749_v55 }
  0xc6   : > { %1606 = vmatprep.subr.bf16.mxu0 %v2398_v63  ;;  %1624 = vmatprep.subr.bf16.mxu1 %v2398_v63 }
  0xc9   : > { %1607 = vmatpush3.bf16.msra.mxu0 %v739_v50  ;;  %1625 = vmatpush3.bf16.msra.mxu1 %v748_v18 }
  0xca   : > { %1608 = vmatprep.subr.bf16.mxu0 %v2398_v63  ;;  %1626 = vmatprep.subr.bf16.mxu1 %v2398_v63 }
  0xcd   : > { %1609 = vmatpush3.bf16.msra.mxu0 %v738_v57  ;;  %1627 = vmatpush3.bf16.msra.mxu1 %v747_v23 }
  0xce   : > { %1610 = vmatprep.subr.bf16.mxu0 %v2398_v63  ;;  %1628 = vmatprep.subr.bf16.mxu1 %v2398_v63 }
  0xd1   : > { %1611 = vmatpush3.bf16.msra.mxu0 %v737_v34  ;;  %1629 = vmatpush3.bf16.msra.mxu1 %v746_v58  ;;  %v1076_v58 = vsel %vm1028_vm2, %v1022_v28, 0 }
  0xd2   : > { %1630 = vmatprep.subr.bf16.mxu1 %v2398_v63  ;;  %1636 = vmatprep.subr.bf16.mxu0 %v2398_v63 }
  0xd3   : > { %v935_v15 = vpop.permute.xlu0 %934 }
  0xd4   : > { %1613 = vmatmul.mubr.bf16.vlgmr.msra.gmra.mxu0 %v434_v10  ;;  %v939_v20 = vpop.permute.xlu1 %938  ;;  %v1122_v10 = vsel %vm1028_vm2, %v1023_v13, 0 }
  0xd5   : > { %1631 = vmatpush3.bf16.msra.mxu1 %v745_v17  ;;  %1638 = vmatprep.mubr.msk.bf16.mxu0 %vm1722_vm1, %v2398_v63 }
  0xd6   : > { %1642 = vmatprep.subr.bf16.mxu1 %v2398_v63  ;;  %1637 = vmatpush3.bf16.msra.mxu0 %v1030_v37 }
  0xd7   : > { %1648 = vmatprep.subr.bf16.mxu0 %v2398_v63 }
  0xd8   : > { %1633 = vmatmul.mubr.bf16.vlgmr.msra.gmra.mxu1 %v435_v2  ;;  %v943_v53 = vpop.permute.xlu1 %942 }
  0xd9   : > { %1644 = vmatprep.mubr.msk.bf16.mxu1 %vm1722_vm1, %v2398_v63  ;;  %1643 = vmatpush3.bf16.msra.mxu1 %v1076_v58 }
  0xda   : > { %1654 = vmatprep.subr.bf16.mxu1 %v2398_v63 }
  0xdc   : > { %v947_v48 = vpop.permute.xlu1 %946 }
 0x174   : > { %v787_v4 = vpop.f32.mrf.mxu0 }
 0x175   : > { %v949_v42 = vmul.f32 %v935_v15, %v787_v4 }
 0x176   : > { %v1574_v19 = vpop.f32.mrf.mxu0 }
 0x177   : > { %v953_v36 = vsel %vm500_vm0, %v949_v42, -inf }
 0x178   : > { %v790_v7 = vpop.f32.mrf.mxu0  ;;  %v827_v5 = vpop.f32.mrf.mxu1  ;;  %954 = vmax.xlane.f32.xlu1 %v953_v36 }
 0x179   : > { %v950_v41 = vmul.f32 %v939_v20, %v827_v5 }
 0x17a   : > { %v1575_v29 = vpop.f32.mrf.mxu0  ;;  %v1594_v39 = vpop.f32.mrf.mxu1 }
 0x17b   : > { %v956_v21 = vsel %vm500_vm0, %v950_v41, -inf }
 0x17c   : > { %957 = vmax.xlane.f32.xlu0 %v956_v21  ;;  %v830_v0 = vpop.f32.mrf.mxu1 }
 0x17e   : > { %v1595_v54 = vpop.f32.mrf.mxu1 }
 0x194   : > { %v867_v22 = vpop.f32.mrf.mxu0 }
 0x195   : > { %v951_v59 = vmul.f32 %v943_v53, %v867_v22 }
 0x196   : > { %v1614_v1 = vpop.f32.mrf.mxu0 }
 0x197   : > { %v959_v11 = vsel %vm500_vm0, %v951_v59, -inf }
 0x198   : > { %v870_v46 = vpop.f32.mrf.mxu0  ;;  %v907_v56 = vpop.f32.mrf.mxu1  ;;  %960 = vmax.xlane.f32.xlu1 %v959_v11 }
 0x199   : > { %v952_v49 = vmul.f32 %v947_v48, %v907_v56 }
 0x19a   : > { %v1615_v27 = vpop.f32.mrf.mxu0  ;;  %v1634_v60 = vpop.f32.mrf.mxu1 }
 0x19b   : > { %v962_v43 = vsel %vm500_vm0, %v952_v49, -inf }
 0x19c   : > { %v910_v55 = vpop.f32.mrf.mxu1  ;;  %963 = vmax.xlane.f32.xlu1 %v962_v43 }
 0x19e   : > { %v1635_v3 = vpop.f32.mrf.mxu1 }
 0x201   : > { %v955_v45 = vpop.xlane.xlu1 %954 }
 0x202   : > { %v965_v50 = vmax.f32 %v955_v45, 0.0 }
 0x204   : > { %v969_v33 = vsub.f32 %v949_v42, %v965_v50  ;;  %v993_v38 = vsub.f32 0.0, %v965_v50 }
 0x205   : > { %v958_v44 = vpop.xlane.xlu0 %957 }
 0x206   : > { %v973_v52 = vmul.f32 1.442695, %v969_v33  ;;  %v966_v18 = vmax.f32 %v958_v44, 0.0  ;;  %v997_v17 = vmul.f32 1.442695, %v993_v38 }
 0x208   : > { %1689 = vpow2.f32 %v973_v52  ;;  %v970_v9 = vsub.f32 %v950_v41, %v966_v18  ;;  %v994_v2 = vsub.f32 0.0, %v966_v18 }
 0x20a   : > { %v975_v61 = vmul.f32 1.442695, %v970_v9  ;;  %v999_v15 = vmul.f32 1.442695, %v994_v2 }
 0x20c   : > { %1691 = vpow2.f32 %v975_v61 }
 0x215   : > { %v1690_v47 = vpop.eup %1689 }
 0x216   : > { %v981_v40 = vsel %vm500_vm0, %v1690_v47, 0.0 }
 0x217   : > { %982 = vadd.xlane.f32.xlu1 %v981_v40 }
 0x219   : > { %v1692_v57 = vpop.eup %1691 }
 0x21a   : > { %v984_v12 = vsel %vm500_vm0, %v1692_v57, 0.0 }
 0x21b   : > { %985 = vadd.xlane.f32.xlu1 %v984_v12 }
 0x221   : > { %v961_v31 = vpop.xlane.xlu1 %960 }
 0x222   : > { %v967_v24 = vmax.f32 %v961_v31, 0.0 }
 0x224   : > { %v971_v6 = vsub.f32 %v951_v59, %v967_v24  ;;  %v995_v5 = vsub.f32 0.0, %v967_v24 }
 0x225   : > { %v964_v14 = vpop.xlane.xlu1 %963 }
 0x226   : > { %v977_v23 = vmul.f32 1.442695, %v971_v6  ;;  %v968_v30 = vmax.f32 %v964_v14, 0.0  ;;  %v1001_v41 = vmul.f32 1.442695, %v995_v5 }
 0x228   : > { %1693 = vpow2.f32 %v977_v23  ;;  %v972_v35 = vsub.f32 %v952_v49, %v968_v30  ;;  %v996_v29 = vsub.f32 0.0, %v968_v30 }
 0x22a   : > { %v979_v34 = vmul.f32 1.442695, %v972_v35  ;;  %v1003_v0 = vmul.f32 1.442695, %v996_v29 }
 0x22c   : > { %1695 = vpow2.f32 %v979_v34 }
 0x22d   : > { %1697 = vpow2.f32 %v997_v17 }
 0x22e   : > { %1699 = vpow2.f32 %v999_v15 }
 0x235   : > { %v1694_v26 = vpop.eup %1693 }
 0x236   : > { %v987_v32 = vsel %vm500_vm0, %v1694_v26, 0.0 }
 0x237   : > { %988 = vadd.xlane.f32.xlu0 %v987_v32 }
 0x239   : > { %v1696_v8 = vpop.eup %1695 }
 0x23a   : > { %v990_v51 = vsel %vm500_vm0, %v1696_v8, 0.0  ;;  %v1698_v4 = vpop.eup %1697 }
 0x23b   : > { %991 = vadd.xlane.f32.xlu1 %v990_v51  ;;  %v1700_v20 = vpop.eup %1699 }
 0x2a0   : > { %v983_v42 = vpop.xlane.xlu1 %982 }
 0x2a1   : > { %v1005_v19 = vadd.f32 %v1698_v4, %v983_v42 }
 0x2a3   : > { %1701 = vrcp.f32 %v1005_v19 }
 0x2a4   : > { %v986_v36 = vpop.xlane.xlu1 %985 }
 0x2a5   : > { %v1006_v7 = vadd.f32 %v1700_v20, %v986_v36 }
 0x2a7   : > { %1703 = vrcp.f32 %v1006_v7 }
 0x2a8   : > { %1705 = vpow2.f32 %v1001_v41 }
 0x2a9   : > { %1707 = vpow2.f32 %v1003_v0 }
 0x2b0   : > { %v1702_v39 = vpop.eup %1701 }
 0x2b1   : > { %v1013_v21 = vmul.f32 %v1702_v39, %v1690_v47 }
 0x2b3   : > { %v1017_v54 = vpack.c.bf16 %v1013_v21, %v1013_v21 }
 0x2b4   : > { %v1704_v53 = vpop.eup %1703 }
 0x2b5   : > { %1639 = vmatmul.mubr.msk.bf16.vlgmr.msra.gmra.mxu0 %vm500_vm0, %v1017_v54  ;;  %v1014_v22 = vmul.f32 %v1704_v53, %v1692_v57  ;;  %v1706_v1 = vpop.eup %1705 }
 0x2b6   : > { %1649 = vmatpush3.bf16.msra.mxu0 %v1122_v10  ;;  %1650 = vmatprep.mubr.msk.bf16.mxu0 %vm1722_vm1, %v2398_v63  ;;  %v1708_v46 = vpop.eup %1707 }
 0x2b7   : > { %v1018_v59 = vpack.c.bf16 %v1014_v22, %v1014_v22 }
 0x2b9   : > { %1645 = vmatmul.mubr.msk.bf16.vlgmr.msra.gmra.mxu1 %vm500_vm0, %v1018_v59 }
 0x2ba   : > { %1655 = vmatpush3.bf16.msra.mxu1 %v1168_v16  ;;  %1656 = vmatprep.mubr.msk.bf16.mxu1 %vm1722_vm1, %v2398_v63 }
 0x2c0   : > { %v989_v48 = vpop.xlane.xlu0 %988 }
 0x2c1   : > { %v1007_v11 = vadd.f32 %v1706_v1, %v989_v48 }
 0x2c3   : > { %1709 = vrcp.f32 %v1007_v11 }
 0x2c4   : > { %v992_v56 = vpop.xlane.xlu1 %991 }
 0x2c5   : > { %v1008_v49 = vadd.f32 %v1708_v46, %v992_v56 }
 0x2c7   : > { %1711 = vrcp.f32 %v1008_v49 }
 0x2d0   : > { %v1710_v27 = vpop.eup %1709 }
 0x2d1   : > { %v1015_v60 = vmul.f32 %v1710_v27, %v1694_v26 }
 0x2d3   : > { %v1019_v43 = vpack.c.bf16 %v1015_v60, %v1015_v60 }
 0x2d4   : > { %v1712_v55 = vpop.eup %1711 }
 0x2d5   : > { %1651 = vmatmul.mubr.msk.bf16.vlgmr.msra.gmra.mxu0 %vm500_vm0, %v1019_v43  ;;  %v1016_v3 = vmul.f32 %v1712_v55, %v1696_v8 }
 0x2d7   : > { %v1020_v45 = vpack.c.bf16 %v1016_v3, %v1016_v3 }
 0x2d9   : > { %1657 = vmatmul.mubr.msk.bf16.vlgmr.msra.gmra.mxu1 %vm500_vm0, %v1020_v45 }
 0x375   : > { %v1066_v63 = vpop.f32.mrf.mxu0 }
 0x377   : > { %v1640_v50 = vpop.f32.mrf.mxu0 }
 0x379   : > { %v1069_v33 = vpop.f32.mrf.mxu0  ;;  %v1112_v44 = vpop.f32.mrf.mxu1 }
 0x37a   : > { %v1472_v52 = vpack.c.bf16 %v1112_v44, %v1066_v63 }
 0x37b   : > { %v1641_v18 = vpop.f32.mrf.mxu0  ;;  %v1646_v9 = vpop.f32.mrf.mxu1 }
 0x37c   : > { %1473 = vst [vmem:[%s265_s8] sm:$0xff] %v1472_v52  }
 0x37d   : > { %v1115_v61 = vpop.f32.mrf.mxu1 }
 0x37f   : > { %v1647_v47 = vpop.f32.mrf.mxu1 }
 0x395   : > { %v1158_v40 = vpop.f32.mrf.mxu0 }
 0x397   : > { %v1652_v57 = vpop.f32.mrf.mxu0 }
 0x399   : > { %v1161_v12 = vpop.f32.mrf.mxu0  ;;  %v1204_v31 = vpop.f32.mrf.mxu1 }
 0x39a   : > { %v1477_v24 = vpack.c.bf16 %v1204_v31, %v1158_v40 }
 0x39b   : > { %v1653_v6 = vpop.f32.mrf.mxu0  ;;  %v1658_v14 = vpop.f32.mrf.mxu1 }
 0x39c   : > { %1511 = vst [vmem:[%s265_s8 + $0x8] sm:$0xff] %v1477_v24  }
 0x39d   : > { %v1207_v23 = vpop.f32.mrf.mxu1 }
 0x39f   : > { %v1659_v30 = vpop.f32.mrf.mxu1 }
 0x3a0 PF: > { %s14_s15 = sadd.s32 1, %s1719_s15  }
 0x3a1   : > { %p11_p4 = scmp.ge.s32.totalorder %s14_s15, 4  }
 0x3a3   :  { %13 = sbr.rel (!%p11_p4) target bundleno = 1 (0x1), region = 75 }

</bundles_post_ra>
